<compile_context>
chip_gen: v7x
topology: tpu7x:2x2x1
jax: 0.10.0
libtpu: 0.0.40
codegen_flags: <defaults>
</compile_context>

<pallas_src>
import functools

import jax
import jax.numpy as jnp
from jax import lax
from jax.experimental import pallas as pl
from jax.experimental.pallas import tpu as pltpu


# ----------------------------------------------------------------------------
# Fused forward kernel
# ----------------------------------------------------------------------------
def _cnn_fused_kernel(p_ref, w1_ref, b1_ref, w2_ref, b2_ref, fcw_ref, fcb_ref,
                      o_ref):
    # p_ref  : [25, 25, L]   conv patches; axis0 = conv2 tap s=(ky2,kx2),
    #                        axis1 = conv1 tap k1=(ky1,kx1),
    #                        lanes L = 4(q1) * 4(q2) * B * 16(oi,oj)
    # w1_ref : [10, 25]      conv1 weight  [Cout, Cin*K*K]
    # b1_ref : [10, 1]       conv1 bias
    # w2_ref : [25, 20, 10]  conv2 weight per tap s: [Cout, Cin]
    # b2_ref : [20, 1]       conv2 bias
    # fcw_ref: [2, 20, B*16] fc weight, tiled over batch along lanes
    # fcb_ref: [1, 2]        fc bias
    # o_ref  : [B, 2]
    L = p_ref.shape[2]
    blk1 = L // 4            # lanes per pool1 phase  (= 128 at B=2)
    blk2 = blk1 // 4         # lanes per pool2 phase  (= 32  at B=2)
    B = o_ref.shape[0]

    w1 = w1_ref[...]         # [10, 25]
    b1 = b1_ref[...]         # [10, 1]
    b2 = b2_ref[...]         # [20, 1]

    # conv2 accumulator over the 25 spatial taps, lanes = (q2, b, oi, oj).
    acc2 = jnp.zeros((20, blk1), jnp.float32)

    for s in range(25):      # conv2 taps (ky2, kx2), fully unrolled
        # conv1 for every h1 value tap s needs (all 4 pool1 phases at once):
        # [10, 25] @ [25, L] -> [10, L]   (lane-dense MXU matmul)
        hs = jnp.dot(w1, p_ref[s], preferred_element_type=jnp.float32)
        # maxpool1 = max over the 4 q1 lane blocks, then bias + ReLU.
        m1 = jnp.maximum(
            jnp.maximum(hs[:, 0 * blk1:1 * blk1], hs[:, 1 * blk1:2 * blk1]),
            jnp.maximum(hs[:, 2 * blk1:3 * blk1], hs[:, 3 * blk1:4 * blk1]),
        )
        a1 = jnp.maximum(m1 + b1, 0.0)                       # [10, blk1]
        # conv2: channel-mixing matmul for this tap, accumulated.
        acc2 = acc2 + jnp.dot(w2_ref[s], a1,
                              preferred_element_type=jnp.float32)  # [20, blk1]

    # maxpool2 = max over the 4 q2 lane sub-blocks, then bias + ReLU.
    m2 = jnp.maximum(
        jnp.maximum(acc2[:, 0 * blk2:1 * blk2], acc2[:, 1 * blk2:2 * blk2]),
        jnp.maximum(acc2[:, 2 * blk2:3 * blk2], acc2[:, 3 * blk2:4 * blk2]),
    )
    a2 = jnp.maximum(m2 + b2, 0.0)          # [20, B*16], lanes = b*16 + oi*4 + oj

    # fc epilogue: out[b, o] = sum_{c,pos} fcw[o,c,b*16+pos] * a2[c,b*16+pos] + fcb[o]
    row_i = lax.broadcasted_iota(jnp.int32, (B, 2), 0)
    col_i = lax.broadcasted_iota(jnp.int32, (B, 2), 1)
    out = jnp.zeros((B, 2), jnp.float32)
    for o in range(2):
        prod = fcw_ref[o] * a2              # [20, B*16]
        for b in range(B):
            s_bo = jnp.sum(prod[:, b * 16:(b + 1) * 16])     # scalar
            out = out + jnp.where((row_i == b) & (col_i == o), s_bo, 0.0)
    o_ref[...] = out + fcb_ref[...]


# ----------------------------------------------------------------------------
# Glue: build the nested conv/pool patch tensor (layout plumbing only)
# ----------------------------------------------------------------------------
def _build_patches(x):
    """x: [B, 1, 28, 28] -> [25, 25, 256*B] patch tensor for the fused kernel.

    Lane (last-axis) order: (q1, q2, b, oi, oj) where
      q1 = (dy1, dx1) pool1 phase, q2 = (di2, dj2) pool2 phase,
      (oi, oj) in [0,4)^2 is the final 4x4 spatial position,
    so that both max-pools are maxima over 4 statically sliced lane blocks.
    """
    B = x.shape[0]
    xs = x[:, 0]                                                      # [B, 28, 28]
    # conv1 taps k1 = ky1*5 + kx1 at full 24x24 resolution.
    pa = jnp.stack([xs[:, ky:ky + 24, kx:kx + 24]
                    for ky in range(5) for kx in range(5)], axis=0)   # [25, B, 24, 24]
    # split by pool1 phase q1 = dy*2 + dx.
    pb = jnp.stack([pa[:, :, dy::2, dx::2]
                    for dy in range(2) for dx in range(2)], axis=0)   # [4, 25, B, 12, 12]
    # conv2 taps s = ky2*5 + kx2 at 8x8 resolution.
    pc = jnp.stack([pb[:, :, :, ky:ky + 8, kx:kx + 8]
                    for ky in range(5) for kx in range(5)], axis=0)   # [25, 4, 25, B, 8, 8]
    # split by pool2 phase q2 = di*2 + dj.
    pd = jnp.stack([pc[..., di::2, dj::2]
                    for di in range(2) for dj in range(2)], axis=0)   # [4, 25, 4, 25, B, 4, 4]
    # -> [s, k1, q1, q2, b, oi, oj], then flatten the column axes.
    pe = pd.transpose(1, 3, 2, 0, 4, 5, 6)                            # [25, 25, 4, 4, B, 4, 4]
    return pe.reshape(25, 25, -1)


# ----------------------------------------------------------------------------
# Forward pass
# ----------------------------------------------------------------------------
@jax.jit
def cnn_forward(params, x):
    B = x.shape[0]
    patches = _build_patches(x)                                       # [25, 25, 256*B]
    w1 = params["conv1_w"].reshape(10, 25)                            # [Cout, Cin*K*K]
    b1 = params["conv1_b"].reshape(10, 1)
    w2 = params["conv2_w"].transpose(2, 3, 0, 1).reshape(25, 20, 10)  # per-tap [Cout, Cin]
    b2 = params["conv2_b"].reshape(20, 1)
    fcw = jnp.tile(params["fc_w"].reshape(2, 20, 16), (1, 1, B))      # [2, 20, B*16]
    fcb = params["fc_b"].reshape(1, 2)

    vmem = functools.partial(pl.BlockSpec, memory_space=pltpu.MemorySpace.VMEM)
    return pl.pallas_call(
        _cnn_fused_kernel,
        out_shape=jax.ShapeDtypeStruct((B, 2), jnp.float32),
        in_specs=[vmem() for _ in range(7)],
        out_specs=vmem(),
    )(patches, w1, b1, w2, b2, fcw, fcb)


# ----------------------------------------------------------------------------
# Pure-JAX reference (for self-check) and parameter init
# ----------------------------------------------------------------------------
def _reference_forward(params, x):
    dn = ("NCHW", "OIHW", "NCHW")
    hp = lax.Precision.HIGHEST
    h = lax.conv_general_dilated(x, params["conv1_w"], (1, 1), "VALID",
                                 dimension_numbers=dn, precision=hp)
    h = h + params["conv1_b"][None, :, None, None]
    h = lax.reduce_window(h, -jnp.inf, lax.max, (1, 1, 2, 2), (1, 1, 2, 2), "VALID")
    h = jnp.maximum(h, 0.0)
    h = lax.conv_general_dilated(h, params["conv2_w"], (1, 1), "VALID",
                                 dimension_numbers=dn, precision=hp)
    h = h + params["conv2_b"][None, :, None, None]
    h = lax.reduce_window(h, -jnp.inf, lax.max, (1, 1, 2, 2), (1, 1, 2, 2), "VALID")
    h = jnp.maximum(h, 0.0)
    h = h.reshape(x.shape[0], -1)
    return jnp.dot(h, params["fc_w"].T, precision=hp) + params["fc_b"]


def init_params(key):
    def uniform(key, shape, fan_in):
        bound = 1.0 / jnp.sqrt(jnp.float32(fan_in))
        return jax.random.uniform(key, shape, dtype=jnp.float32,
                                  minval=-bound, maxval=bound)

    keys = jax.random.split(key, 6)
    return {
        "conv1_w": uniform(keys[0], (10, 1, 5, 5), 1 * 5 * 5),
        "conv1_b": uniform(keys[1], (10,), 1 * 5 * 5),
        "conv2_w": uniform(keys[2], (20, 10, 5, 5), 10 * 5 * 5),
        "conv2_b": uniform(keys[3], (20,), 10 * 5 * 5),
        "fc_w": uniform(keys[4], (2, 320), 320),   # PyTorch Linear: [out, in]
        "fc_b": uniform(keys[5], (2,), 320),
    }


if __name__ == "__main__":
    key = jax.random.PRNGKey(0)
    pkey, xkey = jax.random.split(key)
    params = init_params(pkey)
    # The fc layer's 320 = 20*4*4 features imply a 28x28 single-channel input.
    x = jax.random.normal(xkey, (2, 1, 28, 28), dtype=jnp.float32)

    out = cnn_forward(params, x)
    jax.block_until_ready(out)
    assert out.shape == (2, 2) and out.dtype == jnp.float32

    ref = _reference_forward(params, x)
    assert jnp.allclose(out, ref, rtol=1e-2, atol=1e-2), (out, ref)
    print("KERNEL_OK")
</pallas_src>

<mosaic_0001>
module attributes {stable_mosaic.version = 11 : i64} {
  func.func @_cnn_fused_kernel(%arg0: memref<25x25x512xf32, #tpu.memory_space<vmem>>, %arg1: memref<10x25xf32, #tpu.memory_space<vmem>>, %arg2: memref<10x1xf32, #tpu.memory_space<vmem>>, %arg3: memref<25x20x10xf32, #tpu.memory_space<vmem>>, %arg4: memref<20x1xf32, #tpu.memory_space<vmem>>, %arg5: memref<2x20x32xf32, #tpu.memory_space<vmem>>, %arg6: memref<1x2xf32, #tpu.memory_space<vmem>>, %arg7: memref<2x2xf32, #tpu.memory_space<vmem>>) attributes {dimension_semantics = [], scalar_prefetch = 0 : i64, scratch_operands = 0 : i64, tpu.core_type = #tpu.core_type<tc>} {
    %c0 = arith.constant 0 : index
    %c0_0 = arith.constant 0 : index
    %0 = vector.load %arg1[%c0, %c0_0] : memref<10x25xf32, #tpu.memory_space<vmem>>, vector<10x25xf32>
    %c0_1 = arith.constant 0 : index
    %c0_2 = arith.constant 0 : index
    %1 = vector.load %arg2[%c0_1, %c0_2] : memref<10x1xf32, #tpu.memory_space<vmem>>, vector<10x1xf32>
    %c0_3 = arith.constant 0 : index
    %c0_4 = arith.constant 0 : index
    %2 = vector.load %arg4[%c0_3, %c0_4] : memref<20x1xf32, #tpu.memory_space<vmem>>, vector<20x1xf32>
    %cst = arith.constant 0.000000e+00 : f32
    %3 = vector.broadcast %cst : f32 to vector<20x128xf32>
    %c0_5 = arith.constant 0 : index
    %c0_6 = arith.constant 0 : index
    %c0_7 = arith.constant 0 : index
    %4 = vector.load %arg0[%c0_5, %c0_6, %c0_7] : memref<25x25x512xf32, #tpu.memory_space<vmem>>, vector<1x25x512xf32>
    %5 = vector.shape_cast %4 : vector<1x25x512xf32> to vector<25x512xf32>
    %cst_8 = arith.constant dense<0.000000e+00> : vector<10x512xf32>
    %6 = tpu.matmul %0, %5, %cst_8 {dimension_numbers = #tpu.dot_dimension_numbers<[1], [0], [0], [1], [0, 0, 1, 1], [], []>} : vector<10x25xf32>, vector<25x512xf32>, vector<10x512xf32> -> vector<10x512xf32>
    %7 = vector.extract_strided_slice %6 {offsets = [0, 0], sizes = [10, 128], strides = [1, 1]} : vector<10x512xf32> to vector<10x128xf32>
    %8 = vector.extract_strided_slice %6 {offsets = [0, 128], sizes = [10, 128], strides = [1, 1]} : vector<10x512xf32> to vector<10x128xf32>
    %9 = arith.maximumf %7, %8 : vector<10x128xf32>
    %10 = vector.extract_strided_slice %6 {offsets = [0, 256], sizes = [10, 128], strides = [1, 1]} : vector<10x512xf32> to vector<10x128xf32>
    %11 = vector.extract_strided_slice %6 {offsets = [0, 384], sizes = [10, 128], strides = [1, 1]} : vector<10x512xf32> to vector<10x128xf32>
    %12 = arith.maximumf %10, %11 : vector<10x128xf32>
    %13 = arith.maximumf %9, %12 : vector<10x128xf32>
    %14 = vector.broadcast %1 : vector<10x1xf32> to vector<10x128xf32>
    %15 = arith.addf %13, %14 : vector<10x128xf32>
    %cst_9 = arith.constant 0.000000e+00 : f32
    %16 = vector.broadcast %cst_9 : f32 to vector<10x128xf32>
    %17 = arith.maximumf %15, %16 : vector<10x128xf32>
    %c0_10 = arith.constant 0 : index
    %c0_11 = arith.constant 0 : index
    %c0_12 = arith.constant 0 : index
    %18 = vector.load %arg3[%c0_10, %c0_11, %c0_12] : memref<25x20x10xf32, #tpu.memory_space<vmem>>, vector<1x20x10xf32>
    %19 = vector.shape_cast %18 : vector<1x20x10xf32> to vector<20x10xf32>
    %cst_13 = arith.constant dense<0.000000e+00> : vector<20x128xf32>
    %20 = tpu.matmul %19, %17, %cst_13 {dimension_numbers = #tpu.dot_dimension_numbers<[1], [0], [0], [1], [0, 0, 1, 1], [], []>} : vector<20x10xf32>, vector<10x128xf32>, vector<20x128xf32> -> vector<20x128xf32>
    %21 = arith.addf %3, %20 : vector<20x128xf32>
    %c1 = arith.constant 1 : index
    %c0_14 = arith.constant 0 : index
    %c0_15 = arith.constant 0 : index
    %22 = vector.load %arg0[%c1, %c0_14, %c0_15] : memref<25x25x512xf32, #tpu.memory_space<vmem>>, vector<1x25x512xf32>
    %23 = vector.shape_cast %22 : vector<1x25x512xf32> to vector<25x512xf32>
    %cst_16 = arith.constant dense<0.000000e+00> : vector<10x512xf32>
    %24 = tpu.matmul %0, %23, %cst_16 {dimension_numbers = #tpu.dot_dimension_numbers<[1], [0], [0], [1], [0, 0, 1, 1], [], []>} : vector<10x25xf32>, vector<25x512xf32>, vector<10x512xf32> -> vector<10x512xf32>
    %25 = vector.extract_strided_slice %24 {offsets = [0, 0], sizes = [10, 128], strides = [1, 1]} : vector<10x512xf32> to vector<10x128xf32>
    %26 = vector.extract_strided_slice %24 {offsets = [0, 128], sizes = [10, 128], strides = [1, 1]} : vector<10x512xf32> to vector<10x128xf32>
    %27 = arith.maximumf %25, %26 : vector<10x128xf32>
    %28 = vector.extract_strided_slice %24 {offsets = [0, 256], sizes = [10, 128], strides = [1, 1]} : vector<10x512xf32> to vector<10x128xf32>
    %29 = vector.extract_strided_slice %24 {offsets = [0, 384], sizes = [10, 128], strides = [1, 1]} : vector<10x512xf32> to vector<10x128xf32>
    %30 = arith.maximumf %28, %29 : vector<10x128xf32>
    %31 = arith.maximumf %27, %30 : vector<10x128xf32>
    %32 = vector.broadcast %1 : vector<10x1xf32> to vector<10x128xf32>
    %33 = arith.addf %31, %32 : vector<10x128xf32>
    %cst_17 = arith.constant 0.000000e+00 : f32
    %34 = vector.broadcast %cst_17 : f32 to vector<10x128xf32>
    %35 = arith.maximumf %33, %34 : vector<10x128xf32>
    %c1_18 = arith.constant 1 : index
    %c0_19 = arith.constant 0 : index
    %c0_20 = arith.constant 0 : index
    %36 = vector.load %arg3[%c1_18, %c0_19, %c0_20] : memref<25x20x10xf32, #tpu.memory_space<vmem>>, vector<1x20x10xf32>
    %37 = vector.shape_cast %36 : vector<1x20x10xf32> to vector<20x10xf32>
    %cst_21 = arith.constant dense<0.000000e+00> : vector<20x128xf32>
    %38 = tpu.matmul %37, %35, %cst_21 {dimension_numbers = #tpu.dot_dimension_numbers<[1], [0], [0], [1], [0, 0, 1, 1], [], []>} : vector<20x10xf32>, vector<10x128xf32>, vector<20x128xf32> -> vector<20x128xf32>
    %39 = arith.addf %21, %38 : vector<20x128xf32>
    %c2 = arith.constant 2 : index
    %c0_22 = arith.constant 0 : index
    %c0_23 = arith.constant 0 : index
    %40 = vector.load %arg0[%c2, %c0_22, %c0_23] : memref<25x25x512xf32, #tpu.memory_space<vmem>>, vector<1x25x512xf32>
    %41 = vector.shape_cast %40 : vector<1x25x512xf32> to vector<25x512xf32>
    %cst_24 = arith.constant dense<0.000000e+00> : vector<10x512xf32>
    %42 = tpu.matmul %0, %41, %cst_24 {dimension_numbers = #tpu.dot_dimension_numbers<[1], [0], [0], [1], [0, 0, 1, 1], [], []>} : vector<10x25xf32>, vector<25x512xf32>, vector<10x512xf32> -> vector<10x512xf32>
    %43 = vector.extract_strided_slice %42 {offsets = [0, 0], sizes = [10, 128], strides = [1, 1]} : vector<10x512xf32> to vector<10x128xf32>
    %44 = vector.extract_strided_slice %42 {offsets = [0, 128], sizes = [10, 128], strides = [1, 1]} : vector<10x512xf32> to vector<10x128xf32>
    %45 = arith.maximumf %43, %44 : vector<10x128xf32>
    %46 = vector.extract_strided_slice %42 {offsets = [0, 256], sizes = [10, 128], strides = [1, 1]} : vector<10x512xf32> to vector<10x128xf32>
    %47 = vector.extract_strided_slice %42 {offsets = [0, 384], sizes = [10, 128], strides = [1, 1]} : vector<10x512xf32> to vector<10x128xf32>
    %48 = arith.maximumf %46, %47 : vector<10x128xf32>
    %49 = arith.maximumf %45, %48 : vector<10x128xf32>
    %50 = vector.broadcast %1 : vector<10x1xf32> to vector<10x128xf32>
    %51 = arith.addf %49, %50 : vector<10x128xf32>
    %cst_25 = arith.constant 0.000000e+00 : f32
    %52 = vector.broadcast %cst_25 : f32 to vector<10x128xf32>
    %53 = arith.maximumf %51, %52 : vector<10x128xf32>
    %c2_26 = arith.constant 2 : index
    %c0_27 = arith.constant 0 : index
    %c0_28 = arith.constant 0 : index
    %54 = vector.load %arg3[%c2_26, %c0_27, %c0_28] : memref<25x20x10xf32, #tpu.memory_space<vmem>>, vector<1x20x10xf32>
    %55 = vector.shape_cast %54 : vector<1x20x10xf32> to vector<20x10xf32>
    %cst_29 = arith.constant dense<0.000000e+00> : vector<20x128xf32>
    %56 = tpu.matmul %55, %53, %cst_29 {dimension_numbers = #tpu.dot_dimension_numbers<[1], [0], [0], [1], [0, 0, 1, 1], [], []>} : vector<20x10xf32>, vector<10x128xf32>, vector<20x128xf32> -> vector<20x128xf32>
    %57 = arith.addf %39, %56 : vector<20x128xf32>
    %c3 = arith.constant 3 : index
    %c0_30 = arith.constant 0 : index
    %c0_31 = arith.constant 0 : index
    %58 = vector.load %arg0[%c3, %c0_30, %c0_31] : memref<25x25x512xf32, #tpu.memory_space<vmem>>, vector<1x25x512xf32>
    %59 = vector.shape_cast %58 : vector<1x25x512xf32> to vector<25x512xf32>
    %cst_32 = arith.constant dense<0.000000e+00> : vector<10x512xf32>
    %60 = tpu.matmul %0, %59, %cst_32 {dimension_numbers = #tpu.dot_dimension_numbers<[1], [0], [0], [1], [0, 0, 1, 1], [], []>} : vector<10x25xf32>, vector<25x512xf32>, vector<10x512xf32> -> vector<10x512xf32>
    %61 = vector.extract_strided_slice %60 {offsets = [0, 0], sizes = [10, 128], strides = [1, 1]} : vector<10x512xf32> to vector<10x128xf32>
    %62 = vector.extract_strided_slice %60 {offsets = [0, 128], sizes = [10, 128], strides = [1, 1]} : vector<10x512xf32> to vector<10x128xf32>
    %63 = arith.maximumf %61, %62 : vector<10x128xf32>
    %64 = vector.extract_strided_slice %60 {offsets = [0, 256], sizes = [10, 128], strides = [1, 1]} : vector<10x512xf32> to vector<10x128xf32>
    %65 = vector.extract_strided_slice %60 {offsets = [0, 384], sizes = [10, 128], strides = [1, 1]} : vector<10x512xf32> to vector<10x128xf32>
    %66 = arith.maximumf %64, %65 : vector<10x128xf32>
    %67 = arith.maximumf %63, %66 : vector<10x128xf32>
    %68 = vector.broadcast %1 : vector<10x1xf32> to vector<10x128xf32>
    %69 = arith.addf %67, %68 : vector<10x128xf32>
    %cst_33 = arith.constant 0.000000e+00 : f32
    %70 = vector.broadcast %cst_33 : f32 to vector<10x128xf32>
    %71 = arith.maximumf %69, %70 : vector<10x128xf32>
    %c3_34 = arith.constant 3 : index
    %c0_35 = arith.constant 0 : index
    %c0_36 = arith.constant 0 : index
    %72 = vector.load %arg3[%c3_34, %c0_35, %c0_36] : memref<25x20x10xf32, #tpu.memory_space<vmem>>, vector<1x20x10xf32>
    %73 = vector.shape_cast %72 : vector<1x20x10xf32> to vector<20x10xf32>
    %cst_37 = arith.constant dense<0.000000e+00> : vector<20x128xf32>
    %74 = tpu.matmul %73, %71, %cst_37 {dimension_numbers = #tpu.dot_dimension_numbers<[1], [0], [0], [1], [0, 0, 1, 1], [], []>} : vector<20x10xf32>, vector<10x128xf32>, vector<20x128xf32> -> vector<20x128xf32>
    %75 = arith.addf %57, %74 : vector<20x128xf32>
    %c4 = arith.constant 4 : index
    %c0_38 = arith.constant 0 : index
    %c0_39 = arith.constant 0 : index
    %76 = vector.load %arg0[%c4, %c0_38, %c0_39] : memref<25x25x512xf32, #tpu.memory_space<vmem>>, vector<1x25x512xf32>
    %77 = vector.shape_cast %76 : vector<1x25x512xf32> to vector<25x512xf32>
    %cst_40 = arith.constant dense<0.000000e+00> : vector<10x512xf32>
    %78 = tpu.matmul %0, %77, %cst_40 {dimension_numbers = #tpu.dot_dimension_numbers<[1], [0], [0], [1], [0, 0, 1, 1], [], []>} : vector<10x25xf32>, vector<25x512xf32>, vector<10x512xf32> -> vector<10x512xf32>
    %79 = vector.extract_strided_slice %78 {offsets = [0, 0], sizes = [10, 128], strides = [1, 1]} : vector<10x512xf32> to vector<10x128xf32>
    %80 = vector.extract_strided_slice %78 {offsets = [0, 128], sizes = [10, 128], strides = [1, 1]} : vector<10x512xf32> to vector<10x128xf32>
    %81 = arith.maximumf %79, %80 : vector<10x128xf32>
    %82 = vector.extract_strided_slice %78 {offsets = [0, 256], sizes = [10, 128], strides = [1, 1]} : vector<10x512xf32> to vector<10x128xf32>
    %83 = vector.extract_strided_slice %78 {offsets = [0, 384], sizes = [10, 128], strides = [1, 1]} : vector<10x512xf32> to vector<10x128xf32>
    %84 = arith.maximumf %82, %83 : vector<10x128xf32>
    %85 = arith.maximumf %81, %84 : vector<10x128xf32>
    %86 = vector.broadcast %1 : vector<10x1xf32> to vector<10x128xf32>
    %87 = arith.addf %85, %86 : vector<10x128xf32>
    %cst_41 = arith.constant 0.000000e+00 : f32
    %88 = vector.broadcast %cst_41 : f32 to vector<10x128xf32>
    %89 = arith.maximumf %87, %88 : vector<10x128xf32>
    %c4_42 = arith.constant 4 : index
    %c0_43 = arith.constant 0 : index
    %c0_44 = arith.constant 0 : index
    %90 = vector.load %arg3[%c4_42, %c0_43, %c0_44] : memref<25x20x10xf32, #tpu.memory_space<vmem>>, vector<1x20x10xf32>
    %91 = vector.shape_cast %90 : vector<1x20x10xf32> to vector<20x10xf32>
    %cst_45 = arith.constant dense<0.000000e+00> : vector<20x128xf32>
    %92 = tpu.matmul %91, %89, %cst_45 {dimension_numbers = #tpu.dot_dimension_numbers<[1], [0], [0], [1], [0, 0, 1, 1], [], []>} : vector<20x10xf32>, vector<10x128xf32>, vector<20x128xf32> -> vector<20x128xf32>
    %93 = arith.addf %75, %92 : vector<20x128xf32>
    %c5 = arith.constant 5 : index
    %c0_46 = arith.constant 0 : index
    %c0_47 = arith.constant 0 : index
    %94 = vector.load %arg0[%c5, %c0_46, %c0_47] : memref<25x25x512xf32, #tpu.memory_space<vmem>>, vector<1x25x512xf32>
    %95 = vector.shape_cast %94 : vector<1x25x512xf32> to vector<25x512xf32>
    %cst_48 = arith.constant dense<0.000000e+00> : vector<10x512xf32>
    %96 = tpu.matmul %0, %95, %cst_48 {dimension_numbers = #tpu.dot_dimension_numbers<[1], [0], [0], [1], [0, 0, 1, 1], [], []>} : vector<10x25xf32>, vector<25x512xf32>, vector<10x512xf32> -> vector<10x512xf32>
    %97 = vector.extract_strided_slice %96 {offsets = [0, 0], sizes = [10, 128], strides = [1, 1]} : vector<10x512xf32> to vector<10x128xf32>
    %98 = vector.extract_strided_slice %96 {offsets = [0, 128], sizes = [10, 128], strides = [1, 1]} : vector<10x512xf32> to vector<10x128xf32>
    %99 = arith.maximumf %97, %98 : vector<10x128xf32>
    %100 = vector.extract_strided_slice %96 {offsets = [0, 256], sizes = [10, 128], strides = [1, 1]} : vector<10x512xf32> to vector<10x128xf32>
    %101 = vector.extract_strided_slice %96 {offsets = [0, 384], sizes = [10, 128], strides = [1, 1]} : vector<10x512xf32> to vector<10x128xf32>
    %102 = arith.maximumf %100, %101 : vector<10x128xf32>
    %103 = arith.maximumf %99, %102 : vector<10x128xf32>
    %104 = vector.broadcast %1 : vector<10x1xf32> to vector<10x128xf32>
    %105 = arith.addf %103, %104 : vector<10x128xf32>
    %cst_49 = arith.constant 0.000000e+00 : f32
    %106 = vector.broadcast %cst_49 : f32 to vector<10x128xf32>
    %107 = arith.maximumf %105, %106 : vector<10x128xf32>
    %c5_50 = arith.constant 5 : index
    %c0_51 = arith.constant 0 : index
    %c0_52 = arith.constant 0 : index
    %108 = vector.load %arg3[%c5_50, %c0_51, %c0_52] : memref<25x20x10xf32, #tpu.memory_space<vmem>>, vector<1x20x10xf32>
    %109 = vector.shape_cast %108 : vector<1x20x10xf32> to vector<20x10xf32>
    %cst_53 = arith.constant dense<0.000000e+00> : vector<20x128xf32>
    %110 = tpu.matmul %109, %107, %cst_53 {dimension_numbers = #tpu.dot_dimension_numbers<[1], [0], [0], [1], [0, 0, 1, 1], [], []>} : vector<20x10xf32>, vector<10x128xf32>, vector<20x128xf32> -> vector<20x128xf32>
    %111 = arith.addf %93, %110 : vector<20x128xf32>
    %c6 = arith.constant 6 : index
    %c0_54 = arith.constant 0 : index
    %c0_55 = arith.constant 0 : index
    %112 = vector.load %arg0[%c6, %c0_54, %c0_55] : memref<25x25x512xf32, #tpu.memory_space<vmem>>, vector<1x25x512xf32>
    %113 = vector.shape_cast %112 : vector<1x25x512xf32> to vector<25x512xf32>
    %cst_56 = arith.constant dense<0.000000e+00> : vector<10x512xf32>
    %114 = tpu.matmul %0, %113, %cst_56 {dimension_numbers = #tpu.dot_dimension_numbers<[1], [0], [0], [1], [0, 0, 1, 1], [], []>} : vector<10x25xf32>, vector<25x512xf32>, vector<10x512xf32> -> vector<10x512xf32>
    %115 = vector.extract_strided_slice %114 {offsets = [0, 0], sizes = [10, 128], strides = [1, 1]} : vector<10x512xf32> to vector<10x128xf32>
    %116 = vector.extract_strided_slice %114 {offsets = [0, 128], sizes = [10, 128], strides = [1, 1]} : vector<10x512xf32> to vector<10x128xf32>
    %117 = arith.maximumf %115, %116 : vector<10x128xf32>
    %118 = vector.extract_strided_slice %114 {offsets = [0, 256], sizes = [10, 128], strides = [1, 1]} : vector<10x512xf32> to vector<10x128xf32>
    %119 = vector.extract_strided_slice %114 {offsets = [0, 384], sizes = [10, 128], strides = [1, 1]} : vector<10x512xf32> to vector<10x128xf32>
    %120 = arith.maximumf %118, %119 : vector<10x128xf32>
    %121 = arith.maximumf %117, %120 : vector<10x128xf32>
    %122 = vector.broadcast %1 : vector<10x1xf32> to vector<10x128xf32>
    %123 = arith.addf %121, %122 : vector<10x128xf32>
    %cst_57 = arith.constant 0.000000e+00 : f32
    %124 = vector.broadcast %cst_57 : f32 to vector<10x128xf32>
    %125 = arith.maximumf %123, %124 : vector<10x128xf32>
    %c6_58 = arith.constant 6 : index
    %c0_59 = arith.constant 0 : index
    %c0_60 = arith.constant 0 : index
    %126 = vector.load %arg3[%c6_58, %c0_59, %c0_60] : memref<25x20x10xf32, #tpu.memory_space<vmem>>, vector<1x20x10xf32>
    %127 = vector.shape_cast %126 : vector<1x20x10xf32> to vector<20x10xf32>
    %cst_61 = arith.constant dense<0.000000e+00> : vector<20x128xf32>
    %128 = tpu.matmul %127, %125, %cst_61 {dimension_numbers = #tpu.dot_dimension_numbers<[1], [0], [0], [1], [0, 0, 1, 1], [], []>} : vector<20x10xf32>, vector<10x128xf32>, vector<20x128xf32> -> vector<20x128xf32>
    %129 = arith.addf %111, %128 : vector<20x128xf32>
    %c7 = arith.constant 7 : index
    %c0_62 = arith.constant 0 : index
    %c0_63 = arith.constant 0 : index
    %130 = vector.load %arg0[%c7, %c0_62, %c0_63] : memref<25x25x512xf32, #tpu.memory_space<vmem>>, vector<1x25x512xf32>
    %131 = vector.shape_cast %130 : vector<1x25x512xf32> to vector<25x512xf32>
    %cst_64 = arith.constant dense<0.000000e+00> : vector<10x512xf32>
    %132 = tpu.matmul %0, %131, %cst_64 {dimension_numbers = #tpu.dot_dimension_numbers<[1], [0], [0], [1], [0, 0, 1, 1], [], []>} : vector<10x25xf32>, vector<25x512xf32>, vector<10x512xf32> -> vector<10x512xf32>
    %133 = vector.extract_strided_slice %132 {offsets = [0, 0], sizes = [10, 128], strides = [1, 1]} : vector<10x512xf32> to vector<10x128xf32>
    %134 = vector.extract_strided_slice %132 {offsets = [0, 128], sizes = [10, 128], strides = [1, 1]} : vector<10x512xf32> to vector<10x128xf32>
    %135 = arith.maximumf %133, %134 : vector<10x128xf32>
    %136 = vector.extract_strided_slice %132 {offsets = [0, 256], sizes = [10, 128], strides = [1, 1]} : vector<10x512xf32> to vector<10x128xf32>
    %137 = vector.extract_strided_slice %132 {offsets = [0, 384], sizes = [10, 128], strides = [1, 1]} : vector<10x512xf32> to vector<10x128xf32>
    %138 = arith.maximumf %136, %137 : vector<10x128xf32>
    %139 = arith.maximumf %135, %138 : vector<10x128xf32>
    %140 = vector.broadcast %1 : vector<10x1xf32> to vector<10x128xf32>
    %141 = arith.addf %139, %140 : vector<10x128xf32>
    %cst_65 = arith.constant 0.000000e+00 : f32
    %142 = vector.broadcast %cst_65 : f32 to vector<10x128xf32>
    %143 = arith.maximumf %141, %142 : vector<10x128xf32>
    %c7_66 = arith.constant 7 : index
    %c0_67 = arith.constant 0 : index
    %c0_68 = arith.constant 0 : index
    %144 = vector.load %arg3[%c7_66, %c0_67, %c0_68] : memref<25x20x10xf32, #tpu.memory_space<vmem>>, vector<1x20x10xf32>
    %145 = vector.shape_cast %144 : vector<1x20x10xf32> to vector<20x10xf32>
    %cst_69 = arith.constant dense<0.000000e+00> : vector<20x128xf32>
    %146 = tpu.matmul %145, %143, %cst_69 {dimension_numbers = #tpu.dot_dimension_numbers<[1], [0], [0], [1], [0, 0, 1, 1], [], []>} : vector<20x10xf32>, vector<10x128xf32>, vector<20x128xf32> -> vector<20x128xf32>
    %147 = arith.addf %129, %146 : vector<20x128xf32>
    %c8 = arith.constant 8 : index
    %c0_70 = arith.constant 0 : index
    %c0_71 = arith.constant 0 : index
    %148 = vector.load %arg0[%c8, %c0_70, %c0_71] : memref<25x25x512xf32, #tpu.memory_space<vmem>>, vector<1x25x512xf32>
    %149 = vector.shape_cast %148 : vector<1x25x512xf32> to vector<25x512xf32>
    %cst_72 = arith.constant dense<0.000000e+00> : vector<10x512xf32>
    %150 = tpu.matmul %0, %149, %cst_72 {dimension_numbers = #tpu.dot_dimension_numbers<[1], [0], [0], [1], [0, 0, 1, 1], [], []>} : vector<10x25xf32>, vector<25x512xf32>, vector<10x512xf32> -> vector<10x512xf32>
    %151 = vector.extract_strided_slice %150 {offsets = [0, 0], sizes = [10, 128], strides = [1, 1]} : vector<10x512xf32> to vector<10x128xf32>
    %152 = vector.extract_strided_slice %150 {offsets = [0, 128], sizes = [10, 128], strides = [1, 1]} : vector<10x512xf32> to vector<10x128xf32>
    %153 = arith.maximumf %151, %152 : vector<10x128xf32>
    %154 = vector.extract_strided_slice %150 {offsets = [0, 256], sizes = [10, 128], strides = [1, 1]} : vector<10x512xf32> to vector<10x128xf32>
    %155 = vector.extract_strided_slice %150 {offsets = [0, 384], sizes = [10, 128], strides = [1, 1]} : vector<10x512xf32> to vector<10x128xf32>
    %156 = arith.maximumf %154, %155 : vector<10x128xf32>
    %157 = arith.maximumf %153, %156 : vector<10x128xf32>
    %158 = vector.broadcast %1 : vector<10x1xf32> to vector<10x128xf32>
    %159 = arith.addf %157, %158 : vector<10x128xf32>
    %cst_73 = arith.constant 0.000000e+00 : f32
    %160 = vector.broadcast %cst_73 : f32 to vector<10x128xf32>
    %161 = arith.maximumf %159, %160 : vector<10x128xf32>
    %c8_74 = arith.constant 8 : index
    %c0_75 = arith.constant 0 : index
    %c0_76 = arith.constant 0 : index
    %162 = vector.load %arg3[%c8_74, %c0_75, %c0_76] : memref<25x20x10xf32, #tpu.memory_space<vmem>>, vector<1x20x10xf32>
    %163 = vector.shape_cast %162 : vector<1x20x10xf32> to vector<20x10xf32>
    %cst_77 = arith.constant dense<0.000000e+00> : vector<20x128xf32>
    %164 = tpu.matmul %163, %161, %cst_77 {dimension_numbers = #tpu.dot_dimension_numbers<[1], [0], [0], [1], [0, 0, 1, 1], [], []>} : vector<20x10xf32>, vector<10x128xf32>, vector<20x128xf32> -> vector<20x128xf32>
    %165 = arith.addf %147, %164 : vector<20x128xf32>
    %c9 = arith.constant 9 : index
    %c0_78 = arith.constant 0 : index
    %c0_79 = arith.constant 0 : index
    %166 = vector.load %arg0[%c9, %c0_78, %c0_79] : memref<25x25x512xf32, #tpu.memory_space<vmem>>, vector<1x25x512xf32>
    %167 = vector.shape_cast %166 : vector<1x25x512xf32> to vector<25x512xf32>
    %cst_80 = arith.constant dense<0.000000e+00> : vector<10x512xf32>
    %168 = tpu.matmul %0, %167, %cst_80 {dimension_numbers = #tpu.dot_dimension_numbers<[1], [0], [0], [1], [0, 0, 1, 1], [], []>} : vector<10x25xf32>, vector<25x512xf32>, vector<10x512xf32> -> vector<10x512xf32>
    %169 = vector.extract_strided_slice %168 {offsets = [0, 0], sizes = [10, 128], strides = [1, 1]} : vector<10x512xf32> to vector<10x128xf32>
    %170 = vector.extract_strided_slice %168 {offsets = [0, 128], sizes = [10, 128], strides = [1, 1]} : vector<10x512xf32> to vector<10x128xf32>
    %171 = arith.maximumf %169, %170 : vector<10x128xf32>
    %172 = vector.extract_strided_slice %168 {offsets = [0, 256], sizes = [10, 128], strides = [1, 1]} : vector<10x512xf32> to vector<10x128xf32>
    %173 = vector.extract_strided_slice %168 {offsets = [0, 384], sizes = [10, 128], strides = [1, 1]} : vector<10x512xf32> to vector<10x128xf32>
    %174 = arith.maximumf %172, %173 : vector<10x128xf32>
    %175 = arith.maximumf %171, %174 : vector<10x128xf32>
    %176 = vector.broadcast %1 : vector<10x1xf32> to vector<10x128xf32>
    %177 = arith.addf %175, %176 : vector<10x128xf32>
    %cst_81 = arith.constant 0.000000e+00 : f32
    %178 = vector.broadcast %cst_81 : f32 to vector<10x128xf32>
    %179 = arith.maximumf %177, %178 : vector<10x128xf32>
    %c9_82 = arith.constant 9 : index
    %c0_83 = arith.constant 0 : index
    %c0_84 = arith.constant 0 : index
    %180 = vector.load %arg3[%c9_82, %c0_83, %c0_84] : memref<25x20x10xf32, #tpu.memory_space<vmem>>, vector<1x20x10xf32>
    %181 = vector.shape_cast %180 : vector<1x20x10xf32> to vector<20x10xf32>
    %cst_85 = arith.constant dense<0.000000e+00> : vector<20x128xf32>
    %182 = tpu.matmul %181, %179, %cst_85 {dimension_numbers = #tpu.dot_dimension_numbers<[1], [0], [0], [1], [0, 0, 1, 1], [], []>} : vector<20x10xf32>, vector<10x128xf32>, vector<20x128xf32> -> vector<20x128xf32>
    %183 = arith.addf %165, %182 : vector<20x128xf32>
    %c10 = arith.constant 10 : index
    %c0_86 = arith.constant 0 : index
    %c0_87 = arith.constant 0 : index
    %184 = vector.load %arg0[%c10, %c0_86, %c0_87] : memref<25x25x512xf32, #tpu.memory_space<vmem>>, vector<1x25x512xf32>
    %185 = vector.shape_cast %184 : vector<1x25x512xf32> to vector<25x512xf32>
    %cst_88 = arith.constant dense<0.000000e+00> : vector<10x512xf32>
    %186 = tpu.matmul %0, %185, %cst_88 {dimension_numbers = #tpu.dot_dimension_numbers<[1], [0], [0], [1], [0, 0, 1, 1], [], []>} : vector<10x25xf32>, vector<25x512xf32>, vector<10x512xf32> -> vector<10x512xf32>
    %187 = vector.extract_strided_slice %186 {offsets = [0, 0], sizes = [10, 128], strides = [1, 1]} : vector<10x512xf32> to vector<10x128xf32>
    %188 = vector.extract_strided_slice %186 {offsets = [0, 128], sizes = [10, 128], strides = [1, 1]} : vector<10x512xf32> to vector<10x128xf32>
    %189 = arith.maximumf %187, %188 : vector<10x128xf32>
    %190 = vector.extract_strided_slice %186 {offsets = [0, 256], sizes = [10, 128], strides = [1, 1]} : vector<10x512xf32> to vector<10x128xf32>
    %191 = vector.extract_strided_slice %186 {offsets = [0, 384], sizes = [10, 128], strides = [1, 1]} : vector<10x512xf32> to vector<10x128xf32>
    %192 = arith.maximumf %190, %191 : vector<10x128xf32>
    %193 = arith.maximumf %189, %192 : vector<10x128xf32>
    %194 = vector.broadcast %1 : vector<10x1xf32> to vector<10x128xf32>
    %195 = arith.addf %193, %194 : vector<10x128xf32>
    %cst_89 = arith.constant 0.000000e+00 : f32
    %196 = vector.broadcast %cst_89 : f32 to vector<10x128xf32>
    %197 = arith.maximumf %195, %196 : vector<10x128xf32>
    %c10_90 = arith.constant 10 : index
    %c0_91 = arith.constant 0 : index
    %c0_92 = arith.constant 0 : index
    %198 = vector.load %arg3[%c10_90, %c0_91, %c0_92] : memref<25x20x10xf32, #tpu.memory_space<vmem>>, vector<1x20x10xf32>
    %199 = vector.shape_cast %198 : vector<1x20x10xf32> to vector<20x10xf32>
    %cst_93 = arith.constant dense<0.000000e+00> : vector<20x128xf32>
    %200 = tpu.matmul %199, %197, %cst_93 {dimension_numbers = #tpu.dot_dimension_numbers<[1], [0], [0], [1], [0, 0, 1, 1], [], []>} : vector<20x10xf32>, vector<10x128xf32>, vector<20x128xf32> -> vector<20x128xf32>
    %201 = arith.addf %183, %200 : vector<20x128xf32>
    %c11 = arith.constant 11 : index
    %c0_94 = arith.constant 0 : index
    %c0_95 = arith.constant 0 : index
    %202 = vector.load %arg0[%c11, %c0_94, %c0_95] : memref<25x25x512xf32, #tpu.memory_space<vmem>>, vector<1x25x512xf32>
    %203 = vector.shape_cast %202 : vector<1x25x512xf32> to vector<25x512xf32>
    %cst_96 = arith.constant dense<0.000000e+00> : vector<10x512xf32>
    %204 = tpu.matmul %0, %203, %cst_96 {dimension_numbers = #tpu.dot_dimension_numbers<[1], [0], [0], [1], [0, 0, 1, 1], [], []>} : vector<10x25xf32>, vector<25x512xf32>, vector<10x512xf32> -> vector<10x512xf32>
    %205 = vector.extract_strided_slice %204 {offsets = [0, 0], sizes = [10, 128], strides = [1, 1]} : vector<10x512xf32> to vector<10x128xf32>
    %206 = vector.extract_strided_slice %204 {offsets = [0, 128], sizes = [10, 128], strides = [1, 1]} : vector<10x512xf32> to vector<10x128xf32>
    %207 = arith.maximumf %205, %206 : vector<10x128xf32>
    %208 = vector.extract_strided_slice %204 {offsets = [0, 256], sizes = [10, 128], strides = [1, 1]} : vector<10x512xf32> to vector<10x128xf32>
    %209 = vector.extract_strided_slice %204 {offsets = [0, 384], sizes = [10, 128], strides = [1, 1]} : vector<10x512xf32> to vector<10x128xf32>
    %210 = arith.maximumf %208, %209 : vector<10x128xf32>
    %211 = arith.maximumf %207, %210 : vector<10x128xf32>
    %212 = vector.broadcast %1 : vector<10x1xf32> to vector<10x128xf32>
    %213 = arith.addf %211, %212 : vector<10x128xf32>
    %cst_97 = arith.constant 0.000000e+00 : f32
    %214 = vector.broadcast %cst_97 : f32 to vector<10x128xf32>
    %215 = arith.maximumf %213, %214 : vector<10x128xf32>
    %c11_98 = arith.constant 11 : index
    %c0_99 = arith.constant 0 : index
    %c0_100 = arith.constant 0 : index
    %216 = vector.load %arg3[%c11_98, %c0_99, %c0_100] : memref<25x20x10xf32, #tpu.memory_space<vmem>>, vector<1x20x10xf32>
    %217 = vector.shape_cast %216 : vector<1x20x10xf32> to vector<20x10xf32>
    %cst_101 = arith.constant dense<0.000000e+00> : vector<20x128xf32>
    %218 = tpu.matmul %217, %215, %cst_101 {dimension_numbers = #tpu.dot_dimension_numbers<[1], [0], [0], [1], [0, 0, 1, 1], [], []>} : vector<20x10xf32>, vector<10x128xf32>, vector<20x128xf32> -> vector<20x128xf32>
    %219 = arith.addf %201, %218 : vector<20x128xf32>
    %c12 = arith.constant 12 : index
    %c0_102 = arith.constant 0 : index
    %c0_103 = arith.constant 0 : index
    %220 = vector.load %arg0[%c12, %c0_102, %c0_103] : memref<25x25x512xf32, #tpu.memory_space<vmem>>, vector<1x25x512xf32>
    %221 = vector.shape_cast %220 : vector<1x25x512xf32> to vector<25x512xf32>
    %cst_104 = arith.constant dense<0.000000e+00> : vector<10x512xf32>
    %222 = tpu.matmul %0, %221, %cst_104 {dimension_numbers = #tpu.dot_dimension_numbers<[1], [0], [0], [1], [0, 0, 1, 1], [], []>} : vector<10x25xf32>, vector<25x512xf32>, vector<10x512xf32> -> vector<10x512xf32>
    %223 = vector.extract_strided_slice %222 {offsets = [0, 0], sizes = [10, 128], strides = [1, 1]} : vector<10x512xf32> to vector<10x128xf32>
    %224 = vector.extract_strided_slice %222 {offsets = [0, 128], sizes = [10, 128], strides = [1, 1]} : vector<10x512xf32> to vector<10x128xf32>
    %225 = arith.maximumf %223, %224 : vector<10x128xf32>
    %226 = vector.extract_strided_slice %222 {offsets = [0, 256], sizes = [10, 128], strides = [1, 1]} : vector<10x512xf32> to vector<10x128xf32>
    %227 = vector.extract_strided_slice %222 {offsets = [0, 384], sizes = [10, 128], strides = [1, 1]} : vector<10x512xf32> to vector<10x128xf32>
    %228 = arith.maximumf %226, %227 : vector<10x128xf32>
    %229 = arith.maximumf %225, %228 : vector<10x128xf32>
    %230 = vector.broadcast %1 : vector<10x1xf32> to vector<10x128xf32>
    %231 = arith.addf %229, %230 : vector<10x128xf32>
    %cst_105 = arith.constant 0.000000e+00 : f32
    %232 = vector.broadcast %cst_105 : f32 to vector<10x128xf32>
    %233 = arith.maximumf %231, %232 : vector<10x128xf32>
    %c12_106 = arith.constant 12 : index
    %c0_107 = arith.constant 0 : index
    %c0_108 = arith.constant 0 : index
    %234 = vector.load %arg3[%c12_106, %c0_107, %c0_108] : memref<25x20x10xf32, #tpu.memory_space<vmem>>, vector<1x20x10xf32>
    %235 = vector.shape_cast %234 : vector<1x20x10xf32> to vector<20x10xf32>
    %cst_109 = arith.constant dense<0.000000e+00> : vector<20x128xf32>
    %236 = tpu.matmul %235, %233, %cst_109 {dimension_numbers = #tpu.dot_dimension_numbers<[1], [0], [0], [1], [0, 0, 1, 1], [], []>} : vector<20x10xf32>, vector<10x128xf32>, vector<20x128xf32> -> vector<20x128xf32>
    %237 = arith.addf %219, %236 : vector<20x128xf32>
    %c13 = arith.constant 13 : index
    %c0_110 = arith.constant 0 : index
    %c0_111 = arith.constant 0 : index
    %238 = vector.load %arg0[%c13, %c0_110, %c0_111] : memref<25x25x512xf32, #tpu.memory_space<vmem>>, vector<1x25x512xf32>
    %239 = vector.shape_cast %238 : vector<1x25x512xf32> to vector<25x512xf32>
    %cst_112 = arith.constant dense<0.000000e+00> : vector<10x512xf32>
    %240 = tpu.matmul %0, %239, %cst_112 {dimension_numbers = #tpu.dot_dimension_numbers<[1], [0], [0], [1], [0, 0, 1, 1], [], []>} : vector<10x25xf32>, vector<25x512xf32>, vector<10x512xf32> -> vector<10x512xf32>
    %241 = vector.extract_strided_slice %240 {offsets = [0, 0], sizes = [10, 128], strides = [1, 1]} : vector<10x512xf32> to vector<10x128xf32>
    %242 = vector.extract_strided_slice %240 {offsets = [0, 128], sizes = [10, 128], strides = [1, 1]} : vector<10x512xf32> to vector<10x128xf32>
    %243 = arith.maximumf %241, %242 : vector<10x128xf32>
    %244 = vector.extract_strided_slice %240 {offsets = [0, 256], sizes = [10, 128], strides = [1, 1]} : vector<10x512xf32> to vector<10x128xf32>
    %245 = vector.extract_strided_slice %240 {offsets = [0, 384], sizes = [10, 128], strides = [1, 1]} : vector<10x512xf32> to vector<10x128xf32>
    %246 = arith.maximumf %244, %245 : vector<10x128xf32>
    %247 = arith.maximumf %243, %246 : vector<10x128xf32>
    %248 = vector.broadcast %1 : vector<10x1xf32> to vector<10x128xf32>
    %249 = arith.addf %247, %248 : vector<10x128xf32>
    %cst_113 = arith.constant 0.000000e+00 : f32
    %250 = vector.broadcast %cst_113 : f32 to vector<10x128xf32>
    %251 = arith.maximumf %249, %250 : vector<10x128xf32>
    %c13_114 = arith.constant 13 : index
    %c0_115 = arith.constant 0 : index
    %c0_116 = arith.constant 0 : index
    %252 = vector.load %arg3[%c13_114, %c0_115, %c0_116] : memref<25x20x10xf32, #tpu.memory_space<vmem>>, vector<1x20x10xf32>
    %253 = vector.shape_cast %252 : vector<1x20x10xf32> to vector<20x10xf32>
    %cst_117 = arith.constant dense<0.000000e+00> : vector<20x128xf32>
    %254 = tpu.matmul %253, %251, %cst_117 {dimension_numbers = #tpu.dot_dimension_numbers<[1], [0], [0], [1], [0, 0, 1, 1], [], []>} : vector<20x10xf32>, vector<10x128xf32>, vector<20x128xf32> -> vector<20x128xf32>
    %255 = arith.addf %237, %254 : vector<20x128xf32>
    %c14 = arith.constant 14 : index
    %c0_118 = arith.constant 0 : index
    %c0_119 = arith.constant 0 : index
    %256 = vector.load %arg0[%c14, %c0_118, %c0_119] : memref<25x25x512xf32, #tpu.memory_space<vmem>>, vector<1x25x512xf32>
    %257 = vector.shape_cast %256 : vector<1x25x512xf32> to vector<25x512xf32>
    %cst_120 = arith.constant dense<0.000000e+00> : vector<10x512xf32>
    %258 = tpu.matmul %0, %257, %cst_120 {dimension_numbers = #tpu.dot_dimension_numbers<[1], [0], [0], [1], [0, 0, 1, 1], [], []>} : vector<10x25xf32>, vector<25x512xf32>, vector<10x512xf32> -> vector<10x512xf32>
    %259 = vector.extract_strided_slice %258 {offsets = [0, 0], sizes = [10, 128], strides = [1, 1]} : vector<10x512xf32> to vector<10x128xf32>
    %260 = vector.extract_strided_slice %258 {offsets = [0, 128], sizes = [10, 128], strides = [1, 1]} : vector<10x512xf32> to vector<10x128xf32>
    %261 = arith.maximumf %259, %260 : vector<10x128xf32>
    %262 = vector.extract_strided_slice %258 {offsets = [0, 256], sizes = [10, 128], strides = [1, 1]} : vector<10x512xf32> to vector<10x128xf32>
    %263 = vector.extract_strided_slice %258 {offsets = [0, 384], sizes = [10, 128], strides = [1, 1]} : vector<10x512xf32> to vector<10x128xf32>
    %264 = arith.maximumf %262, %263 : vector<10x128xf32>
    %265 = arith.maximumf %261, %264 : vector<10x128xf32>
    %266 = vector.broadcast %1 : vector<10x1xf32> to vector<10x128xf32>
    %267 = arith.addf %265, %266 : vector<10x128xf32>
    %cst_121 = arith.constant 0.000000e+00 : f32
    %268 = vector.broadcast %cst_121 : f32 to vector<10x128xf32>
    %269 = arith.maximumf %267, %268 : vector<10x128xf32>
    %c14_122 = arith.constant 14 : index
    %c0_123 = arith.constant 0 : index
    %c0_124 = arith.constant 0 : index
    %270 = vector.load %arg3[%c14_122, %c0_123, %c0_124] : memref<25x20x10xf32, #tpu.memory_space<vmem>>, vector<1x20x10xf32>
    %271 = vector.shape_cast %270 : vector<1x20x10xf32> to vector<20x10xf32>
    %cst_125 = arith.constant dense<0.000000e+00> : vector<20x128xf32>
    %272 = tpu.matmul %271, %269, %cst_125 {dimension_numbers = #tpu.dot_dimension_numbers<[1], [0], [0], [1], [0, 0, 1, 1], [], []>} : vector<20x10xf32>, vector<10x128xf32>, vector<20x128xf32> -> vector<20x128xf32>
    %273 = arith.addf %255, %272 : vector<20x128xf32>
    %c15 = arith.constant 15 : index
    %c0_126 = arith.constant 0 : index
    %c0_127 = arith.constant 0 : index
    %274 = vector.load %arg0[%c15, %c0_126, %c0_127] : memref<25x25x512xf32, #tpu.memory_space<vmem>>, vector<1x25x512xf32>
    %275 = vector.shape_cast %274 : vector<1x25x512xf32> to vector<25x512xf32>
    %cst_128 = arith.constant dense<0.000000e+00> : vector<10x512xf32>
    %276 = tpu.matmul %0, %275, %cst_128 {dimension_numbers = #tpu.dot_dimension_numbers<[1], [0], [0], [1], [0, 0, 1, 1], [], []>} : vector<10x25xf32>, vector<25x512xf32>, vector<10x512xf32> -> vector<10x512xf32>
    %277 = vector.extract_strided_slice %276 {offsets = [0, 0], sizes = [10, 128], strides = [1, 1]} : vector<10x512xf32> to vector<10x128xf32>
    %278 = vector.extract_strided_slice %276 {offsets = [0, 128], sizes = [10, 128], strides = [1, 1]} : vector<10x512xf32> to vector<10x128xf32>
    %279 = arith.maximumf %277, %278 : vector<10x128xf32>
    %280 = vector.extract_strided_slice %276 {offsets = [0, 256], sizes = [10, 128], strides = [1, 1]} : vector<10x512xf32> to vector<10x128xf32>
    %281 = vector.extract_strided_slice %276 {offsets = [0, 384], sizes = [10, 128], strides = [1, 1]} : vector<10x512xf32> to vector<10x128xf32>
    %282 = arith.maximumf %280, %281 : vector<10x128xf32>
    %283 = arith.maximumf %279, %282 : vector<10x128xf32>
    %284 = vector.broadcast %1 : vector<10x1xf32> to vector<10x128xf32>
    %285 = arith.addf %283, %284 : vector<10x128xf32>
    %cst_129 = arith.constant 0.000000e+00 : f32
    %286 = vector.broadcast %cst_129 : f32 to vector<10x128xf32>
    %287 = arith.maximumf %285, %286 : vector<10x128xf32>
    %c15_130 = arith.constant 15 : index
    %c0_131 = arith.constant 0 : index
    %c0_132 = arith.constant 0 : index
    %288 = vector.load %arg3[%c15_130, %c0_131, %c0_132] : memref<25x20x10xf32, #tpu.memory_space<vmem>>, vector<1x20x10xf32>
    %289 = vector.shape_cast %288 : vector<1x20x10xf32> to vector<20x10xf32>
    %cst_133 = arith.constant dense<0.000000e+00> : vector<20x128xf32>
    %290 = tpu.matmul %289, %287, %cst_133 {dimension_numbers = #tpu.dot_dimension_numbers<[1], [0], [0], [1], [0, 0, 1, 1], [], []>} : vector<20x10xf32>, vector<10x128xf32>, vector<20x128xf32> -> vector<20x128xf32>
    %291 = arith.addf %273, %290 : vector<20x128xf32>
    %c16 = arith.constant 16 : index
    %c0_134 = arith.constant 0 : index
    %c0_135 = arith.constant 0 : index
    %292 = vector.load %arg0[%c16, %c0_134, %c0_135] : memref<25x25x512xf32, #tpu.memory_space<vmem>>, vector<1x25x512xf32>
    %293 = vector.shape_cast %292 : vector<1x25x512xf32> to vector<25x512xf32>
    %cst_136 = arith.constant dense<0.000000e+00> : vector<10x512xf32>
    %294 = tpu.matmul %0, %293, %cst_136 {dimension_numbers = #tpu.dot_dimension_numbers<[1], [0], [0], [1], [0, 0, 1, 1], [], []>} : vector<10x25xf32>, vector<25x512xf32>, vector<10x512xf32> -> vector<10x512xf32>
    %295 = vector.extract_strided_slice %294 {offsets = [0, 0], sizes = [10, 128], strides = [1, 1]} : vector<10x512xf32> to vector<10x128xf32>
    %296 = vector.extract_strided_slice %294 {offsets = [0, 128], sizes = [10, 128], strides = [1, 1]} : vector<10x512xf32> to vector<10x128xf32>
    %297 = arith.maximumf %295, %296 : vector<10x128xf32>
    %298 = vector.extract_strided_slice %294 {offsets = [0, 256], sizes = [10, 128], strides = [1, 1]} : vector<10x512xf32> to vector<10x128xf32>
    %299 = vector.extract_strided_slice %294 {offsets = [0, 384], sizes = [10, 128], strides = [1, 1]} : vector<10x512xf32> to vector<10x128xf32>
    %300 = arith.maximumf %298, %299 : vector<10x128xf32>
    %301 = arith.maximumf %297, %300 : vector<10x128xf32>
    %302 = vector.broadcast %1 : vector<10x1xf32> to vector<10x128xf32>
    %303 = arith.addf %301, %302 : vector<10x128xf32>
    %cst_137 = arith.constant 0.000000e+00 : f32
    %304 = vector.broadcast %cst_137 : f32 to vector<10x128xf32>
    %305 = arith.maximumf %303, %304 : vector<10x128xf32>
    %c16_138 = arith.constant 16 : index
    %c0_139 = arith.constant 0 : index
    %c0_140 = arith.constant 0 : index
    %306 = vector.load %arg3[%c16_138, %c0_139, %c0_140] : memref<25x20x10xf32, #tpu.memory_space<vmem>>, vector<1x20x10xf32>
    %307 = vector.shape_cast %306 : vector<1x20x10xf32> to vector<20x10xf32>
    %cst_141 = arith.constant dense<0.000000e+00> : vector<20x128xf32>
    %308 = tpu.matmul %307, %305, %cst_141 {dimension_numbers = #tpu.dot_dimension_numbers<[1], [0], [0], [1], [0, 0, 1, 1], [], []>} : vector<20x10xf32>, vector<10x128xf32>, vector<20x128xf32> -> vector<20x128xf32>
    %309 = arith.addf %291, %308 : vector<20x128xf32>
    %c17 = arith.constant 17 : index
    %c0_142 = arith.constant 0 : index
    %c0_143 = arith.constant 0 : index
    %310 = vector.load %arg0[%c17, %c0_142, %c0_143] : memref<25x25x512xf32, #tpu.memory_space<vmem>>, vector<1x25x512xf32>
    %311 = vector.shape_cast %310 : vector<1x25x512xf32> to vector<25x512xf32>
    %cst_144 = arith.constant dense<0.000000e+00> : vector<10x512xf32>
    %312 = tpu.matmul %0, %311, %cst_144 {dimension_numbers = #tpu.dot_dimension_numbers<[1], [0], [0], [1], [0, 0, 1, 1], [], []>} : vector<10x25xf32>, vector<25x512xf32>, vector<10x512xf32> -> vector<10x512xf32>
    %313 = vector.extract_strided_slice %312 {offsets = [0, 0], sizes = [10, 128], strides = [1, 1]} : vector<10x512xf32> to vector<10x128xf32>
    %314 = vector.extract_strided_slice %312 {offsets = [0, 128], sizes = [10, 128], strides = [1, 1]} : vector<10x512xf32> to vector<10x128xf32>
    %315 = arith.maximumf %313, %314 : vector<10x128xf32>
    %316 = vector.extract_strided_slice %312 {offsets = [0, 256], sizes = [10, 128], strides = [1, 1]} : vector<10x512xf32> to vector<10x128xf32>
    %317 = vector.extract_strided_slice %312 {offsets = [0, 384], sizes = [10, 128], strides = [1, 1]} : vector<10x512xf32> to vector<10x128xf32>
    %318 = arith.maximumf %316, %317 : vector<10x128xf32>
    %319 = arith.maximumf %315, %318 : vector<10x128xf32>
    %320 = vector.broadcast %1 : vector<10x1xf32> to vector<10x128xf32>
    %321 = arith.addf %319, %320 : vector<10x128xf32>
    %cst_145 = arith.constant 0.000000e+00 : f32
    %322 = vector.broadcast %cst_145 : f32 to vector<10x128xf32>
    %323 = arith.maximumf %321, %322 : vector<10x128xf32>
    %c17_146 = arith.constant 17 : index
    %c0_147 = arith.constant 0 : index
    %c0_148 = arith.constant 0 : index
    %324 = vector.load %arg3[%c17_146, %c0_147, %c0_148] : memref<25x20x10xf32, #tpu.memory_space<vmem>>, vector<1x20x10xf32>
    %325 = vector.shape_cast %324 : vector<1x20x10xf32> to vector<20x10xf32>
    %cst_149 = arith.constant dense<0.000000e+00> : vector<20x128xf32>
    %326 = tpu.matmul %325, %323, %cst_149 {dimension_numbers = #tpu.dot_dimension_numbers<[1], [0], [0], [1], [0, 0, 1, 1], [], []>} : vector<20x10xf32>, vector<10x128xf32>, vector<20x128xf32> -> vector<20x128xf32>
    %327 = arith.addf %309, %326 : vector<20x128xf32>
    %c18 = arith.constant 18 : index
    %c0_150 = arith.constant 0 : index
    %c0_151 = arith.constant 0 : index
    %328 = vector.load %arg0[%c18, %c0_150, %c0_151] : memref<25x25x512xf32, #tpu.memory_space<vmem>>, vector<1x25x512xf32>
    %329 = vector.shape_cast %328 : vector<1x25x512xf32> to vector<25x512xf32>
    %cst_152 = arith.constant dense<0.000000e+00> : vector<10x512xf32>
    %330 = tpu.matmul %0, %329, %cst_152 {dimension_numbers = #tpu.dot_dimension_numbers<[1], [0], [0], [1], [0, 0, 1, 1], [], []>} : vector<10x25xf32>, vector<25x512xf32>, vector<10x512xf32> -> vector<10x512xf32>
    %331 = vector.extract_strided_slice %330 {offsets = [0, 0], sizes = [10, 128], strides = [1, 1]} : vector<10x512xf32> to vector<10x128xf32>
    %332 = vector.extract_strided_slice %330 {offsets = [0, 128], sizes = [10, 128], strides = [1, 1]} : vector<10x512xf32> to vector<10x128xf32>
    %333 = arith.maximumf %331, %332 : vector<10x128xf32>
    %334 = vector.extract_strided_slice %330 {offsets = [0, 256], sizes = [10, 128], strides = [1, 1]} : vector<10x512xf32> to vector<10x128xf32>
    %335 = vector.extract_strided_slice %330 {offsets = [0, 384], sizes = [10, 128], strides = [1, 1]} : vector<10x512xf32> to vector<10x128xf32>
    %336 = arith.maximumf %334, %335 : vector<10x128xf32>
    %337 = arith.maximumf %333, %336 : vector<10x128xf32>
    %338 = vector.broadcast %1 : vector<10x1xf32> to vector<10x128xf32>
    %339 = arith.addf %337, %338 : vector<10x128xf32>
    %cst_153 = arith.constant 0.000000e+00 : f32
    %340 = vector.broadcast %cst_153 : f32 to vector<10x128xf32>
    %341 = arith.maximumf %339, %340 : vector<10x128xf32>
    %c18_154 = arith.constant 18 : index
    %c0_155 = arith.constant 0 : index
    %c0_156 = arith.constant 0 : index
    %342 = vector.load %arg3[%c18_154, %c0_155, %c0_156] : memref<25x20x10xf32, #tpu.memory_space<vmem>>, vector<1x20x10xf32>
    %343 = vector.shape_cast %342 : vector<1x20x10xf32> to vector<20x10xf32>
    %cst_157 = arith.constant dense<0.000000e+00> : vector<20x128xf32>
    %344 = tpu.matmul %343, %341, %cst_157 {dimension_numbers = #tpu.dot_dimension_numbers<[1], [0], [0], [1], [0, 0, 1, 1], [], []>} : vector<20x10xf32>, vector<10x128xf32>, vector<20x128xf32> -> vector<20x128xf32>
    %345 = arith.addf %327, %344 : vector<20x128xf32>
    %c19 = arith.constant 19 : index
    %c0_158 = arith.constant 0 : index
    %c0_159 = arith.constant 0 : index
    %346 = vector.load %arg0[%c19, %c0_158, %c0_159] : memref<25x25x512xf32, #tpu.memory_space<vmem>>, vector<1x25x512xf32>
    %347 = vector.shape_cast %346 : vector<1x25x512xf32> to vector<25x512xf32>
    %cst_160 = arith.constant dense<0.000000e+00> : vector<10x512xf32>
    %348 = tpu.matmul %0, %347, %cst_160 {dimension_numbers = #tpu.dot_dimension_numbers<[1], [0], [0], [1], [0, 0, 1, 1], [], []>} : vector<10x25xf32>, vector<25x512xf32>, vector<10x512xf32> -> vector<10x512xf32>
    %349 = vector.extract_strided_slice %348 {offsets = [0, 0], sizes = [10, 128], strides = [1, 1]} : vector<10x512xf32> to vector<10x128xf32>
    %350 = vector.extract_strided_slice %348 {offsets = [0, 128], sizes = [10, 128], strides = [1, 1]} : vector<10x512xf32> to vector<10x128xf32>
    %351 = arith.maximumf %349, %350 : vector<10x128xf32>
    %352 = vector.extract_strided_slice %348 {offsets = [0, 256], sizes = [10, 128], strides = [1, 1]} : vector<10x512xf32> to vector<10x128xf32>
    %353 = vector.extract_strided_slice %348 {offsets = [0, 384], sizes = [10, 128], strides = [1, 1]} : vector<10x512xf32> to vector<10x128xf32>
    %354 = arith.maximumf %352, %353 : vector<10x128xf32>
    %355 = arith.maximumf %351, %354 : vector<10x128xf32>
    %356 = vector.broadcast %1 : vector<10x1xf32> to vector<10x128xf32>
    %357 = arith.addf %355, %356 : vector<10x128xf32>
    %cst_161 = arith.constant 0.000000e+00 : f32
    %358 = vector.broadcast %cst_161 : f32 to vector<10x128xf32>
    %359 = arith.maximumf %357, %358 : vector<10x128xf32>
    %c19_162 = arith.constant 19 : index
    %c0_163 = arith.constant 0 : index
    %c0_164 = arith.constant 0 : index
    %360 = vector.load %arg3[%c19_162, %c0_163, %c0_164] : memref<25x20x10xf32, #tpu.memory_space<vmem>>, vector<1x20x10xf32>
    %361 = vector.shape_cast %360 : vector<1x20x10xf32> to vector<20x10xf32>
    %cst_165 = arith.constant dense<0.000000e+00> : vector<20x128xf32>
    %362 = tpu.matmul %361, %359, %cst_165 {dimension_numbers = #tpu.dot_dimension_numbers<[1], [0], [0], [1], [0, 0, 1, 1], [], []>} : vector<20x10xf32>, vector<10x128xf32>, vector<20x128xf32> -> vector<20x128xf32>
    %363 = arith.addf %345, %362 : vector<20x128xf32>
    %c20 = arith.constant 20 : index
    %c0_166 = arith.constant 0 : index
    %c0_167 = arith.constant 0 : index
    %364 = vector.load %arg0[%c20, %c0_166, %c0_167] : memref<25x25x512xf32, #tpu.memory_space<vmem>>, vector<1x25x512xf32>
    %365 = vector.shape_cast %364 : vector<1x25x512xf32> to vector<25x512xf32>
    %cst_168 = arith.constant dense<0.000000e+00> : vector<10x512xf32>
    %366 = tpu.matmul %0, %365, %cst_168 {dimension_numbers = #tpu.dot_dimension_numbers<[1], [0], [0], [1], [0, 0, 1, 1], [], []>} : vector<10x25xf32>, vector<25x512xf32>, vector<10x512xf32> -> vector<10x512xf32>
    %367 = vector.extract_strided_slice %366 {offsets = [0, 0], sizes = [10, 128], strides = [1, 1]} : vector<10x512xf32> to vector<10x128xf32>
    %368 = vector.extract_strided_slice %366 {offsets = [0, 128], sizes = [10, 128], strides = [1, 1]} : vector<10x512xf32> to vector<10x128xf32>
    %369 = arith.maximumf %367, %368 : vector<10x128xf32>
    %370 = vector.extract_strided_slice %366 {offsets = [0, 256], sizes = [10, 128], strides = [1, 1]} : vector<10x512xf32> to vector<10x128xf32>
    %371 = vector.extract_strided_slice %366 {offsets = [0, 384], sizes = [10, 128], strides = [1, 1]} : vector<10x512xf32> to vector<10x128xf32>
    %372 = arith.maximumf %370, %371 : vector<10x128xf32>
    %373 = arith.maximumf %369, %372 : vector<10x128xf32>
    %374 = vector.broadcast %1 : vector<10x1xf32> to vector<10x128xf32>
    %375 = arith.addf %373, %374 : vector<10x128xf32>
    %cst_169 = arith.constant 0.000000e+00 : f32
    %376 = vector.broadcast %cst_169 : f32 to vector<10x128xf32>
    %377 = arith.maximumf %375, %376 : vector<10x128xf32>
    %c20_170 = arith.constant 20 : index
    %c0_171 = arith.constant 0 : index
    %c0_172 = arith.constant 0 : index
    %378 = vector.load %arg3[%c20_170, %c0_171, %c0_172] : memref<25x20x10xf32, #tpu.memory_space<vmem>>, vector<1x20x10xf32>
    %379 = vector.shape_cast %378 : vector<1x20x10xf32> to vector<20x10xf32>
    %cst_173 = arith.constant dense<0.000000e+00> : vector<20x128xf32>
    %380 = tpu.matmul %379, %377, %cst_173 {dimension_numbers = #tpu.dot_dimension_numbers<[1], [0], [0], [1], [0, 0, 1, 1], [], []>} : vector<20x10xf32>, vector<10x128xf32>, vector<20x128xf32> -> vector<20x128xf32>
    %381 = arith.addf %363, %380 : vector<20x128xf32>
    %c21 = arith.constant 21 : index
    %c0_174 = arith.constant 0 : index
    %c0_175 = arith.constant 0 : index
    %382 = vector.load %arg0[%c21, %c0_174, %c0_175] : memref<25x25x512xf32, #tpu.memory_space<vmem>>, vector<1x25x512xf32>
    %383 = vector.shape_cast %382 : vector<1x25x512xf32> to vector<25x512xf32>
    %cst_176 = arith.constant dense<0.000000e+00> : vector<10x512xf32>
    %384 = tpu.matmul %0, %383, %cst_176 {dimension_numbers = #tpu.dot_dimension_numbers<[1], [0], [0], [1], [0, 0, 1, 1], [], []>} : vector<10x25xf32>, vector<25x512xf32>, vector<10x512xf32> -> vector<10x512xf32>
    %385 = vector.extract_strided_slice %384 {offsets = [0, 0], sizes = [10, 128], strides = [1, 1]} : vector<10x512xf32> to vector<10x128xf32>
    %386 = vector.extract_strided_slice %384 {offsets = [0, 128], sizes = [10, 128], strides = [1, 1]} : vector<10x512xf32> to vector<10x128xf32>
    %387 = arith.maximumf %385, %386 : vector<10x128xf32>
    %388 = vector.extract_strided_slice %384 {offsets = [0, 256], sizes = [10, 128], strides = [1, 1]} : vector<10x512xf32> to vector<10x128xf32>
    %389 = vector.extract_strided_slice %384 {offsets = [0, 384], sizes = [10, 128], strides = [1, 1]} : vector<10x512xf32> to vector<10x128xf32>
    %390 = arith.maximumf %388, %389 : vector<10x128xf32>
    %391 = arith.maximumf %387, %390 : vector<10x128xf32>
    %392 = vector.broadcast %1 : vector<10x1xf32> to vector<10x128xf32>
    %393 = arith.addf %391, %392 : vector<10x128xf32>
    %cst_177 = arith.constant 0.000000e+00 : f32
    %394 = vector.broadcast %cst_177 : f32 to vector<10x128xf32>
    %395 = arith.maximumf %393, %394 : vector<10x128xf32>
    %c21_178 = arith.constant 21 : index
    %c0_179 = arith.constant 0 : index
    %c0_180 = arith.constant 0 : index
    %396 = vector.load %arg3[%c21_178, %c0_179, %c0_180] : memref<25x20x10xf32, #tpu.memory_space<vmem>>, vector<1x20x10xf32>
    %397 = vector.shape_cast %396 : vector<1x20x10xf32> to vector<20x10xf32>
    %cst_181 = arith.constant dense<0.000000e+00> : vector<20x128xf32>
    %398 = tpu.matmul %397, %395, %cst_181 {dimension_numbers = #tpu.dot_dimension_numbers<[1], [0], [0], [1], [0, 0, 1, 1], [], []>} : vector<20x10xf32>, vector<10x128xf32>, vector<20x128xf32> -> vector<20x128xf32>
    %399 = arith.addf %381, %398 : vector<20x128xf32>
    %c22 = arith.constant 22 : index
    %c0_182 = arith.constant 0 : index
    %c0_183 = arith.constant 0 : index
    %400 = vector.load %arg0[%c22, %c0_182, %c0_183] : memref<25x25x512xf32, #tpu.memory_space<vmem>>, vector<1x25x512xf32>
    %401 = vector.shape_cast %400 : vector<1x25x512xf32> to vector<25x512xf32>
    %cst_184 = arith.constant dense<0.000000e+00> : vector<10x512xf32>
    %402 = tpu.matmul %0, %401, %cst_184 {dimension_numbers = #tpu.dot_dimension_numbers<[1], [0], [0], [1], [0, 0, 1, 1], [], []>} : vector<10x25xf32>, vector<25x512xf32>, vector<10x512xf32> -> vector<10x512xf32>
    %403 = vector.extract_strided_slice %402 {offsets = [0, 0], sizes = [10, 128], strides = [1, 1]} : vector<10x512xf32> to vector<10x128xf32>
    %404 = vector.extract_strided_slice %402 {offsets = [0, 128], sizes = [10, 128], strides = [1, 1]} : vector<10x512xf32> to vector<10x128xf32>
    %405 = arith.maximumf %403, %404 : vector<10x128xf32>
    %406 = vector.extract_strided_slice %402 {offsets = [0, 256], sizes = [10, 128], strides = [1, 1]} : vector<10x512xf32> to vector<10x128xf32>
    %407 = vector.extract_strided_slice %402 {offsets = [0, 384], sizes = [10, 128], strides = [1, 1]} : vector<10x512xf32> to vector<10x128xf32>
    %408 = arith.maximumf %406, %407 : vector<10x128xf32>
    %409 = arith.maximumf %405, %408 : vector<10x128xf32>
    %410 = vector.broadcast %1 : vector<10x1xf32> to vector<10x128xf32>
    %411 = arith.addf %409, %410 : vector<10x128xf32>
    %cst_185 = arith.constant 0.000000e+00 : f32
    %412 = vector.broadcast %cst_185 : f32 to vector<10x128xf32>
    %413 = arith.maximumf %411, %412 : vector<10x128xf32>
    %c22_186 = arith.constant 22 : index
    %c0_187 = arith.constant 0 : index
    %c0_188 = arith.constant 0 : index
    %414 = vector.load %arg3[%c22_186, %c0_187, %c0_188] : memref<25x20x10xf32, #tpu.memory_space<vmem>>, vector<1x20x10xf32>
    %415 = vector.shape_cast %414 : vector<1x20x10xf32> to vector<20x10xf32>
    %cst_189 = arith.constant dense<0.000000e+00> : vector<20x128xf32>
    %416 = tpu.matmul %415, %413, %cst_189 {dimension_numbers = #tpu.dot_dimension_numbers<[1], [0], [0], [1], [0, 0, 1, 1], [], []>} : vector<20x10xf32>, vector<10x128xf32>, vector<20x128xf32> -> vector<20x128xf32>
    %417 = arith.addf %399, %416 : vector<20x128xf32>
    %c23 = arith.constant 23 : index
    %c0_190 = arith.constant 0 : index
    %c0_191 = arith.constant 0 : index
    %418 = vector.load %arg0[%c23, %c0_190, %c0_191] : memref<25x25x512xf32, #tpu.memory_space<vmem>>, vector<1x25x512xf32>
    %419 = vector.shape_cast %418 : vector<1x25x512xf32> to vector<25x512xf32>
    %cst_192 = arith.constant dense<0.000000e+00> : vector<10x512xf32>
    %420 = tpu.matmul %0, %419, %cst_192 {dimension_numbers = #tpu.dot_dimension_numbers<[1], [0], [0], [1], [0, 0, 1, 1], [], []>} : vector<10x25xf32>, vector<25x512xf32>, vector<10x512xf32> -> vector<10x512xf32>
    %421 = vector.extract_strided_slice %420 {offsets = [0, 0], sizes = [10, 128], strides = [1, 1]} : vector<10x512xf32> to vector<10x128xf32>
    %422 = vector.extract_strided_slice %420 {offsets = [0, 128], sizes = [10, 128], strides = [1, 1]} : vector<10x512xf32> to vector<10x128xf32>
    %423 = arith.maximumf %421, %422 : vector<10x128xf32>
    %424 = vector.extract_strided_slice %420 {offsets = [0, 256], sizes = [10, 128], strides = [1, 1]} : vector<10x512xf32> to vector<10x128xf32>
    %425 = vector.extract_strided_slice %420 {offsets = [0, 384], sizes = [10, 128], strides = [1, 1]} : vector<10x512xf32> to vector<10x128xf32>
    %426 = arith.maximumf %424, %425 : vector<10x128xf32>
    %427 = arith.maximumf %423, %426 : vector<10x128xf32>
    %428 = vector.broadcast %1 : vector<10x1xf32> to vector<10x128xf32>
    %429 = arith.addf %427, %428 : vector<10x128xf32>
    %cst_193 = arith.constant 0.000000e+00 : f32
    %430 = vector.broadcast %cst_193 : f32 to vector<10x128xf32>
    %431 = arith.maximumf %429, %430 : vector<10x128xf32>
    %c23_194 = arith.constant 23 : index
    %c0_195 = arith.constant 0 : index
    %c0_196 = arith.constant 0 : index
    %432 = vector.load %arg3[%c23_194, %c0_195, %c0_196] : memref<25x20x10xf32, #tpu.memory_space<vmem>>, vector<1x20x10xf32>
    %433 = vector.shape_cast %432 : vector<1x20x10xf32> to vector<20x10xf32>
    %cst_197 = arith.constant dense<0.000000e+00> : vector<20x128xf32>
    %434 = tpu.matmul %433, %431, %cst_197 {dimension_numbers = #tpu.dot_dimension_numbers<[1], [0], [0], [1], [0, 0, 1, 1], [], []>} : vector<20x10xf32>, vector<10x128xf32>, vector<20x128xf32> -> vector<20x128xf32>
    %435 = arith.addf %417, %434 : vector<20x128xf32>
    %c24 = arith.constant 24 : index
    %c0_198 = arith.constant 0 : index
    %c0_199 = arith.constant 0 : index
    %436 = vector.load %arg0[%c24, %c0_198, %c0_199] : memref<25x25x512xf32, #tpu.memory_space<vmem>>, vector<1x25x512xf32>
    %437 = vector.shape_cast %436 : vector<1x25x512xf32> to vector<25x512xf32>
    %cst_200 = arith.constant dense<0.000000e+00> : vector<10x512xf32>
    %438 = tpu.matmul %0, %437, %cst_200 {dimension_numbers = #tpu.dot_dimension_numbers<[1], [0], [0], [1], [0, 0, 1, 1], [], []>} : vector<10x25xf32>, vector<25x512xf32>, vector<10x512xf32> -> vector<10x512xf32>
    %439 = vector.extract_strided_slice %438 {offsets = [0, 0], sizes = [10, 128], strides = [1, 1]} : vector<10x512xf32> to vector<10x128xf32>
    %440 = vector.extract_strided_slice %438 {offsets = [0, 128], sizes = [10, 128], strides = [1, 1]} : vector<10x512xf32> to vector<10x128xf32>
    %441 = arith.maximumf %439, %440 : vector<10x128xf32>
    %442 = vector.extract_strided_slice %438 {offsets = [0, 256], sizes = [10, 128], strides = [1, 1]} : vector<10x512xf32> to vector<10x128xf32>
    %443 = vector.extract_strided_slice %438 {offsets = [0, 384], sizes = [10, 128], strides = [1, 1]} : vector<10x512xf32> to vector<10x128xf32>
    %444 = arith.maximumf %442, %443 : vector<10x128xf32>
    %445 = arith.maximumf %441, %444 : vector<10x128xf32>
    %446 = vector.broadcast %1 : vector<10x1xf32> to vector<10x128xf32>
    %447 = arith.addf %445, %446 : vector<10x128xf32>
    %cst_201 = arith.constant 0.000000e+00 : f32
    %448 = vector.broadcast %cst_201 : f32 to vector<10x128xf32>
    %449 = arith.maximumf %447, %448 : vector<10x128xf32>
    %c24_202 = arith.constant 24 : index
    %c0_203 = arith.constant 0 : index
    %c0_204 = arith.constant 0 : index
    %450 = vector.load %arg3[%c24_202, %c0_203, %c0_204] : memref<25x20x10xf32, #tpu.memory_space<vmem>>, vector<1x20x10xf32>
    %451 = vector.shape_cast %450 : vector<1x20x10xf32> to vector<20x10xf32>
    %cst_205 = arith.constant dense<0.000000e+00> : vector<20x128xf32>
    %452 = tpu.matmul %451, %449, %cst_205 {dimension_numbers = #tpu.dot_dimension_numbers<[1], [0], [0], [1], [0, 0, 1, 1], [], []>} : vector<20x10xf32>, vector<10x128xf32>, vector<20x128xf32> -> vector<20x128xf32>
    %453 = arith.addf %435, %452 : vector<20x128xf32>
    %454 = vector.extract_strided_slice %453 {offsets = [0, 0], sizes = [20, 32], strides = [1, 1]} : vector<20x128xf32> to vector<20x32xf32>
    %455 = vector.extract_strided_slice %453 {offsets = [0, 32], sizes = [20, 32], strides = [1, 1]} : vector<20x128xf32> to vector<20x32xf32>
    %456 = arith.maximumf %454, %455 : vector<20x32xf32>
    %457 = vector.extract_strided_slice %453 {offsets = [0, 64], sizes = [20, 32], strides = [1, 1]} : vector<20x128xf32> to vector<20x32xf32>
    %458 = vector.extract_strided_slice %453 {offsets = [0, 96], sizes = [20, 32], strides = [1, 1]} : vector<20x128xf32> to vector<20x32xf32>
    %459 = arith.maximumf %457, %458 : vector<20x32xf32>
    %460 = arith.maximumf %456, %459 : vector<20x32xf32>
    %461 = vector.broadcast %2 : vector<20x1xf32> to vector<20x32xf32>
    %462 = arith.addf %460, %461 : vector<20x32xf32>
    %cst_206 = arith.constant 0.000000e+00 : f32
    %463 = vector.broadcast %cst_206 : f32 to vector<20x32xf32>
    %464 = arith.maximumf %462, %463 : vector<20x32xf32>
    %465 = tpu.iota {dimensions = array<i32: 0>} : vector<2x2xi32>
    %466 = tpu.iota {dimensions = array<i32: 1>} : vector<2x2xi32>
    %cst_207 = arith.constant 0.000000e+00 : f32
    %467 = vector.broadcast %cst_207 : f32 to vector<2x2xf32>
    %c0_208 = arith.constant 0 : index
    %c0_209 = arith.constant 0 : index
    %c0_210 = arith.constant 0 : index
    %468 = vector.load %arg5[%c0_208, %c0_209, %c0_210] : memref<2x20x32xf32, #tpu.memory_space<vmem>>, vector<1x20x32xf32>
    %469 = vector.shape_cast %468 : vector<1x20x32xf32> to vector<20x32xf32>
    %470 = arith.mulf %469, %464 : vector<20x32xf32>
    %471 = vector.extract_strided_slice %470 {offsets = [0, 0], sizes = [20, 16], strides = [1, 1]} : vector<20x32xf32> to vector<20x16xf32>
    %472 = vector.shape_cast %471 : vector<20x16xf32> to vector<1x20x16xf32>
    %cst_211 = arith.constant dense<0.000000e+00> : vector<1xf32>
    %473 = vector.multi_reduction <add>, %472, %cst_211 [1, 2] : vector<1x20x16xf32> to vector<1xf32>
    %474 = vector.shape_cast %473 : vector<1xf32> to vector<1x1x1xf32>
    %475 = vector.extract %474[0, 0, 0] : f32 from vector<1x1x1xf32>
    %c0_i32 = arith.constant 0 : i32
    %476 = vector.broadcast %c0_i32 : i32 to vector<2x2xi32>
    %477 = arith.cmpi eq, %465, %476 : vector<2x2xi32>
    %c0_i32_212 = arith.constant 0 : i32
    %478 = vector.broadcast %c0_i32_212 : i32 to vector<2x2xi32>
    %479 = arith.cmpi eq, %466, %478 : vector<2x2xi32>
    %480 = arith.andi %477, %479 : vector<2x2xi1>
    %cst_213 = arith.constant 0.000000e+00 : f32
    %481 = vector.broadcast %475 : f32 to vector<2x2xf32>
    %482 = vector.broadcast %cst_213 : f32 to vector<2x2xf32>
    %483 = arith.select %480, %481, %482 : vector<2x2xi1>, vector<2x2xf32>
    %484 = arith.addf %467, %483 : vector<2x2xf32>
    %485 = vector.extract_strided_slice %470 {offsets = [0, 16], sizes = [20, 16], strides = [1, 1]} : vector<20x32xf32> to vector<20x16xf32>
    %486 = vector.shape_cast %485 : vector<20x16xf32> to vector<1x20x16xf32>
    %cst_214 = arith.constant dense<0.000000e+00> : vector<1xf32>
    %487 = vector.multi_reduction <add>, %486, %cst_214 [1, 2] : vector<1x20x16xf32> to vector<1xf32>
    %488 = vector.shape_cast %487 : vector<1xf32> to vector<1x1x1xf32>
    %489 = vector.extract %488[0, 0, 0] : f32 from vector<1x1x1xf32>
    %c1_i32 = arith.constant 1 : i32
    %490 = vector.broadcast %c1_i32 : i32 to vector<2x2xi32>
    %491 = arith.cmpi eq, %465, %490 : vector<2x2xi32>
    %c0_i32_215 = arith.constant 0 : i32
    %492 = vector.broadcast %c0_i32_215 : i32 to vector<2x2xi32>
    %493 = arith.cmpi eq, %466, %492 : vector<2x2xi32>
    %494 = arith.andi %491, %493 : vector<2x2xi1>
    %cst_216 = arith.constant 0.000000e+00 : f32
    %495 = vector.broadcast %489 : f32 to vector<2x2xf32>
    %496 = vector.broadcast %cst_216 : f32 to vector<2x2xf32>
    %497 = arith.select %494, %495, %496 : vector<2x2xi1>, vector<2x2xf32>
    %498 = arith.addf %484, %497 : vector<2x2xf32>
    %c1_217 = arith.constant 1 : index
    %c0_218 = arith.constant 0 : index
    %c0_219 = arith.constant 0 : index
    %499 = vector.load %arg5[%c1_217, %c0_218, %c0_219] : memref<2x20x32xf32, #tpu.memory_space<vmem>>, vector<1x20x32xf32>
    %500 = vector.shape_cast %499 : vector<1x20x32xf32> to vector<20x32xf32>
    %501 = arith.mulf %500, %464 : vector<20x32xf32>
    %502 = vector.extract_strided_slice %501 {offsets = [0, 0], sizes = [20, 16], strides = [1, 1]} : vector<20x32xf32> to vector<20x16xf32>
    %503 = vector.shape_cast %502 : vector<20x16xf32> to vector<1x20x16xf32>
    %cst_220 = arith.constant dense<0.000000e+00> : vector<1xf32>
    %504 = vector.multi_reduction <add>, %503, %cst_220 [1, 2] : vector<1x20x16xf32> to vector<1xf32>
    %505 = vector.shape_cast %504 : vector<1xf32> to vector<1x1x1xf32>
    %506 = vector.extract %505[0, 0, 0] : f32 from vector<1x1x1xf32>
    %c0_i32_221 = arith.constant 0 : i32
    %507 = vector.broadcast %c0_i32_221 : i32 to vector<2x2xi32>
    %508 = arith.cmpi eq, %465, %507 : vector<2x2xi32>
    %c1_i32_222 = arith.constant 1 : i32
    %509 = vector.broadcast %c1_i32_222 : i32 to vector<2x2xi32>
    %510 = arith.cmpi eq, %466, %509 : vector<2x2xi32>
    %511 = arith.andi %508, %510 : vector<2x2xi1>
    %cst_223 = arith.constant 0.000000e+00 : f32
    %512 = vector.broadcast %506 : f32 to vector<2x2xf32>
    %513 = vector.broadcast %cst_223 : f32 to vector<2x2xf32>
    %514 = arith.select %511, %512, %513 : vector<2x2xi1>, vector<2x2xf32>
    %515 = arith.addf %498, %514 : vector<2x2xf32>
    %516 = vector.extract_strided_slice %501 {offsets = [0, 16], sizes = [20, 16], strides = [1, 1]} : vector<20x32xf32> to vector<20x16xf32>
    %517 = vector.shape_cast %516 : vector<20x16xf32> to vector<1x20x16xf32>
    %cst_224 = arith.constant dense<0.000000e+00> : vector<1xf32>
    %518 = vector.multi_reduction <add>, %517, %cst_224 [1, 2] : vector<1x20x16xf32> to vector<1xf32>
    %519 = vector.shape_cast %518 : vector<1xf32> to vector<1x1x1xf32>
    %520 = vector.extract %519[0, 0, 0] : f32 from vector<1x1x1xf32>
    %c1_i32_225 = arith.constant 1 : i32
    %521 = vector.broadcast %c1_i32_225 : i32 to vector<2x2xi32>
    %522 = arith.cmpi eq, %465, %521 : vector<2x2xi32>
    %c1_i32_226 = arith.constant 1 : i32
    %523 = vector.broadcast %c1_i32_226 : i32 to vector<2x2xi32>
    %524 = arith.cmpi eq, %466, %523 : vector<2x2xi32>
    %525 = arith.andi %522, %524 : vector<2x2xi1>
    %cst_227 = arith.constant 0.000000e+00 : f32
    %526 = vector.broadcast %520 : f32 to vector<2x2xf32>
    %527 = vector.broadcast %cst_227 : f32 to vector<2x2xf32>
    %528 = arith.select %525, %526, %527 : vector<2x2xi1>, vector<2x2xf32>
    %529 = arith.addf %515, %528 : vector<2x2xf32>
    %c0_228 = arith.constant 0 : index
    %c0_229 = arith.constant 0 : index
    %530 = vector.load %arg6[%c0_228, %c0_229] : memref<1x2xf32, #tpu.memory_space<vmem>>, vector<1x2xf32>
    %531 = vector.broadcast %530 : vector<1x2xf32> to vector<2x2xf32>
    %532 = arith.addf %529, %531 : vector<2x2xf32>
    %c0_230 = arith.constant 0 : index
    %c0_231 = arith.constant 0 : index
    %533 = vector.load %arg7[%c0_230, %c0_231] : memref<2x2xf32, #tpu.memory_space<vmem>>, vector<2x2xf32>
    tpu.vector_store %arg7[%c0_230, %c0_231], %532 {strides = array<i32>} : memref<2x2xf32, #tpu.memory_space<vmem>>, vector<2x2xf32>,
    return
  }
}

</mosaic_0001>

<bundles_post_ra>
// kernel: cnn_forward.1
= control target key start
LH: loop header
LB: loop body
LE: loop exit
PB: predicated region body
PF: predicated region fallthrough
CT: control target
= control target key end

     0   :  { %vm57_vm0 = vcmask 1040384   ;;  %v9543_v7 = vmov 0.0   ;;  %vm9544_vm1 = vmmov 1   ;;  %v9545_v13 = vmov 0   ;;  %s12115_s0 = inlined_call_operand.vmem [shape: f32[25,25,512], index: 0, kind: input, shape index: {}]   ;;  %s12116_s1 = inlined_call_operand.vmem [shape: f32[10,25], index: 1, kind: input, shape index: {}]   ;;  %s12117_s2 = inlined_call_operand.vmem [shape: f32[10,1], index: 2, kind: input, shape index: {}]   ;;  %s12118_s3 = inlined_call_operand.vmem [shape: f32[25,20,10], index: 3, kind: input, shape index: {}]   ;;  %s12119_s4 = inlined_call_operand.vmem [shape: f32[20,1], index: 4, kind: input, shape index: {}]   ;;  %s12120_s5 = inlined_call_operand.vmem [shape: f32[2,20,32], index: 5, kind: input, shape index: {}]   ;;  %s12121_s6 = inlined_call_operand.vmem [shape: f32[1,2], index: 6, kind: input, shape index: {}]   ;;  %s12122_s7 = inlined_call_operand.hbm [shape: f32[2,2], index: 7, kind: output, shape index: {}]  }
   0x1   :  { %v35_v0 = vld [vmem:[%s12115_s0 + $0x8] sm:$0xff]  ;;  %v34_v2 = vld [vmem:[%s12115_s0] sm:$0xff]  ;;  %134 = vmatprep.mubr.f32.mxu1 %v9543_v7  ;;  %340 = vmatprep.mubr.f32.mxu0 %v9543_v7  ;;  %vm9613_vm2 = vmpackc.low %vm57_vm0, %vm9544_vm1  ;;  %vm50_vm3 = vcmask 203776  }
   0x2   :  { %v39_v1 = vld [vmem:[%s12115_s0 + $0x28] sm:$0xff]  ;;  %v38_v4 = vld [vmem:[%s12115_s0 + $0x20] sm:$0xff]  ;;  %9511 = vset.pattern.permute.xlu0 %v9545_v13  ;;  %9512 = vset.pattern.permute.xlu1 %v9545_v13  ;;  %v37_v14 = vld [vmem:[%s12115_s0 + $0x18] sm:$0xff] }
   0x3   :  { %v8750_v3 = vpack.c.bf16 %v39_v1, %v35_v0  ;;  %v43_v5 = vld [vmem:[%s12115_s0 + $0x48] sm:$0xff]  ;;  %v8752_v8 = vpack.c.bf16 %v38_v4, %v34_v2  ;;  %v42_v11 = vld [vmem:[%s12115_s0 + $0x40] sm:$0xff]  ;;  %v41_v15 = vld [vmem:[%s12115_s0 + $0x38] sm:$0xff] }
   0x4   :  { %v47_v6 = vld [vmem:[%s12115_s0 + $0x68] sm:$0x1]  ;;  %v46_v12 = vld [vmem:[%s12115_s0 + $0x60] sm:$0x1]  ;;  %v8760_v17 = vpack.c.bf16 %v41_v15, %v37_v14  ;;  %v36_v18 = vld [vmem:[%s12115_s0 + $0x10] sm:$0xff] }
   0x5   :  { %v8754_v9 = vpack.c.bf16 %v47_v6, %v43_v5  ;;  %8751 = vmatprep.subr.bf16.mxu1 %v8750_v3  ;;  %v8757_v16 = vpack.c.bf16 %v46_v12, %v42_v11  ;;  %v40_v19 = vld [vmem:[%s12115_s0 + $0x30] sm:$0xff]  ;;  %v45_v20 = vld [vmem:[%s12115_s0 + $0x58] sm:$0xff]  ;;  %v7549_v22 = vld [vmem:[%s12115_s0 + $0x88] sm:$0xff] }
   0x6   :  { %8753 = vmatpush1.bf16.msra.mxu1 %v8752_v8  ;;  %v49_v21 = vld [vmem:[%s12115_s0 + $0x78] sm:$0x1]  ;;  %v7553_v23 = vld [vmem:[%s12115_s0 + $0xa8] sm:$0xff]  ;;  %v9652_v24 = vld [vmem:[%s12116_s1] sm:$0xff]  ;;  %v8762_v27 = vpack.c.bf16 %v40_v19, %v36_v18 }
   0x7   :  { %8756 = vmatprep.subr.msk.bf16.mxu1 %vm9613_vm2, %v8754_v9  ;;  %v8770_v25 = vpack.c.bf16 %v7553_v23, %v7549_v22  ;;  %v7548_v26 = vld [vmem:[%s12115_s0 + $0x80] sm:$0xff]  ;;  %v44_v28 = vld [vmem:[%s12115_s0 + $0x50] sm:$0xff]  ;;  %v8764_v31 = vpack.c.bf16 %v49_v21, %v45_v20  ;;  %v7551_v32 = vld [vmem:[%s12115_s0 + $0x98] sm:$0xff] }
   0x8   :  { %v48_v29 = vld [vmem:[%s12115_s0 + $0x70] sm:$0x1]  ;;  %v7552_v30 = vld [vmem:[%s12115_s0 + $0xa0] sm:$0xff]  ;;  %v7557_v34 = vld [vmem:[%s12115_s0 + $0xc8] sm:$0xff] }
   0x9   :  { %8771 = vmatprep.subr.bf16.mxu0 %v8770_v25  ;;  %v8772_v33 = vpack.c.bf16 %v7552_v30, %v7548_v26  ;;  %v7561_v35 = vld [vmem:[%s12115_s0 + $0xe8] sm:$0x1]  ;;  %v7555_v36 = vld [vmem:[%s12115_s0 + $0xb8] sm:$0xff]  ;;  %v7556_v38 = vld [vmem:[%s12115_s0 + $0xc0] sm:$0xff]  ;;  %v8767_v42 = vpack.c.bf16 %v48_v29, %v44_v28 }
   0xa   :  { %8759 = vmatpush1.bf16.msk.msra.mxu1 %vm9613_vm2, %v8757_v16  ;;  %v8774_v37 = vpack.c.bf16 %v7561_v35, %v7557_v34  ;;  %v7560_v39 = vld [vmem:[%s12115_s0 + $0xe0] sm:$0x1]  ;;  %v9692_v41 = vld [vmem:[%s12116_s1 + $0x8] sm:$0x3]  ;;  %v8780_v43 = vpack.c.bf16 %v7555_v36, %v7551_v32  ;;  %v7550_v44 = vld [vmem:[%s12115_s0 + $0x90] sm:$0xff] }
   0xb   :  { %8761 = vmatprep.subr.bf16.mxu1 %v8760_v17  ;;  %8773 = vmatpush1.bf16.msra.mxu0 %v8772_v33  ;;  %v8777_v40 = vpack.c.bf16 %v7560_v39, %v7556_v38  ;;  %v7554_v45 = vld [vmem:[%s12115_s0 + $0xb0] sm:$0xff]  ;;  %v7559_v46 = vld [vmem:[%s12115_s0 + $0xd8] sm:$0xff]  ;;  %v7584_v52 = vld [vmem:[%s12115_s0 + $0x108] sm:$0xff] }
   0xc   :  { %8776 = vmatprep.subr.msk.bf16.mxu0 %vm9613_vm2, %v8774_v37  ;;  %v7563_v47 = vld [vmem:[%s12115_s0 + $0xf8] sm:$0x1]  ;;  %v8782_v48 = vpack.c.bf16 %v7554_v45, %v7550_v44  ;;  %v7558_v50 = vld [vmem:[%s12115_s0 + $0xd0] sm:$0xff]  ;;  %v7588_v53 = vld [vmem:[%s12115_s0 + $0x128] sm:$0xff] }
   0xd   :  { %7542 = vmatmul.mubr.msk.f32.vlgmr.msra.gmra.mrb[0].mxu1 %vm50_vm3, %v9652_v24  ;;  %v8784_v49 = vpack.c.bf16 %v7563_v47, %v7559_v46  ;;  %v7562_v51 = vld [vmem:[%s12115_s0 + $0xf0] sm:$0x1]  ;;  %v8798_v55 = vpack.c.bf16 %v7588_v53, %v7584_v52  ;;  %v7583_v56 = vld [vmem:[%s12115_s0 + $0x100] sm:$0xff]  ;;  %v7592_v58 = vld [vmem:[%s12115_s0 + $0x148] sm:$0xff] }
   0xe   :  { %8763 = vmatpush1.bf16.msra.mxu1 %v8762_v27  ;;  %140 = vmatprep.mubr.f32.mxu1 %v9543_v7  ;;  %v8787_v54 = vpack.c.bf16 %v7562_v51, %v7558_v50  ;;  %v7587_v57 = vld [vmem:[%s12115_s0 + $0x120] sm:$0xff]  ;;  %v7596_v59 = vld [vmem:[%s12115_s0 + $0x168] sm:$0x1]  ;;  %v7586_v0 = vld [vmem:[%s12115_s0 + $0x118] sm:$0xff] }
   0xf   :  { %8766 = vmatprep.subr.msk.bf16.mxu1 %vm9613_vm2, %v8764_v31  ;;  %8779 = vmatpush1.bf16.msk.msra.mxu0 %vm9613_vm2, %v8777_v40  ;;  %v8800_v60 = vpack.c.bf16 %v7587_v57, %v7583_v56  ;;  %v8802_v61 = vpack.c.bf16 %v7596_v59, %v7592_v58  ;;  %v7591_v62 = vld [vmem:[%s12115_s0 + $0x140] sm:$0xff]  ;;  %v7590_v1 = vld [vmem:[%s12115_s0 + $0x138] sm:$0xff]  ;;  %v7585_v4 = vld [vmem:[%s12115_s0 + $0x110] sm:$0xff] }
  0x10   :  { %v7595_v63 = vld [vmem:[%s12115_s0 + $0x160] sm:$0x1]  ;;  %v8808_v3 = vpack.c.bf16 %v7590_v1, %v7586_v0  ;;  %v7589_v5 = vld [vmem:[%s12115_s0 + $0x130] sm:$0xff]  ;;  %v7594_v6 = vld [vmem:[%s12115_s0 + $0x158] sm:$0xff] }
  0x11   :  { %7543 = vmatmul.mubr.msk.f32.gmra.mrb[2].mxu1 %vm50_vm3, %v9692_v41  ;;  %v8805_v2 = vpack.c.bf16 %v7595_v63, %v7591_v62  ;;  %v7598_v8 = vld [vmem:[%s12115_s0 + $0x178] sm:$0x1]  ;;  %v8810_v9 = vpack.c.bf16 %v7589_v5, %v7585_v4  ;;  %v7593_v12 = vld [vmem:[%s12115_s0 + $0x150] sm:$0xff]  ;;  %v7615_v14 = vld [vmem:[%s12115_s0 + $0x188] sm:$0xff] }
  0x12   :  { %8769 = vmatpush1.bf16.msk.msra.mxu1 %vm9613_vm2, %v8767_v42  ;;  %211 = vmatprep.mubr.f32.mxu1 %v9543_v7  ;;  %v8812_v11 = vpack.c.bf16 %v7598_v8, %v7594_v6  ;;  %v7597_v13 = vld [vmem:[%s12115_s0 + $0x170] sm:$0x1]  ;;  %v7619_v15 = vld [vmem:[%s12115_s0 + $0x1a8] sm:$0xff]  ;;  %v7614_v18 = vld [vmem:[%s12115_s0 + $0x180] sm:$0xff] }
  0x13   :  { %8781 = vmatprep.subr.bf16.mxu1 %v8780_v43  ;;  %7566 = vmatmul.mubr.msk.f32.vlgmr.msra.gmra.mrb[0].mxu0 %vm50_vm3, %v9652_v24  ;;  %v8815_v16 = vpack.c.bf16 %v7597_v13, %v7593_v12  ;;  %v8822_v17 = vpack.c.bf16 %v7619_v15, %v7615_v14  ;;  %v7618_v19 = vld [vmem:[%s12115_s0 + $0x1a0] sm:$0xff]  ;;  %v7623_v20 = vld [vmem:[%s12115_s0 + $0x1c8] sm:$0xff]  ;;  %v7617_v28 = vld [vmem:[%s12115_s0 + $0x198] sm:$0xff] }
  0x14   :  { %346 = vmatprep.mubr.f32.mxu0 %v9543_v7  ;;  %v7627_v21 = vld [vmem:[%s12115_s0 + $0x1e8] sm:$0x1]  ;;  %v29_v22 = vld [vmem:[%s12117_s2] sm:$0xff]  ;;  %v8824_v23 = vpack.c.bf16 %v7618_v19, %v7614_v18  ;;  %v7621_v29 = vld [vmem:[%s12115_s0 + $0x1b8] sm:$0xff] }
  0x15   :  { %7546 = vmatmul.mubr.msk.f32.vlgmr.msra.gmra.mrb[4].mxu1 %vm50_vm3, %v9652_v24  ;;  %v8826_v25 = vpack.c.bf16 %v7627_v21, %v7623_v20  ;;  %v7622_v26 = vld [vmem:[%s12115_s0 + $0x1c0] sm:$0xff]  ;;  %232 = vperm.xlu0 %9511, %v29_v22   ;;  %v30_v30 = vld [vmem:[%s12117_s2 + $0x8] sm:$0x3]  ;;  %v8832_v32 = vpack.c.bf16 %v7621_v29, %v7617_v28  ;;  %v7616_v33 = vld [vmem:[%s12115_s0 + $0x190] sm:$0xff] }
  0x16   :  { %8783 = vmatpush1.bf16.msra.mxu1 %v8782_v48  ;;  %217 = vmatprep.mubr.f32.mxu1 %v9543_v7  ;;  %v7626_v27 = vld [vmem:[%s12115_s0 + $0x1e0] sm:$0x1]  ;;  %v7620_v34 = vld [vmem:[%s12115_s0 + $0x1b0] sm:$0xff]  ;;  %v7625_v35 = vld [vmem:[%s12115_s0 + $0x1d8] sm:$0xff] }
  0x17   :  { %8786 = vmatprep.subr.msk.bf16.mxu1 %vm9613_vm2, %v8784_v49  ;;  %7567 = vmatmul.mubr.msk.f32.gmra.mrb[2].mxu0 %vm50_vm3, %v9692_v41  ;;  %v8829_v31 = vpack.c.bf16 %v7626_v27, %v7622_v26  ;;  %v7629_v36 = vld [vmem:[%s12115_s0 + $0x1f8] sm:$0x1]  ;;  %v8834_v37 = vpack.c.bf16 %v7620_v34, %v7616_v33  ;;  %v7624_v39 = vld [vmem:[%s12115_s0 + $0x1d0] sm:$0xff]  ;;  %v7646_v42 = vld [vmem:[%s12115_s0 + $0x208] sm:$0xff] }
  0x18   :  { %v8836_v38 = vpack.c.bf16 %v7629_v36, %v7625_v35  ;;  %v7628_v40 = vld [vmem:[%s12115_s0 + $0x1f0] sm:$0x1]  ;;  %v7650_v43 = vld [vmem:[%s12115_s0 + $0x228] sm:$0xff]  ;;  %v7645_v46 = vld [vmem:[%s12115_s0 + $0x200] sm:$0xff] }
  0x19   :  { %7547 = vmatmul.mubr.msk.f32.gmra.mrb[6].mxu1 %vm50_vm3, %v9692_v41  ;;  %237 = vperm.xlu0 %9511, %v30_v30   ;;  %v8839_v44 = vpack.c.bf16 %v7628_v40, %v7624_v39  ;;  %v8846_v45 = vpack.c.bf16 %v7650_v43, %v7646_v42  ;;  %v7649_v47 = vld [vmem:[%s12115_s0 + $0x220] sm:$0xff]  ;;  %v7654_v48 = vld [vmem:[%s12115_s0 + $0x248] sm:$0xff]  ;;  %v7647_v58 = vld [vmem:[%s12115_s0 + $0x210] sm:$0xff] }
  0x1a   :  { %8789 = vmatpush1.bf16.msk.msra.mxu1 %vm9613_vm2, %v8787_v54  ;;  %417 = vmatprep.mubr.f32.mxu1 %v9543_v7  ;;  %v7658_v49 = vld [vmem:[%s12115_s0 + $0x268] sm:$0x1]  ;;  %v8848_v50 = vpack.c.bf16 %v7649_v47, %v7645_v46  ;;  %v7653_v52 = vld [vmem:[%s12115_s0 + $0x240] sm:$0xff]  ;;  %v7648_v54 = vld [vmem:[%s12115_s0 + $0x218] sm:$0xff] }
  0x1b   :  { %8799 = vmatprep.subr.bf16.mxu1 %v8798_v55  ;;  %v8850_v51 = vpack.c.bf16 %v7658_v49, %v7654_v48  ;;  %v7657_v53 = vld [vmem:[%s12115_s0 + $0x260] sm:$0x1]  ;;  %v7652_v55 = vld [vmem:[%s12115_s0 + $0x238] sm:$0xff]  ;;  %v7651_v59 = vld [vmem:[%s12115_s0 + $0x230] sm:$0xff] }
  0x1c   :  { %v8853_v56 = vpack.c.bf16 %v7657_v53, %v7653_v52  ;;  %v8856_v57 = vpack.c.bf16 %v7652_v55, %v7648_v54  ;;  %v8858_v62 = vpack.c.bf16 %v7651_v59, %v7647_v58  ;;  %v7655_v0 = vld [vmem:[%s12115_s0 + $0x250] sm:$0xff]  ;;  %v7676_v6 = vld [vmem:[%s12115_s0 + $0x280] sm:$0xff] }
  0x1d   :  { %7570 = vmatmul.mubr.msk.f32.vlgmr.msra.gmra.mrb[8].mxu1 %vm50_vm3, %v9652_v24  ;;  %v7659_v1 = vld [vmem:[%s12115_s0 + $0x270] sm:$0x1]  ;;  %v7680_v8 = vld [vmem:[%s12115_s0 + $0x2a0] sm:$0xff] }
  0x1e   :  { %8801 = vmatpush1.bf16.msra.mxu1 %v8800_v60  ;;  %423 = vmatprep.mubr.f32.mxu1 %v9543_v7  ;;  %v7656_v60 = vld [vmem:[%s12115_s0 + $0x258] sm:$0xff]  ;;  %v8863_v4 = vpack.c.bf16 %v7659_v1, %v7655_v0 }
  0x1f   :  { %8804 = vmatprep.subr.msk.bf16.mxu1 %vm9613_vm2, %v8802_v61  ;;  %v7660_v61 = vld [vmem:[%s12115_s0 + $0x278] sm:$0x1] }
  0x20   :  { %v8860_v63 = vpack.c.bf16 %v7660_v61, %v7656_v60 }
  0x21   :  { %7571 = vmatmul.mubr.msk.f32.gmra.mrb[10].mxu1 %vm50_vm3, %v9692_v41 }
  0x22   :  { %8807 = vmatpush1.bf16.msk.msra.mxu1 %vm9613_vm2, %v8805_v2  ;;  %723 = vmatprep.mubr.f32.mxu1 %v9543_v7  ;;  %v7677_v2 = vld [vmem:[%s12115_s0 + $0x288] sm:$0xff] }
  0x23   :  { %8809 = vmatprep.subr.bf16.mxu1 %v8808_v3  ;;  %v7681_v3 = vld [vmem:[%s12115_s0 + $0x2a8] sm:$0xff] }
  0x24   :  { %v8870_v5 = vpack.c.bf16 %v7681_v3, %v7677_v2 }
  0x25   :  { %7601 = vmatmul.mubr.msk.f32.vlgmr.msra.gmra.mrb[12].mxu1 %vm50_vm3, %v9652_v24 }
  0x26   :  { %8811 = vmatpush1.bf16.msra.mxu1 %v8810_v9  ;;  %729 = vmatprep.mubr.f32.mxu1 %v9543_v7  ;;  %v7685_v9 = vld [vmem:[%s12115_s0 + $0x2c8] sm:$0xff] }
  0x27   :  { %8814 = vmatprep.subr.msk.bf16.mxu1 %vm9613_vm2, %v8812_v11  ;;  %v7689_v11 = vld [vmem:[%s12115_s0 + $0x2e8] sm:$0x1] }
  0x29   :  { %7602 = vmatmul.mubr.msk.f32.gmra.mrb[14].mxu1 %vm50_vm3, %v9692_v41 }
  0x2a   :  { %8817 = vmatpush1.bf16.msk.msra.mxu1 %vm9613_vm2, %v8815_v16  ;;  %800 = vmatprep.mubr.f32.mxu1 %v9543_v7 }
  0x2b   :  { %8823 = vmatprep.subr.bf16.mxu1 %v8822_v17 }
  0x2d   :  { %7605 = vmatmul.mubr.msk.f32.vlgmr.msra.gmra.mrb[16].mxu1 %vm50_vm3, %v9652_v24 }
  0x2e   :  { %8825 = vmatpush1.bf16.msra.mxu1 %v8824_v23  ;;  %806 = vmatprep.mubr.f32.mxu1 %v9543_v7 }
  0x2f   :  { %8828 = vmatprep.subr.msk.bf16.mxu1 %vm9613_vm2, %v8826_v25 }
  0x31   :  { %7606 = vmatmul.mubr.msk.f32.gmra.mrb[18].mxu1 %vm50_vm3, %v9692_v41 }
  0x32   :  { %8831 = vmatpush1.bf16.msk.msra.mxu1 %vm9613_vm2, %v8829_v31  ;;  %1015 = vmatprep.mubr.f32.mxu1 %v9543_v7 }
  0x33   :  { %8833 = vmatprep.subr.bf16.mxu1 %v8832_v32 }
  0x35   :  { %7632 = vmatmul.mubr.msk.f32.vlgmr.msra.gmra.mrb[20].mxu1 %vm50_vm3, %v9652_v24 }
  0x36   :  { %8835 = vmatpush1.bf16.msra.mxu1 %v8834_v37  ;;  %1021 = vmatprep.mubr.f32.mxu1 %v9543_v7 }
  0x37   :  { %8838 = vmatprep.subr.msk.bf16.mxu1 %vm9613_vm2, %v8836_v38 }
  0x39   :  { %7633 = vmatmul.mubr.msk.f32.gmra.mrb[22].mxu1 %vm50_vm3, %v9692_v41 }
  0x3a   :  { %8841 = vmatpush1.bf16.msk.msra.mxu1 %vm9613_vm2, %v8839_v44  ;;  %1092 = vmatprep.mubr.f32.mxu1 %v9543_v7 }
  0x3b   :  { %8847 = vmatprep.subr.bf16.mxu1 %v8846_v45 }
  0x3d   :  { %7636 = vmatmul.mubr.msk.f32.vlgmr.msra.gmra.mrb[24].mxu1 %vm50_vm3, %v9652_v24 }
  0x3e   :  { %8849 = vmatpush1.bf16.msra.mxu1 %v8848_v50  ;;  %1098 = vmatprep.mubr.f32.mxu1 %v9543_v7 }
  0x3f   :  { %8852 = vmatprep.subr.msk.bf16.mxu1 %vm9613_vm2, %v8850_v51 }
  0x41   :  { %7637 = vmatmul.mubr.msk.f32.gmra.mrb[26].mxu1 %vm50_vm3, %v9692_v41 }
  0x42   :  { %8855 = vmatpush1.bf16.msk.msra.mxu1 %vm9613_vm2, %v8853_v56  ;;  %1307 = vmatprep.mubr.f32.mxu1 %v9543_v7 }
  0x43   :  { %8857 = vmatprep.subr.bf16.mxu1 %v8856_v57 }
  0x45   :  { %7663 = vmatmul.mubr.msk.f32.vlgmr.msra.gmra.mrb[28].mxu1 %vm50_vm3, %v9652_v24 }
  0x46   :  { %8859 = vmatpush1.bf16.msra.mxu1 %v8858_v62  ;;  %1313 = vmatprep.mubr.f32.mxu1 %v9543_v7 }
  0x47   :  { %8862 = vmatprep.subr.msk.bf16.mxu1 %vm9613_vm2, %v8860_v63 }
  0x49   :  { %7664 = vmatmul.mubr.msk.f32.gmra.mrb[30].mxu1 %vm50_vm3, %v9692_v41 }
  0x4a   :  { %12 = vsyncpa [#allocation3], 0  ;;  %8865 = vmatpush1.bf16.msk.msra.mxu1 %vm9613_vm2, %v8863_v4  ;;  %1384 = vmatprep.mubr.f32.mxu1 %v9543_v7  ;;  %v8872_v12 = vpack.c.bf16 %v7680_v8, %v7676_v6  ;;  %v8874_v13 = vpack.c.bf16 %v7689_v11, %v7685_v9  ;;  %v7684_v14 = vld [vmem:[%s12115_s0 + $0x2c0] sm:$0xff]  ;;  %v7679_v16 = vld [vmem:[%s12115_s0 + $0x298] sm:$0xff]  ;;  %vm9547_vm4 = vmmov 0   ;;  %vm454_vm5 = vcmask 1041408  }
  0x4b   :  { %8871 = vmatprep.subr.bf16.mxu1 %v8870_v5  ;;  %v7688_v15 = vld [vmem:[%s12115_s0 + $0x2e0] sm:$0x1]  ;;  %v7683_v17 = vld [vmem:[%s12115_s0 + $0x2b8] sm:$0xff]  ;;  %v7678_v20 = vld [vmem:[%s12115_s0 + $0x290] sm:$0xff]  ;;  %8429 = vmatprep.mubr.msk.f32.mxu0 %vm9547_vm4, %v9543_v7  ;;  %vm444_vm7 = vcmask 80896   ;;  %s9548_s12 = smov 96  }
  0x4c   :  { %v8877_v18 = vpack.c.bf16 %v7688_v15, %v7684_v14  ;;  %v8880_v19 = vpack.c.bf16 %v7683_v17, %v7679_v16  ;;  %v7682_v21 = vld [vmem:[%s12115_s0 + $0x2b0] sm:$0xff]  ;;  %v7687_v22 = vld [vmem:[%s12115_s0 + $0x2d8] sm:$0xff]  ;;  %v7708_v29 = vld [vmem:[%s12115_s0 + $0x308] sm:$0xff]  ;;  %s9550_s24 = smov 112   ;;  %vm7407_vm8 = vcmask 130048   ;;  %vm7411_vm9 = vcmask 125952  }
  0x4d   :  { %7667 = vmatmul.mubr.msk.f32.vlgmr.msra.gmra.mrb[32].mxu1 %vm50_vm3, %v9652_v24  ;;  %v7691_v23 = vld [vmem:[%s12115_s0 + $0x2f8] sm:$0x1]  ;;  %v8882_v25 = vpack.c.bf16 %v7682_v21, %v7678_v20  ;;  %v7686_v27 = vld [vmem:[%s12115_s0 + $0x2d0] sm:$0xff]  ;;  %v7712_v30 = vld [vmem:[%s12115_s0 + $0x328] sm:$0xff]  ;;  %s9551_s10 = smov [#allocation2]  }
  0x4e   :  { %8873 = vmatpush1.bf16.msra.mxu1 %v8872_v12  ;;  %1390 = vmatprep.mubr.f32.mxu1 %v9543_v7  ;;  %v8884_v26 = vpack.c.bf16 %v7691_v23, %v7687_v22  ;;  %v7690_v28 = vld [vmem:[%s12115_s0 + $0x2f0] sm:$0x1]  ;;  %v8894_v32 = vpack.c.bf16 %v7712_v30, %v7708_v29  ;;  %v7707_v33 = vld [vmem:[%s12115_s0 + $0x300] sm:$0xff]  ;;  %v7716_v35 = vld [vmem:[%s12115_s0 + $0x348] sm:$0xff]  ;;  %s7532_s11 = sshll.u32 %s9551_s10, 4  ;;  %s7533_s11 = int_to_ptr.vmem [resolvable:$true] %s7532_s11 }
  0x4f   :  { %8876 = vmatprep.subr.msk.bf16.mxu1 %vm9613_vm2, %v8874_v13  ;;  %v8887_v31 = vpack.c.bf16 %v7690_v28, %v7686_v27  ;;  %v7711_v34 = vld [vmem:[%s12115_s0 + $0x320] sm:$0xff]  ;;  %v7720_v36 = vld [vmem:[%s12115_s0 + $0x368] sm:$0x1]  ;;  %v7741_v54 = vld [vmem:[%s12115_s0 + $0x398] sm:$0xff]  ;;  %p9524_p1 = scmp.lt.s32.totalorder %s7533_s11, %s7533_s11 }
  0x50   :  { %v8896_v37 = vpack.c.bf16 %v7711_v34, %v7707_v33  ;;  %v8898_v38 = vpack.c.bf16 %v7720_v36, %v7716_v35  ;;  %v7715_v39 = vld [vmem:[%s12115_s0 + $0x340] sm:$0xff]  ;;  %v7739_v42 = vld [vmem:[%s12115_s0 + $0x388] sm:$0xff]  ;;  %v7745_v55 = vld [vmem:[%s12115_s0 + $0x3b8] sm:$0xff]  ;;  %v9546_v35 = vmov 0.0|0.0  }
  0x51   :  { %7668 = vmatmul.mubr.msk.f32.gmra.mrb[34].mxu1 %vm50_vm3, %v9692_v41  ;;  %v7719_v40 = vld [vmem:[%s12115_s0 + $0x360] sm:$0x1]  ;;  %v7743_v43 = vld [vmem:[%s12115_s0 + $0x3a8] sm:$0xff]  ;;  %v8928_v57 = vpack.c.bf16 %v7745_v55, %v7741_v54  ;;  %v7740_v58 = vld [vmem:[%s12115_s0 + $0x390] sm:$0xff]  ;;  %8790 = vmatprep.subr.bf16.mxu0 %v9546_v35 }
  0x52   :  { %8879 = vmatpush1.bf16.msk.msra.mxu1 %vm9613_vm2, %v8877_v18  ;;  %1599 = vmatprep.mubr.f32.mxu1 %v9543_v7  ;;  %v8901_v44 = vpack.c.bf16 %v7719_v40, %v7715_v39  ;;  %v8918_v45 = vpack.c.bf16 %v7743_v43, %v7739_v42  ;;  %v7738_v46 = vld [vmem:[%s12115_s0 + $0x380] sm:$0xff]  ;;  %v7747_v48 = vld [vmem:[%s12115_s0 + $0x3c8] sm:$0xff]  ;;  %v7744_v59 = vld [vmem:[%s12115_s0 + $0x3b0] sm:$0xff] }
  0x53   :  { %8881 = vmatprep.subr.bf16.mxu1 %v8880_v19  ;;  %v7742_v47 = vld [vmem:[%s12115_s0 + $0x3a0] sm:$0xff]  ;;  %v7751_v49 = vld [vmem:[%s12115_s0 + $0x3e8] sm:$0x1]  ;;  %v7749_v60 = vld [vmem:[%s12115_s0 + $0x3d8] sm:$0xff]  ;;  %v8930_v62 = vpack.c.bf16 %v7744_v59, %v7740_v58 }
  0x54   :  { %v8920_v50 = vpack.c.bf16 %v7742_v47, %v7738_v46  ;;  %v8922_v51 = vpack.c.bf16 %v7751_v49, %v7747_v48  ;;  %v7746_v52 = vld [vmem:[%s12115_s0 + $0x3c0] sm:$0xff]  ;;  %v7753_v61 = vld [vmem:[%s12115_s0 + $0x3f8] sm:$0x1]  ;;  %v7748_v0 = vld [vmem:[%s12115_s0 + $0x3d0] sm:$0xff] }
  0x55   :  { %7694 = vmatmul.mubr.msk.f32.vlgmr.msra.gmra.mrb[36].mxu1 %vm50_vm3, %v9652_v24  ;;  %v7750_v53 = vld [vmem:[%s12115_s0 + $0x3e0] sm:$0x1]  ;;  %v8932_v63 = vpack.c.bf16 %v7753_v61, %v7749_v60  ;;  %v7752_v1 = vld [vmem:[%s12115_s0 + $0x3f0] sm:$0x1]  ;;  %v7770_v2 = vld [vmem:[%s12115_s0 + $0x408] sm:$0xff] }
  0x56   :  { %8883 = vmatpush1.bf16.msra.mxu1 %v8882_v25  ;;  %1605 = vmatprep.mubr.f32.mxu1 %v9543_v7  ;;  %v8925_v56 = vpack.c.bf16 %v7750_v53, %v7746_v52  ;;  %v7774_v3 = vld [vmem:[%s12115_s0 + $0x428] sm:$0xff]  ;;  %v8935_v4 = vpack.c.bf16 %v7752_v1, %v7748_v0  ;;  %v7769_v6 = vld [vmem:[%s12115_s0 + $0x400] sm:$0xff]  ;;  %v7772_v16 = vld [vmem:[%s12115_s0 + $0x418] sm:$0xff] }
  0x57   :  { %8886 = vmatprep.subr.msk.bf16.mxu1 %vm9613_vm2, %v8884_v26  ;;  %v8942_v5 = vpack.c.bf16 %v7774_v3, %v7770_v2  ;;  %v7773_v8 = vld [vmem:[%s12115_s0 + $0x420] sm:$0xff]  ;;  %v7778_v9 = vld [vmem:[%s12115_s0 + $0x448] sm:$0xff]  ;;  %v7776_v17 = vld [vmem:[%s12115_s0 + $0x438] sm:$0xff] }
  0x58   :  { %v7782_v11 = vld [vmem:[%s12115_s0 + $0x468] sm:$0x1]  ;;  %v8944_v12 = vpack.c.bf16 %v7773_v8, %v7769_v6  ;;  %v7777_v14 = vld [vmem:[%s12115_s0 + $0x440] sm:$0xff]  ;;  %v8952_v19 = vpack.c.bf16 %v7776_v17, %v7772_v16  ;;  %v7771_v20 = vld [vmem:[%s12115_s0 + $0x410] sm:$0xff] }
  0x59   :  { %7695 = vmatmul.mubr.msk.f32.gmra.mrb[38].mxu1 %vm50_vm3, %v9692_v41  ;;  %v8946_v13 = vpack.c.bf16 %v7782_v11, %v7778_v9  ;;  %v7781_v15 = vld [vmem:[%s12115_s0 + $0x460] sm:$0x1]  ;;  %v7775_v21 = vld [vmem:[%s12115_s0 + $0x430] sm:$0xff]  ;;  %v7780_v22 = vld [vmem:[%s12115_s0 + $0x458] sm:$0xff] }
  0x5a   :  { %8889 = vmatpush1.bf16.msk.msra.mxu1 %vm9613_vm2, %v8887_v31  ;;  %1676 = vmatprep.mubr.f32.mxu1 %v9543_v7  ;;  %v8949_v18 = vpack.c.bf16 %v7781_v15, %v7777_v14  ;;  %v7784_v23 = vld [vmem:[%s12115_s0 + $0x478] sm:$0x1]  ;;  %v8954_v25 = vpack.c.bf16 %v7775_v21, %v7771_v20  ;;  %v7779_v27 = vld [vmem:[%s12115_s0 + $0x450] sm:$0xff]  ;;  %v7801_v29 = vld [vmem:[%s12115_s0 + $0x488] sm:$0xff] }
  0x5b   :  { %8895 = vmatprep.subr.bf16.mxu1 %v8894_v32  ;;  %v8956_v26 = vpack.c.bf16 %v7784_v23, %v7780_v22  ;;  %v7783_v28 = vld [vmem:[%s12115_s0 + $0x470] sm:$0x1]  ;;  %v7805_v30 = vld [vmem:[%s12115_s0 + $0x4a8] sm:$0xff]  ;;  %v7800_v33 = vld [vmem:[%s12115_s0 + $0x480] sm:$0xff] }
  0x5c   :  { %v8959_v31 = vpack.c.bf16 %v7783_v28, %v7779_v27  ;;  %v8966_v32 = vpack.c.bf16 %v7805_v30, %v7801_v29  ;;  %v7804_v34 = vld [vmem:[%s12115_s0 + $0x4a0] sm:$0xff]  ;;  %v7809_v36 = vld [vmem:[%s12115_s0 + $0x4c8] sm:$0xff]  ;;  %v7803_v43 = vld [vmem:[%s12115_s0 + $0x498] sm:$0xff] }
  0x5d   :  { %7698 = vmatmul.mubr.msk.f32.vlgmr.msra.gmra.mrb[40].mxu1 %vm50_vm3, %v9652_v24  ;;  %v7808_v40 = vld [vmem:[%s12115_s0 + $0x4c0] sm:$0xff]  ;;  %v7802_v47 = vld [vmem:[%s12115_s0 + $0x490] sm:$0xff]  ;;  %v7811_v49 = vld [vmem:[%s12115_s0 + $0x4d8] sm:$0xff] }
  0x5e   :  { %8897 = vmatpush1.bf16.msra.mxu1 %v8896_v37  ;;  %1682 = vmatprep.mubr.f32.mxu1 %v9543_v7  ;;  %v7813_v37 = vld [vmem:[%s12115_s0 + $0x4e8] sm:$0x1]  ;;  %v7812_v42 = vld [vmem:[%s12115_s0 + $0x4e0] sm:$0x1]  ;;  %v7806_v48 = vld [vmem:[%s12115_s0 + $0x4b0] sm:$0xff] }
  0x5f   :  { %8900 = vmatprep.subr.msk.bf16.mxu1 %vm9613_vm2, %v8898_v38  ;;  %v8968_v38 = vpack.c.bf16 %v7804_v34, %v7800_v33  ;;  %v8970_v39 = vpack.c.bf16 %v7813_v37, %v7809_v36  ;;  %v7810_v53 = vld [vmem:[%s12115_s0 + $0x4d0] sm:$0xff]  ;;  %v7832_v55 = vld [vmem:[%s12115_s0 + $0x508] sm:$0xff]  ;;  %v7831_v59 = vld [vmem:[%s12115_s0 + $0x500] sm:$0xff] }
  0x60   :  { %v7814_v54 = vld [vmem:[%s12115_s0 + $0x4f0] sm:$0x1]  ;;  %v7835_v60 = vld [vmem:[%s12115_s0 + $0x520] sm:$0xff]  ;;  %v7840_v61 = vld [vmem:[%s12115_s0 + $0x548] sm:$0xff] }
  0x61   :  { %7699 = vmatmul.mubr.msk.f32.gmra.mrb[42].mxu1 %vm50_vm3, %v9692_v41  ;;  %v7839_v1 = vld [vmem:[%s12115_s0 + $0x540] sm:$0xff]  ;;  %v7863_v3 = vld [vmem:[%s12115_s0 + $0x588] sm:$0xff]  ;;  %v7865_v17 = vld [vmem:[%s12115_s0 + $0x598] sm:$0xff] }
  0x62   :  { %8903 = vmatpush1.bf16.msk.msra.mxu1 %vm9613_vm2, %v8901_v44  ;;  %1891 = vmatprep.mubr.f32.mxu1 %v9543_v7  ;;  %v7807_v44 = vld [vmem:[%s12115_s0 + $0x4b8] sm:$0xff]  ;;  %v7843_v2 = vld [vmem:[%s12115_s0 + $0x560] sm:$0x1]  ;;  %v7871_v11 = vld [vmem:[%s12115_s0 + $0x5c8] sm:$0xff] }
  0x63   :  { %8919 = vmatprep.subr.bf16.mxu1 %v8918_v45  ;;  %v8973_v45 = vpack.c.bf16 %v7812_v42, %v7808_v40  ;;  %v8976_v46 = vpack.c.bf16 %v7807_v44, %v7803_v43  ;;  %v7862_v8 = vld [vmem:[%s12115_s0 + $0x580] sm:$0xff]  ;;  %v7864_v21 = vld [vmem:[%s12115_s0 + $0x590] sm:$0xff]  ;;  %v7873_v23 = vld [vmem:[%s12115_s0 + $0x5d8] sm:$0xff] }
  0x64   :  { %v7866_v9 = vld [vmem:[%s12115_s0 + $0x5a0] sm:$0xff]  ;;  %v7868_v22 = vld [vmem:[%s12115_s0 + $0x5b0] sm:$0xff]  ;;  %v7894_v30 = vld [vmem:[%s12115_s0 + $0x608] sm:$0xff] }
  0x65   :  { %7725 = vmatmul.mubr.msk.f32.vlgmr.msra.gmra.mrb[44].mxu1 %vm50_vm3, %v9652_v24  ;;  %v7870_v15 = vld [vmem:[%s12115_s0 + $0x5c0] sm:$0xff]  ;;  %v7872_v28 = vld [vmem:[%s12115_s0 + $0x5d0] sm:$0xff]  ;;  %v7902_v37 = vld [vmem:[%s12115_s0 + $0x648] sm:$0xff] }
  0x66   :  { %8921 = vmatpush1.bf16.msra.mxu1 %v8920_v50  ;;  %1897 = vmatprep.mubr.f32.mxu1 %v9543_v7  ;;  %v7815_v50 = vld [vmem:[%s12115_s0 + $0x4f8] sm:$0x1]  ;;  %v7874_v16 = vld [vmem:[%s12115_s0 + $0x5e0] sm:$0x1]  ;;  %v7876_v29 = vld [vmem:[%s12115_s0 + $0x5f0] sm:$0x1] }
  0x67   :  { %8924 = vmatprep.subr.msk.bf16.mxu1 %vm9613_vm2, %v8922_v51  ;;  %v8978_v51 = vpack.c.bf16 %v7806_v48, %v7802_v47  ;;  %v8980_v52 = vpack.c.bf16 %v7815_v50, %v7811_v49  ;;  %v7893_v34 = vld [vmem:[%s12115_s0 + $0x600] sm:$0xff]  ;;  %v7896_v44 = vld [vmem:[%s12115_s0 + $0x618] sm:$0xff]  ;;  %v7895_v48 = vld [vmem:[%s12115_s0 + $0x610] sm:$0xff] }
  0x68   :  { %v7897_v36 = vld [vmem:[%s12115_s0 + $0x620] sm:$0xff]  ;;  %v7899_v49 = vld [vmem:[%s12115_s0 + $0x630] sm:$0xff]  ;;  %v7904_v50 = vld [vmem:[%s12115_s0 + $0x658] sm:$0xff] }
  0x69   :  { %7726 = vmatmul.mubr.msk.f32.gmra.mrb[46].mxu1 %vm50_vm3, %v9692_v41  ;;  %v7901_v42 = vld [vmem:[%s12115_s0 + $0x640] sm:$0xff]  ;;  %vm10750_vm6 = vmpackc.low %vm454_vm5, %vm9544_vm1 }
  0x6a   :  { %8927 = vmatpush1.bf16.msk.msra.mxu1 %vm9613_vm2, %v8925_v56  ;;  %2183 = vmatprep.mubr.f32.mxu1 %v9543_v7  ;;  %v7836_v56 = vld [vmem:[%s12115_s0 + $0x528] sm:$0xff]  ;;  %v7905_v43 = vld [vmem:[%s12115_s0 + $0x660] sm:$0x1] }
  0x6b   :  { %8929 = vmatprep.subr.bf16.mxu1 %v8928_v57  ;;  %v8983_v57 = vpack.c.bf16 %v7814_v54, %v7810_v53  ;;  %v8990_v58 = vpack.c.bf16 %v7836_v56, %v7832_v55  ;;  %v7903_v54 = vld [vmem:[%s12115_s0 + $0x650] sm:$0xff]  ;;  %v7925_v56 = vld [vmem:[%s12115_s0 + $0x688] sm:$0xff] }
  0x6c   :  { %v7907_v55 = vld [vmem:[%s12115_s0 + $0x670] sm:$0x1] }
  0x6d   :  { %7756 = vmatmul.mubr.msk.f32.vlgmr.msra.gmra.mrb[48].mxu1 %vm50_vm3, %v9652_v24 }
  0x6e   :  { %8931 = vmatpush1.bf16.msra.mxu1 %v8930_v62  ;;  %2189 = vmatprep.mubr.f32.mxu1 %v9543_v7  ;;  %v7844_v62 = vld [vmem:[%s12115_s0 + $0x568] sm:$0x1] }
  0x6f   :  { %8934 = vmatprep.subr.msk.bf16.mxu1 %vm9613_vm2, %v8932_v63  ;;  %v8992_v63 = vpack.c.bf16 %v7835_v60, %v7831_v59  ;;  %v8994_v0 = vpack.c.bf16 %v7844_v62, %v7840_v61  ;;  %v7924_v60 = vld [vmem:[%s12115_s0 + $0x680] sm:$0xff]  ;;  %v7933_v62 = vld [vmem:[%s12115_s0 + $0x6c8] sm:$0xff] }
  0x70   :  { %v7928_v61 = vld [vmem:[%s12115_s0 + $0x6a0] sm:$0xff] }
  0x71   :  { %7757 = vmatmul.mubr.msk.f32.gmra.mrb[50].mxu1 %vm50_vm3, %v9692_v41 }
  0x72   :  { %8937 = vmatpush1.bf16.msk.msra.mxu1 %vm9613_vm2, %v8935_v4  ;;  %2260 = vmatprep.mubr.f32.mxu1 %v9543_v7  ;;  %v7867_v4 = vld [vmem:[%s12115_s0 + $0x5a8] sm:$0xff] }
  0x73   :  { %8943 = vmatprep.subr.bf16.mxu1 %v8942_v5  ;;  %v8997_v5 = vpack.c.bf16 %v7843_v2, %v7839_v1  ;;  %v9014_v6 = vpack.c.bf16 %v7867_v4, %v7863_v3  ;;  %v7932_v2 = vld [vmem:[%s12115_s0 + $0x6c0] sm:$0xff]  ;;  %v7927_v4 = vld [vmem:[%s12115_s0 + $0x698] sm:$0xff] }
  0x74   :  { %v7936_v3 = vld [vmem:[%s12115_s0 + $0x6e0] sm:$0x1] }
  0x75   :  { %7760 = vmatmul.mubr.msk.f32.vlgmr.msra.gmra.mrb[52].mxu1 %vm50_vm3, %v9652_v24 }
  0x76   :  { %8945 = vmatpush1.bf16.msra.mxu1 %v8944_v12  ;;  %2266 = vmatprep.mubr.f32.mxu1 %v9543_v7  ;;  %v7875_v12 = vld [vmem:[%s12115_s0 + $0x5e8] sm:$0x1] }
  0x77   :  { %8948 = vmatprep.subr.msk.bf16.mxu1 %vm9613_vm2, %v8946_v13  ;;  %v9016_v13 = vpack.c.bf16 %v7866_v9, %v7862_v8  ;;  %v9018_v14 = vpack.c.bf16 %v7875_v12, %v7871_v11  ;;  %v7926_v9 = vld [vmem:[%s12115_s0 + $0x690] sm:$0xff]  ;;  %v7935_v12 = vld [vmem:[%s12115_s0 + $0x6d8] sm:$0xff] }
  0x78   :  { %v7930_v11 = vld [vmem:[%s12115_s0 + $0x6b0] sm:$0xff] }
  0x79   :  { %7761 = vmatmul.mubr.msk.f32.gmra.mrb[54].mxu1 %vm50_vm3, %v9692_v41 }
  0x7a   :  { %8951 = vmatpush1.bf16.msk.msra.mxu1 %vm9613_vm2, %v8949_v18  ;;  %2475 = vmatprep.mubr.f32.mxu1 %v9543_v7  ;;  %v7869_v18 = vld [vmem:[%s12115_s0 + $0x5b8] sm:$0xff] }
  0x7b   :  { %8953 = vmatprep.subr.bf16.mxu1 %v8952_v19  ;;  %v9021_v19 = vpack.c.bf16 %v7874_v16, %v7870_v15  ;;  %v9024_v20 = vpack.c.bf16 %v7869_v18, %v7865_v17  ;;  %v7934_v16 = vld [vmem:[%s12115_s0 + $0x6d0] sm:$0xff]  ;;  %v7956_v18 = vld [vmem:[%s12115_s0 + $0x708] sm:$0xff] }
  0x7c   :  { %v7938_v17 = vld [vmem:[%s12115_s0 + $0x6f0] sm:$0x1] }
  0x7d   :  { %7787 = vmatmul.mubr.msk.f32.vlgmr.msra.gmra.mrb[56].mxu1 %vm50_vm3, %v9652_v24 }
  0x7e   :  { %8955 = vmatpush1.bf16.msra.mxu1 %v8954_v25  ;;  %2481 = vmatprep.mubr.f32.mxu1 %v9543_v7  ;;  %v7877_v25 = vld [vmem:[%s12115_s0 + $0x5f8] sm:$0x1] }
  0x7f   :  { %8958 = vmatprep.subr.msk.bf16.mxu1 %vm9613_vm2, %v8956_v26  ;;  %v9026_v26 = vpack.c.bf16 %v7868_v22, %v7864_v21  ;;  %v9028_v27 = vpack.c.bf16 %v7877_v25, %v7873_v23  ;;  %v7955_v22 = vld [vmem:[%s12115_s0 + $0x700] sm:$0xff]  ;;  %v7968_v25 = vld [vmem:[%s12115_s0 + $0x768] sm:$0x1] }
  0x80   :  { %v7959_v23 = vld [vmem:[%s12115_s0 + $0x720] sm:$0xff] }
  0x81   :  { %7788 = vmatmul.mubr.msk.f32.gmra.mrb[58].mxu1 %vm50_vm3, %v9692_v41 }
  0x82   :  { %8961 = vmatpush1.bf16.msk.msra.mxu1 %vm9613_vm2, %v8959_v31  ;;  %2552 = vmatprep.mubr.f32.mxu1 %v9543_v7  ;;  %v7898_v31 = vld [vmem:[%s12115_s0 + $0x628] sm:$0xff] }
  0x83   :  { %8967 = vmatprep.subr.bf16.mxu1 %v8966_v32  ;;  %v9031_v32 = vpack.c.bf16 %v7876_v29, %v7872_v28  ;;  %v9038_v33 = vpack.c.bf16 %v7898_v31, %v7894_v30  ;;  %v7963_v28 = vld [vmem:[%s12115_s0 + $0x740] sm:$0xff]  ;;  %v7987_v30 = vld [vmem:[%s12115_s0 + $0x788] sm:$0xff] }
  0x84   :  { %v7967_v29 = vld [vmem:[%s12115_s0 + $0x760] sm:$0x1]  ;;  %v7991_v31 = vld [vmem:[%s12115_s0 + $0x7a8] sm:$0xff] }
  0x85   :  { %7791 = vmatmul.mubr.msk.f32.vlgmr.msra.gmra.mrb[60].mxu1 %vm50_vm3, %v9652_v24 }
  0x86   :  { %8969 = vmatpush1.bf16.msra.mxu1 %v8968_v38  ;;  %2558 = vmatprep.mubr.f32.mxu1 %v9543_v7  ;;  %v7906_v38 = vld [vmem:[%s12115_s0 + $0x668] sm:$0x1] }
  0x87   :  { %8972 = vmatprep.subr.msk.bf16.mxu1 %vm9613_vm2, %v8970_v39  ;;  %v9040_v39 = vpack.c.bf16 %v7897_v36, %v7893_v34  ;;  %v9042_v40 = vpack.c.bf16 %v7906_v38, %v7902_v37  ;;  %v9110_v34 = vpack.c.bf16 %v7991_v31, %v7987_v30  ;;  %v7986_v36 = vld [vmem:[%s12115_s0 + $0x780] sm:$0xff]  ;;  %v7995_v38 = vld [vmem:[%s12115_s0 + $0x7c8] sm:$0xff]  ;;  %v8027_v30 = vld [vmem:[%s12115_s0 + $0x850] sm:$0xff] }
  0x88   :  { %v7990_v37 = vld [vmem:[%s12115_s0 + $0x7a0] sm:$0xff]  ;;  %v8031_v31 = vld [vmem:[%s12115_s0 + $0x870] sm:$0x1] }
  0x89   :  { %7792 = vmatmul.mubr.msk.f32.gmra.mrb[62].mxu1 %vm50_vm3, %v9692_v41 }
  0x8a   :  { %8975 = vmatpush1.bf16.msk.msra.mxu1 %vm9613_vm2, %v8973_v45  ;;  %2767 = vmatprep.mubr.f32.mxu1 %v9543_v7  ;;  %v7900_v45 = vld [vmem:[%s12115_s0 + $0x638] sm:$0xff] }
  0x8b   :  { %8977 = vmatprep.subr.bf16.mxu1 %v8976_v46  ;;  %v9045_v46 = vpack.c.bf16 %v7905_v43, %v7901_v42  ;;  %v9048_v47 = vpack.c.bf16 %v7900_v45, %v7896_v44  ;;  %v7994_v43 = vld [vmem:[%s12115_s0 + $0x7c0] sm:$0xff]  ;;  %v7993_v45 = vld [vmem:[%s12115_s0 + $0x7b8] sm:$0xff] }
  0x8c   :  { %v7998_v44 = vld [vmem:[%s12115_s0 + $0x7e0] sm:$0x1] }
  0x8d   :  { %7818 = vmatmul.mubr.msk.f32.vlgmr.msra.gmra.mrb[64].mxu1 %vm50_vm3, %v9652_v24 }
  0x8e   :  { %8979 = vmatpush1.bf16.msra.mxu1 %v8978_v51  ;;  %2773 = vmatprep.mubr.f32.mxu1 %v9543_v7  ;;  %v7908_v51 = vld [vmem:[%s12115_s0 + $0x678] sm:$0x1] }
  0x8f   :  { %8982 = vmatprep.subr.msk.bf16.mxu1 %vm9613_vm2, %v8980_v52  ;;  %v9050_v52 = vpack.c.bf16 %v7899_v49, %v7895_v48  ;;  %v9052_v53 = vpack.c.bf16 %v7908_v51, %v7904_v50  ;;  %v7988_v48 = vld [vmem:[%s12115_s0 + $0x790] sm:$0xff]  ;;  %v7997_v50 = vld [vmem:[%s12115_s0 + $0x7d8] sm:$0xff] }
  0x90   :  { %v7992_v49 = vld [vmem:[%s12115_s0 + $0x7b0] sm:$0xff]  ;;  %v8001_v51 = vld [vmem:[%s12115_s0 + $0x7f8] sm:$0x1] }
  0x91   :  { %7819 = vmatmul.mubr.msk.f32.gmra.mrb[66].mxu1 %vm50_vm3, %v9692_v41 }
  0x92   :  { %8985 = vmatpush1.bf16.msk.msra.mxu1 %vm9613_vm2, %v8983_v57  ;;  %2844 = vmatprep.mubr.f32.mxu1 %v9543_v7  ;;  %v7929_v57 = vld [vmem:[%s12115_s0 + $0x6a8] sm:$0xff] }
  0x93   :  { %8991 = vmatprep.subr.bf16.mxu1 %v8990_v58  ;;  %v9055_v58 = vpack.c.bf16 %v7907_v55, %v7903_v54  ;;  %v9062_v59 = vpack.c.bf16 %v7929_v57, %v7925_v56  ;;  %v9124_v54 = vpack.c.bf16 %v8001_v51, %v7997_v50  ;;  %v7996_v55 = vld [vmem:[%s12115_s0 + $0x7d0] sm:$0xff]  ;;  %v8018_v57 = vld [vmem:[%s12115_s0 + $0x808] sm:$0xff] }
  0x94   :  { %v8000_v56 = vld [vmem:[%s12115_s0 + $0x7f0] sm:$0x1]  ;;  %v8057_v50 = vld [vmem:[%s12115_s0 + $0x8c8] sm:$0xff] }
  0x95   :  { %7822 = vmatmul.mubr.msk.f32.vlgmr.msra.gmra.mrb[68].mxu1 %vm50_vm3, %v9652_v24  ;;  %v8061_v51 = vld [vmem:[%s12115_s0 + $0x8e8] sm:$0x1] }
  0x96   :  { %8993 = vmatpush1.bf16.msra.mxu1 %v8992_v63  ;;  %2850 = vmatprep.mubr.f32.mxu1 %v9543_v7  ;;  %v7937_v63 = vld [vmem:[%s12115_s0 + $0x6e8] sm:$0x1] }
  0x97   :  { %8996 = vmatprep.subr.msk.bf16.mxu1 %vm9613_vm2, %v8994_v0  ;;  %v9064_v0 = vpack.c.bf16 %v7928_v61, %v7924_v60  ;;  %v9066_v1 = vpack.c.bf16 %v7937_v63, %v7933_v62  ;;  %v8017_v61 = vld [vmem:[%s12115_s0 + $0x800] sm:$0xff] }
  0x98   :  { %v8021_v62 = vld [vmem:[%s12115_s0 + $0x820] sm:$0xff] }
  0x99   :  { %7823 = vmatmul.mubr.msk.f32.gmra.mrb[70].mxu1 %vm50_vm3, %v9692_v41 }
  0x9a   :  { %8999 = vmatpush1.bf16.msk.msra.mxu1 %vm9613_vm2, %v8997_v5  ;;  %3059 = vmatprep.mubr.f32.mxu1 %v9543_v7  ;;  %v7931_v5 = vld [vmem:[%s12115_s0 + $0x6b8] sm:$0xff] }
  0x9b   :  { %9015 = vmatprep.subr.bf16.mxu1 %v9014_v6  ;;  %v9069_v6 = vpack.c.bf16 %v7936_v3, %v7932_v2  ;;  %v9072_v8 = vpack.c.bf16 %v7931_v5, %v7927_v4  ;;  %v9136_v4 = vpack.c.bf16 %v8021_v62, %v8017_v61 }
  0x9d   :  { %7849 = vmatmul.mubr.msk.f32.vlgmr.msra.gmra.mrb[72].mxu1 %vm50_vm3, %v9652_v24 }
  0x9e   :  { %9017 = vmatpush1.bf16.msra.mxu1 %v9016_v13  ;;  %3065 = vmatprep.mubr.f32.mxu1 %v9543_v7  ;;  %v7939_v13 = vld [vmem:[%s12115_s0 + $0x6f8] sm:$0x1] }
  0x9f   :  { %9020 = vmatprep.subr.msk.bf16.mxu1 %vm9613_vm2, %v9018_v14  ;;  %v9074_v14 = vpack.c.bf16 %v7930_v11, %v7926_v9  ;;  %v9076_v15 = vpack.c.bf16 %v7939_v13, %v7935_v12  ;;  %v8020_v11 = vld [vmem:[%s12115_s0 + $0x818] sm:$0xff] }
  0xa0   :  { %v8024_v12 = vld [vmem:[%s12115_s0 + $0x838] sm:$0xff] }
  0xa1   :  { %7850 = vmatmul.mubr.msk.f32.gmra.mrb[74].mxu1 %vm50_vm3, %v9692_v41 }
  0xa2   :  { %9023 = vmatpush1.bf16.msk.msra.mxu1 %vm9613_vm2, %v9021_v19  ;;  %3351 = vmatprep.mubr.f32.mxu1 %v9543_v7  ;;  %v7960_v19 = vld [vmem:[%s12115_s0 + $0x728] sm:$0xff] }
  0xa3   :  { %9025 = vmatprep.subr.bf16.mxu1 %v9024_v20  ;;  %v9079_v20 = vpack.c.bf16 %v7938_v17, %v7934_v16  ;;  %v9086_v21 = vpack.c.bf16 %v7960_v19, %v7956_v18  ;;  %v9144_v16 = vpack.c.bf16 %v8024_v12, %v8020_v11  ;;  %v8019_v17 = vld [vmem:[%s12115_s0 + $0x810] sm:$0xff] }
  0xa4   :  { %v8023_v18 = vld [vmem:[%s12115_s0 + $0x830] sm:$0xff] }
  0xa5   :  { %7880 = vmatmul.mubr.msk.f32.vlgmr.msra.gmra.mrb[76].mxu1 %vm50_vm3, %v9652_v24  ;;  %v8054_v11 = vld [vmem:[%s12115_s0 + $0x8b0] sm:$0xff] }
  0xa6   :  { %9027 = vmatpush1.bf16.msra.mxu1 %v9026_v26  ;;  %3357 = vmatprep.mubr.f32.mxu1 %v9543_v7  ;;  %v9088_v26 = vpack.c.bf16 %v7959_v23, %v7955_v22  ;;  %v8028_v22 = vld [vmem:[%s12115_s0 + $0x858] sm:$0xff] }
  0xa7   :  { %9030 = vmatprep.subr.msk.bf16.mxu1 %vm9613_vm2, %v9028_v27  ;;  %v8032_v23 = vld [vmem:[%s12115_s0 + $0x878] sm:$0x1] }
  0xa9   :  { %7881 = vmatmul.mubr.msk.f32.gmra.mrb[78].mxu1 %vm50_vm3, %v9692_v41 }
  0xaa   :  { %9033 = vmatpush1.bf16.msk.msra.mxu1 %vm9613_vm2, %v9031_v32  ;;  %3428 = vmatprep.mubr.f32.mxu1 %v9543_v7  ;;  %v10528_v32 = vld [vmem:[%s12116_s1] sm:$0xff] }
  0xab   :  { %9039 = vmatprep.subr.bf16.mxu1 %v9038_v33  ;;  %v9093_v33 = vpack.c.bf16 %v7967_v29, %v7963_v28  ;;  %v9146_v28 = vpack.c.bf16 %v8023_v18, %v8019_v17  ;;  %v9148_v29 = vpack.c.bf16 %v8032_v23, %v8028_v22  ;;  %v8058_v22 = vld [vmem:[%s12115_s0 + $0x8d0] sm:$0xff] }
  0xac   :  { %v8062_v23 = vld [vmem:[%s12115_s0 + $0x8f0] sm:$0x1] }
  0xad   :  { %7884 = vmatmul.mubr.msk.f32.vlgmr.msra.gmra.mrb[80].mxu1 %vm50_vm3, %v9652_v24 }
  0xae   :  { %9041 = vmatpush1.bf16.msra.mxu1 %v9040_v39  ;;  %3434 = vmatprep.mubr.f32.mxu1 %v9543_v7  ;;  %v7999_v39 = vld [vmem:[%s12115_s0 + $0x7e8] sm:$0x1] }
  0xaf   :  { %9044 = vmatprep.subr.msk.bf16.mxu1 %vm9613_vm2, %v9042_v40  ;;  %v9112_v40 = vpack.c.bf16 %v7990_v37, %v7986_v36  ;;  %v9114_v42 = vpack.c.bf16 %v7999_v39, %v7995_v38  ;;  %v8049_v38 = vld [vmem:[%s12115_s0 + $0x888] sm:$0xff] }
  0xb0   :  { %v8053_v39 = vld [vmem:[%s12115_s0 + $0x8a8] sm:$0xff] }
  0xb1   :  { %7885 = vmatmul.mubr.msk.f32.gmra.mrb[82].mxu1 %vm50_vm3, %v9692_v41 }
  0xb2   :  { %9047 = vmatpush1.bf16.msk.msra.mxu1 %vm9613_vm2, %v9045_v46  ;;  %3643 = vmatprep.mubr.f32.mxu1 %v9543_v7  ;;  %v9117_v46 = vpack.c.bf16 %v7998_v44, %v7994_v43  ;;  %v9151_v44 = vpack.c.bf16 %v8031_v31, %v8027_v30  ;;  %v8289_v31 = vld [vmem:[%s12118_s3 + $0x240] sm:$0xff] }
  0xb3   :  { %9049 = vmatprep.subr.bf16.mxu1 %v9048_v47 }
  0xb5   :  { %7911 = vmatmul.mubr.msk.f32.vlgmr.msra.gmra.mrb[84].mxu1 %vm50_vm3, %v9652_v24 }
  0xb6   :  { %9051 = vmatpush1.bf16.msra.mxu1 %v9050_v52  ;;  %3649 = vmatprep.mubr.f32.mxu1 %v9543_v7  ;;  %v10584_v52 = vld [vmem:[%s12116_s1 + $0x8] sm:$0x3] }
  0xb7   :  { %9054 = vmatprep.subr.msk.bf16.mxu1 %vm9613_vm2, %v9052_v53  ;;  %v9122_v53 = vpack.c.bf16 %v7992_v49, %v7988_v48 }
  0xb9   :  { %7912 = vmatmul.mubr.msk.f32.gmra.mrb[86].mxu1 %vm50_vm3, %v9692_v41 }
  0xba   :  { %9057 = vmatpush1.bf16.msk.msra.mxu1 %vm9613_vm2, %v9055_v58  ;;  %3720 = vmatprep.mubr.f32.mxu1 %v9543_v7  ;;  %v8022_v58 = vld [vmem:[%s12115_s0 + $0x828] sm:$0xff] }
  0xbb   :  { %9063 = vmatprep.subr.bf16.mxu1 %v9062_v59  ;;  %v9127_v59 = vpack.c.bf16 %v8000_v56, %v7996_v55  ;;  %v9134_v60 = vpack.c.bf16 %v8022_v58, %v8018_v57  ;;  %v9162_v58 = vpack.c.bf16 %v8061_v51, %v8057_v50  ;;  %v8091_v50 = vld [vmem:[%s12115_s0 + $0x960] sm:$0x1] }
  0xbd   :  { %7915 = vmatmul.mubr.msk.f32.vlgmr.msra.gmra.mrb[88].mxu1 %vm50_vm3, %v9652_v24 }
  0xbe   :  { %9065 = vmatpush1.bf16.msra.mxu1 %v9064_v0  ;;  %3726 = vmatprep.mubr.f32.mxu1 %v9543_v7  ;;  %v8026_v0 = vld [vmem:[%s12115_s0 + $0x848] sm:$0xff] }
  0xbf   :  { %9068 = vmatprep.subr.msk.bf16.mxu1 %vm9613_vm2, %v9066_v1  ;;  %v8030_v1 = vld [vmem:[%s12115_s0 + $0x868] sm:$0x1] }
  0xc0   :  { %v9138_v5 = vpack.c.bf16 %v8030_v1, %v8026_v0  ;;  %v8055_v0 = vld [vmem:[%s12115_s0 + $0x8b8] sm:$0xff] }
  0xc1   :  { %7916 = vmatmul.mubr.msk.f32.gmra.mrb[90].mxu1 %vm50_vm3, %v9692_v41 }
  0xc2   :  { %9071 = vmatpush1.bf16.msk.msra.mxu1 %vm9613_vm2, %v9069_v6  ;;  %3935 = vmatprep.mubr.f32.mxu1 %v9543_v7  ;;  %v8025_v6 = vld [vmem:[%s12115_s0 + $0x840] sm:$0xff] }
  0xc3   :  { %9073 = vmatprep.subr.bf16.mxu1 %v9072_v8  ;;  %v8029_v8 = vld [vmem:[%s12115_s0 + $0x860] sm:$0x1] }
  0xc5   :  { %7942 = vmatmul.mubr.msk.f32.vlgmr.msra.gmra.mrb[92].mxu1 %vm50_vm3, %v9652_v24  ;;  %v7964_v24 = vld [vmem:[%s12115_s0 + $0x748] sm:$0xff] }
  0xc6   :  { %9075 = vmatpush1.bf16.msra.mxu1 %v9074_v14  ;;  %3941 = vmatprep.mubr.f32.mxu1 %v9543_v7  ;;  %v9090_v27 = vpack.c.bf16 %v7968_v25, %v7964_v24  ;;  %v10656_v25 = vpop.permute.xlu0 %232 }
  0xc7   :  { %9078 = vmatprep.subr.msk.bf16.mxu1 %vm9613_vm2, %v9076_v15  ;;  %v9141_v15 = vpack.c.bf16 %v8029_v8, %v8025_v6 }
  0xc9   :  { %7943 = vmatmul.mubr.msk.f32.gmra.mrb[94].mxu1 %vm50_vm3, %v9692_v41 }
  0xca   :  { %9081 = vmatpush1.bf16.msk.msra.mxu1 %vm9613_vm2, %v9079_v20  ;;  %4012 = vmatprep.mubr.f32.mxu1 %v9543_v7 }
  0xcb   :  { %9087 = vmatprep.subr.bf16.mxu1 %v9086_v21 }
  0xcd   :  { %7946 = vmatmul.mubr.msk.f32.vlgmr.msra.gmra.mrb[96].mxu1 %vm50_vm3, %v10528_v32 }
  0xce   :  { %9089 = vmatpush1.bf16.msra.mxu1 %v9088_v26  ;;  %4018 = vmatprep.mubr.f32.mxu1 %v9543_v7 }
  0xcf   :  { %9092 = vmatprep.subr.msk.bf16.mxu1 %vm9613_vm2, %v9090_v27 }
  0xd1   :  { %7947 = vmatmul.mubr.msk.f32.gmra.mrb[98].mxu1 %vm50_vm3, %v9692_v41  ;;  %v7989_v41 = vld [vmem:[%s12115_s0 + $0x798] sm:$0xff] }
  0xd2   :  { %9095 = vmatpush1.bf16.msk.msra.mxu1 %vm9613_vm2, %v9093_v33  ;;  %4227 = vmatprep.mubr.f32.mxu1 %v9543_v7  ;;  %v9120_v47 = vpack.c.bf16 %v7993_v45, %v7989_v41  ;;  %v10676_v41 = vpop.permute.xlu0 %237  ;;  %v9158_v45 = vpack.c.bf16 %v8053_v39, %v8049_v38  ;;  %v8079_v38 = vld [vmem:[%s12115_s0 + $0x900] sm:$0xff] }
  0xd3   :  { %9111 = vmatprep.subr.bf16.mxu1 %v9110_v34  ;;  %v8083_v39 = vld [vmem:[%s12115_s0 + $0x920] sm:$0xff] }
  0xd5   :  { %7973 = vmatmul.mubr.msk.f32.vlgmr.msra.gmra.mrb[100].mxu1 %vm50_vm3, %v10528_v32 }
  0xd6   :  { %9113 = vmatpush1.bf16.msra.mxu1 %v9112_v40  ;;  %4233 = vmatprep.mubr.f32.mxu1 %v9543_v7 }
  0xd7   :  { %9116 = vmatprep.subr.msk.bf16.mxu1 %vm9613_vm2, %v9114_v42 }
  0xd9   :  { %7974 = vmatmul.mubr.msk.f32.gmra.mrb[102].mxu1 %vm50_vm3, %v10584_v52 }
  0xda   :  { %9119 = vmatpush1.bf16.msk.msra.mxu1 %vm9613_vm2, %v9117_v46  ;;  %4519 = vmatprep.mubr.f32.mxu1 %v9543_v7  ;;  %v8048_v46 = vld [vmem:[%s12115_s0 + $0x880] sm:$0xff] }
  0xdb   :  { %9121 = vmatprep.subr.bf16.mxu1 %v9120_v47  ;;  %v8052_v47 = vld [vmem:[%s12115_s0 + $0x8a0] sm:$0xff] }
  0xdc   :  { %v9160_v56 = vpack.c.bf16 %v8052_v47, %v8048_v46  ;;  %v9184_v47 = vpack.c.bf16 %v8083_v39, %v8079_v38  ;;  %v8120_v39 = vld [vmem:[%s12115_s0 + $0x9d0] sm:$0xff] }
  0xdd   :  { %8004 = vmatmul.mubr.msk.f32.vlgmr.msra.gmra.mrb[104].mxu1 %vm50_vm3, %v10528_v32 }
  0xde   :  { %9123 = vmatpush1.bf16.msra.mxu1 %v9122_v53  ;;  %4525 = vmatprep.mubr.f32.mxu1 %v9543_v7 }
  0xdf   :  { %9126 = vmatprep.subr.msk.bf16.mxu1 %vm9613_vm2, %v9124_v54 }
  0xe0   :  { %v136_v63 = vpop.f32.mrb[0].mxu1 }
  0xe1   :  { %v138_v2 = vpop.f32.mrb[1].mxu1  ;;  %8005 = vmatmul.mubr.msk.f32.gmra.mrb[106].mxu1 %vm50_vm3, %v10584_v52 }
  0xe2   :  { %v224_v3 = vmax.f32 %v136_v63, %v138_v2  ;;  %9129 = vmatpush1.bf16.msk.msra.mxu1 %vm9613_vm2, %v9127_v59  ;;  %4596 = vmatprep.mubr.f32.mxu1 %v9543_v7  ;;  %v8056_v59 = vld [vmem:[%s12115_s0 + $0x8c0] sm:$0xff]  ;;  %v8051_v63 = vld [vmem:[%s12115_s0 + $0x898] sm:$0xff] }
  0xe3   :  { %9135 = vmatprep.subr.bf16.mxu1 %v9134_v60  ;;  %v8060_v60 = vld [vmem:[%s12115_s0 + $0x8e0] sm:$0x1]  ;;  %v9168_v8 = vpack.c.bf16 %v8055_v0, %v8051_v63 }
  0xe4   :  { %v142_v9 = vpop.f32.mrb[2].mxu1 }
  0xe5   :  { %v144_v13 = vpop.f32.mrb[3].mxu1  ;;  %8008 = vmatmul.mubr.msk.f32.vlgmr.msra.gmra.mrb[108].mxu1 %vm50_vm3, %v10528_v32 }
  0xe6   :  { %v225_v14 = vmax.f32 %v142_v9, %v144_v13  ;;  %9137 = vmatpush1.bf16.msra.mxu1 %v9136_v4  ;;  %4602 = vmatprep.mubr.f32.mxu1 %v9543_v7  ;;  %v342_v19 = vpop.f32.mrb[0].mxu0  ;;  %v8050_v9 = vld [vmem:[%s12115_s0 + $0x890] sm:$0xff] }
  0xe7   :  { %9140 = vmatprep.subr.msk.bf16.mxu1 %vm9613_vm2, %v9138_v5  ;;  %v344_v21 = vpop.f32.mrb[1].mxu0  ;;  %v9165_v5 = vpack.c.bf16 %v8060_v60, %v8056_v59 }
  0xe8   :  { %v213_v20 = vpop.f32.mrb[4].mxu1  ;;  %v430_v26 = vmax.f32 %v342_v19, %v344_v21 }
  0xe9   :  { %v215_v24 = vpop.f32.mrb[5].mxu1  ;;  %8009 = vmatmul.mubr.msk.f32.gmra.mrb[110].mxu1 %vm50_vm3, %v10584_v52 }
  0xea   :  { %v226_v27 = vmax.f32 %v213_v20, %v215_v24  ;;  %9143 = vmatpush1.bf16.msk.msra.mxu1 %vm9613_vm2, %v9141_v15  ;;  %4811 = vmatprep.mubr.f32.mxu1 %v9543_v7  ;;  %v348_v33 = vpop.f32.mrb[2].mxu0  ;;  %v8059_v15 = vld [vmem:[%s12115_s0 + $0x8d8] sm:$0xff]  ;;  %v9170_v20 = vpack.c.bf16 %v8054_v11, %v8050_v9 }
  0xeb   :  { %9145 = vmatprep.subr.bf16.mxu1 %v9144_v16  ;;  %v350_v37 = vpop.f32.mrb[3].mxu0  ;;  %v8063_v16 = vld [vmem:[%s12115_s0 + $0x8f8] sm:$0x1] }
  0xec   :  { %v228_v34 = vmax.f32 %v224_v3, %v226_v27  ;;  %v219_v36 = vpop.f32.mrb[6].mxu1  ;;  %v431_v42 = vmax.f32 %v348_v33, %v350_v37  ;;  %v9172_v21 = vpack.c.bf16 %v8063_v16, %v8059_v15 }
  0xed   :  { %v221_v40 = vpop.f32.mrb[7].mxu1  ;;  %8035 = vmatmul.mubr.msk.f32.vlgmr.msra.gmra.mrb[112].mxu1 %vm50_vm3, %v10528_v32 }
  0xee   :  { %v227_v43 = vmax.f32 %v219_v36, %v221_v40  ;;  %9147 = vmatpush1.bf16.msra.mxu1 %v9146_v28  ;;  %4817 = vmatprep.mubr.f32.mxu1 %v9543_v7  ;;  %v240_v53 = vadd.f32 %v10656_v25, %v228_v34  ;;  %v8080_v28 = vld [vmem:[%s12115_s0 + $0x908] sm:$0xff]  ;;  %v9175_v36 = vpack.c.bf16 %v8062_v23, %v8058_v22 }
  0xef   :  { %9150 = vmatprep.subr.msk.bf16.mxu1 %vm9613_vm2, %v9148_v29  ;;  %v8084_v29 = vld [vmem:[%s12115_s0 + $0x928] sm:$0xff] }
  0xf0   :  { %v229_v48 = vmax.f32 %v225_v14, %v227_v43  ;;  %v419_v49 = vpop.f32.mrb[8].mxu1  ;;  %v242_v1 = vmax.f32 %v240_v53, 0.0  ;;  %v9182_v37 = vpack.c.bf16 %v8084_v29, %v8080_v28  ;;  %v8088_v43 = vld [vmem:[%s12115_s0 + $0x948] sm:$0xff] }
  0xf1   :  { %v421_v54 = vpop.f32.mrb[9].mxu1  ;;  %8036 = vmatmul.mubr.msk.f32.gmra.mrb[114].mxu1 %vm50_vm3, %v10584_v52  ;;  %v245_v29 = vld [vmem:[%s12118_s3 + $0x8] sm:$0xff] }
  0xf2   :  { %v432_v55 = vmax.f32 %v419_v49, %v421_v54  ;;  %9153 = vmatpush1.bf16.msk.msra.mxu1 %vm9613_vm2, %v9151_v44  ;;  %4888 = vmatprep.mubr.f32.mxu1 %v9543_v7  ;;  %v241_v57 = vadd.f32 %v10676_v41, %v229_v48  ;;  %v8092_v44 = vld [vmem:[%s12115_s0 + $0x968] sm:$0x1]  ;;  %v8087_v49 = vld [vmem:[%s12115_s0 + $0x940] sm:$0xff] }
  0xf3   :  { %9159 = vmatprep.subr.bf16.mxu1 %v9158_v45  ;;  %v9186_v48 = vpack.c.bf16 %v8092_v44, %v8088_v43  ;;  %v7573_v54 = vld [vmem:[%s12118_s3 + $0x20] sm:$0xff]  ;;  %v9189_v59 = vpack.c.bf16 %v8091_v50, %v8087_v49  ;;  %v246_v44 = vld [vmem:[%s12118_s3 + $0x10] sm:$0xf] }
  0xf4   :  { %v434_v61 = vmax.f32 %v430_v26, %v432_v55  ;;  %v425_v62 = vpop.f32.mrb[10].mxu1  ;;  %v243_v2 = vmax.f32 %v241_v57, 0.0  ;;  %v8111_v55 = vld [vmem:[%s12115_s0 + $0x988] sm:$0xff] }
  0xf5   :  { %v427_v3 = vpop.f32.mrb[11].mxu1  ;;  %8039 = vmatmul.mubr.msk.f32.vlgmr.msra.gmra.mrb[116].mxu1 %vm50_vm3, %v10528_v32 }
  0xf6   :  { %v433_v4 = vmax.f32 %v425_v62, %v427_v3  ;;  %9161 = vmatpush1.bf16.msra.mxu1 %v9160_v56  ;;  %4894 = vmatprep.mubr.f32.mxu1 %v9543_v7  ;;  %v8795_v6 = vpack.c.bf16 %v243_v2, %v242_v1  ;;  %v436_v12 = vadd.f32 %v434_v61, %v10656_v25  ;;  %v8115_v56 = vld [vmem:[%s12115_s0 + $0x9a8] sm:$0xff]  ;;  %v8110_v61 = vld [vmem:[%s12115_s0 + $0x980] sm:$0xff] }
  0xf7   :  { %9164 = vmatprep.subr.msk.bf16.mxu1 %vm9613_vm2, %v9162_v58  ;;  %v9206_v60 = vpack.c.bf16 %v8115_v56, %v8111_v55  ;;  %v8114_v62 = vld [vmem:[%s12115_s0 + $0x9a0] sm:$0xff]  ;;  %v7574_v2 = vld [vmem:[%s12118_s3 + $0x28] sm:$0xf] }
  0xf8   :  { %v435_v13 = vmax.f32 %v431_v42, %v433_v4  ;;  %v725_v14 = vpop.f32.mrb[12].mxu1  ;;  %v438_v24 = vmax.f32 %v436_v12, 0.0  ;;  %v7572_v42 = vld [vmem:[%s12118_s3 + $0x18] sm:$0xff]  ;;  %v8119_v3 = vld [vmem:[%s12115_s0 + $0x9c8] sm:$0xff]  ;;  %v9208_v9 = vpack.c.bf16 %v8114_v62, %v8110_v61  ;;  %v8118_v12 = vld [vmem:[%s12115_s0 + $0x9c0] sm:$0xff] }
  0xf9   :  { %v727_v17 = vpop.f32.mrb[13].mxu1  ;;  %8040 = vmatmul.mubr.msk.f32.gmra.mrb[118].mxu1 %vm50_vm3, %v10584_v52  ;;  %v8123_v4 = vld [vmem:[%s12115_s0 + $0x9e8] sm:$0x1] }
  0xfa   :  { %v437_v18 = vadd.f32 %v435_v13, %v10676_v41  ;;  %v813_v19 = vmax.f32 %v725_v14, %v727_v17  ;;  %9167 = vmatpush1.bf16.msk.msra.mxu1 %vm9613_vm2, %v9165_v5  ;;  %5103 = vmatprep.mubr.f32.mxu1 %v9543_v7  ;;  %v9210_v11 = vpack.c.bf16 %v8123_v4, %v8119_v3  ;;  %v8122_v13 = vld [vmem:[%s12115_s0 + $0x9e0] sm:$0x1] }
  0xfb   :  { %9169 = vmatprep.subr.bf16.mxu1 %v9168_v8  ;;  %v244_v17 = vld [vmem:[%s12118_s3] sm:$0xff]  ;;  %v9213_v23 = vpack.c.bf16 %v8122_v13, %v8118_v12 }
  0xfc   :  { %v439_v26 = vmax.f32 %v437_v18, 0.0  ;;  %v731_v27 = vpop.f32.mrb[14].mxu1  ;;  %v8113_v18 = vld [vmem:[%s12115_s0 + $0x998] sm:$0xff] }
  0xfd   :  { %v733_v30 = vpop.f32.mrb[15].mxu1  ;;  %8066 = vmatmul.mubr.msk.f32.vlgmr.msra.gmra.mrb[120].mxu1 %vm50_vm3, %v10528_v32 }
  0xfe   :  { %v8791_v33 = vpack.c.bf16 %v439_v26, %v438_v24  ;;  %v814_v34 = vmax.f32 %v731_v27, %v733_v30  ;;  %9171 = vmatpush1.bf16.msra.mxu1 %v9170_v20  ;;  %5109 = vmatprep.mubr.f32.mxu1 %v9543_v7  ;;  %v8112_v26 = vld [vmem:[%s12115_s0 + $0x990] sm:$0xff]  ;;  %v8121_v30 = vld [vmem:[%s12115_s0 + $0x9d8] sm:$0xff] }
  0xff   :  { %9174 = vmatprep.subr.msk.bf16.mxu1 %vm9613_vm2, %v9172_v21  ;;  %v8116_v27 = vld [vmem:[%s12115_s0 + $0x9b0] sm:$0xff] }
 0x100   :  { %8793 = vmatpush3.bf16.msk.msra.mxu0 %vm10750_vm6, %v8791_v33  ;;  %v802_v40 = vpop.f32.mrb[16].mxu1  ;;  %v8125_v33 = vld [vmem:[%s12115_s0 + $0x9f8] sm:$0x1] }
 0x101   :  { %v804_v45 = vpop.f32.mrb[17].mxu1  ;;  %8067 = vmatmul.mubr.msk.f32.gmra.mrb[122].mxu1 %vm50_vm3, %v10584_v52  ;;  %8794 = vmatprep.subr.bf16.mxu0 %v9546_v35  ;;  %v9220_v38 = vpack.c.bf16 %v8125_v33, %v8121_v30  ;;  %v7638_v33 = vld [vmem:[%s12118_s3 + $0x48] sm:$0xff] }
 0x102   :  { %v815_v46 = vmax.f32 %v802_v40, %v804_v45  ;;  %9177 = vmatpush1.bf16.msk.msra.mxu1 %vm9613_vm2, %v9175_v36  ;;  %5180 = vmatprep.mubr.f32.mxu1 %v9543_v7  ;;  %v8124_v40 = vld [vmem:[%s12115_s0 + $0x9f0] sm:$0x1]  ;;  %v8142_v45 = vld [vmem:[%s12115_s0 + $0xa08] sm:$0xff] }
 0x103   :  { %8430 = vmatmul.mubr.msk.f32.vlgmr.msra.gmra.mrb[4].mxu0 %vm444_vm7, %v7572_v42  ;;  %9183 = vmatprep.subr.bf16.mxu1 %v9182_v37  ;;  %v9218_v37 = vpack.c.bf16 %v8116_v27, %v8112_v26  ;;  %v9223_v49 = vpack.c.bf16 %v8124_v40, %v8120_v39  ;;  %v8151_v27 = vld [vmem:[%s12115_s0 + $0xa50] sm:$0xff] }
 0x104   :  { %v817_v51 = vmax.f32 %v813_v19, %v815_v46  ;;  %8797 = vmatpush3.bf16.msk.msra.mxu0 %vm10750_vm6, %v8795_v6  ;;  %v808_v53 = vpop.f32.mrb[18].mxu1  ;;  %8432 = vmatprep.mubr.msk.f32.mxu0 %vm9547_vm4, %v9543_v7  ;;  %v8117_v19 = vld [vmem:[%s12115_s0 + $0x9b8] sm:$0xff]  ;;  %v8146_v46 = vld [vmem:[%s12115_s0 + $0xa28] sm:$0xff] }
 0x105   :  { %v810_v57 = vpop.f32.mrb[19].mxu1  ;;  %8070 = vmatmul.mubr.msk.f32.vlgmr.msra.gmra.mrb[124].mxu1 %vm50_vm3, %v10528_v32  ;;  %8818 = vmatprep.subr.bf16.mxu0 %v9546_v35  ;;  %v9216_v24 = vpack.c.bf16 %v8117_v19, %v8113_v18  ;;  %v9230_v50 = vpack.c.bf16 %v8146_v46, %v8142_v45  ;;  %v7609_v19 = vld [vmem:[%s12118_s3 + $0x40] sm:$0xf] }
 0x106   :  { %v816_v58 = vmax.f32 %v808_v53, %v810_v57  ;;  %9185 = vmatpush1.bf16.msra.mxu1 %v9184_v47  ;;  %5186 = vmatprep.mubr.f32.mxu1 %v9543_v7  ;;  %v819_v63 = vadd.f32 %v817_v51, %v10656_v25  ;;  %v8141_v51 = vld [vmem:[%s12115_s0 + $0xa00] sm:$0xff]  ;;  %v7607_v57 = vld [vmem:[%s12118_s3 + $0x30] sm:$0xff] }
 0x107   :  { %8433 = vmatmul.mubr.msk.f32.gmra.mrb[6].mxu0 %vm444_vm7, %v7573_v54  ;;  %9188 = vmatprep.subr.msk.bf16.mxu1 %vm9613_vm2, %v9186_v48  ;;  %v8145_v53 = vld [vmem:[%s12115_s0 + $0xa20] sm:$0xff] }
 0x108   :  { %v818_v0 = vmax.f32 %v814_v34, %v816_v58  ;;  %v1017_v1 = vpop.f32.mrb[20].mxu1  ;;  %8435 = vmatprep.mubr.msk.f32.mxu0 %vm9547_vm4, %v9543_v7  ;;  %v821_v14 = vmax.f32 %v819_v63, 0.0  ;;  %v8150_v58 = vld [vmem:[%s12115_s0 + $0xa48] sm:$0xff]  ;;  %v9232_v63 = vpack.c.bf16 %v8145_v53, %v8141_v51 }
 0x109   :  { %v1019_v5 = vpop.f32.mrb[21].mxu1  ;;  %8071 = vmatmul.mubr.msk.f32.gmra.mrb[126].mxu1 %vm50_vm3, %v10584_v52 }
 0x10a   :  { %v820_v6 = vadd.f32 %v818_v0, %v10676_v41  ;;  %v1105_v8 = vmax.f32 %v1017_v1, %v1019_v5  ;;  %9191 = vmatpush1.bf16.msk.msra.mxu1 %vm9613_vm2, %v9189_v59  ;;  %5395 = vmatprep.mubr.f32.mxu1 %v9543_v7  ;;  %v8154_v59 = vld [vmem:[%s12115_s0 + $0xa68] sm:$0x1]  ;;  %v8149_v1 = vld [vmem:[%s12115_s0 + $0xa40] sm:$0xff] }
 0x10b   :  { %8436 = vmatmul.mubr.msk.f32.gmra.mrb[8].mxu0 %vm444_vm7, %v7574_v2  ;;  %9207 = vmatprep.subr.bf16.mxu1 %v9206_v60  ;;  %v9234_v0 = vpack.c.bf16 %v8154_v59, %v8150_v58  ;;  %v8153_v2 = vld [vmem:[%s12115_s0 + $0xa60] sm:$0x1]  ;;  %v7640_v58 = vld [vmem:[%s12118_s3 + $0x58] sm:$0xf] }
 0x10c   :  { %v822_v15 = vmax.f32 %v820_v6, 0.0  ;;  %v1023_v16 = vpop.f32.mrb[22].mxu1  ;;  %8442 = vmatprep.mubr.msk.f32.mxu0 %vm9547_vm4, %v9543_v7  ;;  %v7608_v6 = vld [vmem:[%s12118_s3 + $0x38] sm:$0xff] }
 0x10d   :  { %v1025_v20 = vpop.f32.mrb[23].mxu1  ;;  %8097 = vmatmul.mubr.msk.f32.vlgmr.msra.gmra.mrb[128].mxu1 %vm50_vm3, %v10528_v32 }
 0x10e   :  { %v8819_v21 = vpack.c.bf16 %v822_v15, %v821_v14  ;;  %v1106_v22 = vmax.f32 %v1023_v16, %v1025_v20  ;;  %9209 = vmatpush1.bf16.msra.mxu1 %v9208_v9  ;;  %5401 = vmatprep.mubr.f32.mxu1 %v9543_v7  ;;  %v8148_v9 = vld [vmem:[%s12115_s0 + $0xa38] sm:$0xff]  ;;  %v9237_v14 = vpack.c.bf16 %v8153_v2, %v8149_v1  ;;  %v8143_v16 = vld [vmem:[%s12115_s0 + $0xa10] sm:$0xff] }
 0x10f   :  { %8443 = vmatmul.mubr.msk.f32.vlgmr.msra.gmra.mrb[4].mxu0 %vm444_vm7, %v244_v17  ;;  %9212 = vmatprep.subr.msk.bf16.mxu1 %vm9613_vm2, %v9210_v11  ;;  %v8147_v17 = vld [vmem:[%s12115_s0 + $0xa30] sm:$0xff]  ;;  %v8152_v20 = vld [vmem:[%s12115_s0 + $0xa58] sm:$0xff] }
 0x110   :  { %8821 = vmatpush3.bf16.msk.msra.mxu0 %vm10750_vm6, %v8819_v21  ;;  %v1094_v28 = vpop.f32.mrb[24].mxu1  ;;  %8445 = vmatprep.mubr.msk.f32.mxu0 %vm9547_vm4, %v9543_v7  ;;  %v8156_v21 = vld [vmem:[%s12115_s0 + $0xa78] sm:$0x1] }
 0x111   :  { %v1096_v34 = vpop.f32.mrb[25].mxu1  ;;  %8098 = vmatmul.mubr.msk.f32.gmra.mrb[130].mxu1 %vm50_vm3, %v10584_v52  ;;  %8842 = vmatprep.subr.bf16.mxu0 %v9546_v35  ;;  %v9244_v26 = vpack.c.bf16 %v8156_v21, %v8152_v20  ;;  %v7670_v21 = vld [vmem:[%s12118_s3 + $0x68] sm:$0xff] }
 0x112   :  { %v1107_v36 = vmax.f32 %v1094_v28, %v1096_v34  ;;  %9215 = vmatpush1.bf16.msk.msra.mxu1 %vm9613_vm2, %v9213_v23  ;;  %5687 = vmatprep.mubr.f32.mxu1 %v9543_v7  ;;  %v8155_v28 = vld [vmem:[%s12115_s0 + $0xa70] sm:$0x1]  ;;  %v8173_v34 = vld [vmem:[%s12115_s0 + $0xa88] sm:$0xff] }
 0x113   :  { %9217 = vmatprep.subr.bf16.mxu1 %v9216_v24  ;;  %8446 = vmatmul.mubr.msk.f32.gmra.mrb[6].mxu0 %vm444_vm7, %v245_v29  ;;  %v9242_v24 = vpack.c.bf16 %v8147_v17, %v8143_v16  ;;  %v9247_v39 = vpack.c.bf16 %v8155_v28, %v8151_v27  ;;  %v8182_v17 = vld [vmem:[%s12115_s0 + $0xad0] sm:$0xff] }
 0x114   :  { %v1109_v42 = vmax.f32 %v1105_v8, %v1107_v36  ;;  %v1100_v43 = vpop.f32.mrb[26].mxu1  ;;  %8448 = vmatprep.mubr.msk.f32.mxu0 %vm9547_vm4, %v9543_v7  ;;  %v8144_v8 = vld [vmem:[%s12115_s0 + $0xa18] sm:$0xff]  ;;  %v8177_v36 = vld [vmem:[%s12115_s0 + $0xaa8] sm:$0xff] }
 0x115   :  { %v1102_v47 = vpop.f32.mrb[27].mxu1  ;;  %8128 = vmatmul.mubr.msk.f32.vlgmr.msra.gmra.mrb[132].mxu1 %vm50_vm3, %v10528_v32  ;;  %v9240_v15 = vpack.c.bf16 %v8148_v9, %v8144_v8  ;;  %v9254_v40 = vpack.c.bf16 %v8177_v36, %v8173_v34  ;;  %v7669_v9 = vld [vmem:[%s12118_s3 + $0x60] sm:$0xff]  ;;  %v7671_v36 = vld [vmem:[%s12118_s3 + $0x70] sm:$0xf] }
 0x116   :  { %v1108_v48 = vmax.f32 %v1100_v43, %v1102_v47  ;;  %9219 = vmatpush1.bf16.msra.mxu1 %v9218_v37  ;;  %5693 = vmatprep.mubr.f32.mxu1 %v9543_v7  ;;  %v1111_v54 = vadd.f32 %v1109_v42, %v10656_v25  ;;  %v8172_v42 = vld [vmem:[%s12115_s0 + $0xa80] sm:$0xff]  ;;  %v7639_v47 = vld [vmem:[%s12118_s3 + $0x50] sm:$0xff] }
 0x117   :  { %9222 = vmatprep.subr.msk.bf16.mxu1 %vm9613_vm2, %v9220_v38  ;;  %8449 = vmatmul.mubr.msk.f32.gmra.mrb[8].mxu0 %vm444_vm7, %v246_v44  ;;  %v8176_v43 = vld [vmem:[%s12115_s0 + $0xaa0] sm:$0xff] }
 0x118   :  { %v1110_v55 = vmax.f32 %v1106_v22, %v1108_v48  ;;  %v1309_v56 = vpop.f32.mrb[28].mxu1  ;;  %8455 = vmatprep.mubr.msk.f32.mxu0 %vm9547_vm4, %v9543_v7  ;;  %v1113_v3 = vmax.f32 %v1111_v54, 0.0  ;;  %v8181_v48 = vld [vmem:[%s12115_s0 + $0xac8] sm:$0xff]  ;;  %v9256_v54 = vpack.c.bf16 %v8176_v43, %v8172_v42 }
 0x119   :  { %v1311_v60 = vpop.f32.mrb[29].mxu1  ;;  %8129 = vmatmul.mubr.msk.f32.gmra.mrb[134].mxu1 %vm50_vm3, %v10584_v52 }
 0x11a   :  { %v1112_v61 = vadd.f32 %v1110_v55, %v10676_v41  ;;  %v1397_v62 = vmax.f32 %v1309_v56, %v1311_v60  ;;  %9225 = vmatpush1.bf16.msk.msra.mxu1 %vm9613_vm2, %v9223_v49  ;;  %5764 = vmatprep.mubr.f32.mxu1 %v9543_v7  ;;  %v8185_v49 = vld [vmem:[%s12115_s0 + $0xae8] sm:$0x1]  ;;  %v8180_v56 = vld [vmem:[%s12115_s0 + $0xac0] sm:$0xff] }
 0x11b   :  { %9231 = vmatprep.subr.bf16.mxu1 %v9230_v50  ;;  %8456 = vmatmul.mubr.msk.f32.vlgmr.msra.gmra.mrb[4].mxu0 %vm444_vm7, %v7607_v57  ;;  %v9258_v55 = vpack.c.bf16 %v8185_v49, %v8181_v48  ;;  %v8184_v57 = vld [vmem:[%s12115_s0 + $0xae0] sm:$0x1] }
 0x11c   :  { %v1114_v4 = vmax.f32 %v1112_v61, 0.0  ;;  %v1315_v5 = vpop.f32.mrb[30].mxu1  ;;  %8458 = vmatprep.mubr.msk.f32.mxu0 %vm9547_vm4, %v9543_v7  ;;  %v8211_v48 = vld [vmem:[%s12115_s0 + $0xb40] sm:$0xff] }
 0x11d   :  { %v1317_v11 = vpop.f32.mrb[31].mxu1  ;;  %8132 = vmatmul.mubr.msk.f32.vlgmr.msra.gmra.mrb[136].mxu1 %vm50_vm3, %v10528_v32  ;;  %v8215_v49 = vld [vmem:[%s12115_s0 + $0xb60] sm:$0x1] }
 0x11e   :  { %v8843_v12 = vpack.c.bf16 %v1114_v4, %v1113_v3  ;;  %v1398_v13 = vmax.f32 %v1315_v5, %v1317_v11  ;;  %9233 = vmatpush1.bf16.msra.mxu1 %v9232_v63  ;;  %5770 = vmatprep.mubr.f32.mxu1 %v9543_v7  ;;  %v8179_v63 = vld [vmem:[%s12115_s0 + $0xab8] sm:$0xff]  ;;  %v9261_v3 = vpack.c.bf16 %v8184_v57, %v8180_v56  ;;  %v8174_v5 = vld [vmem:[%s12115_s0 + $0xa90] sm:$0xff] }
 0x11f   :  { %9236 = vmatprep.subr.msk.bf16.mxu1 %vm9613_vm2, %v9234_v0  ;;  %8459 = vmatmul.mubr.msk.f32.gmra.mrb[6].mxu0 %vm444_vm7, %v7608_v6  ;;  %v8178_v6 = vld [vmem:[%s12115_s0 + $0xab0] sm:$0xff]  ;;  %v8183_v11 = vld [vmem:[%s12115_s0 + $0xad8] sm:$0xff] }
 0x120   :  { %8845 = vmatpush3.bf16.msk.msra.mxu0 %vm10750_vm6, %v8843_v12  ;;  %v1386_v18 = vpop.f32.mrb[32].mxu1  ;;  %8461 = vmatprep.mubr.msk.f32.mxu0 %vm9547_vm4, %v9543_v7  ;;  %v8187_v12 = vld [vmem:[%s12115_s0 + $0xaf8] sm:$0x1] }
 0x121   :  { %v1388_v22 = vpop.f32.mrb[33].mxu1  ;;  %8133 = vmatmul.mubr.msk.f32.gmra.mrb[138].mxu1 %vm50_vm3, %v10584_v52  ;;  %8866 = vmatprep.subr.bf16.mxu0 %v9546_v35  ;;  %v9268_v16 = vpack.c.bf16 %v8187_v12, %v8183_v11 }
 0x122   :  { %v1399_v23 = vmax.f32 %v1386_v18, %v1388_v22  ;;  %9239 = vmatpush1.bf16.msk.msra.mxu1 %vm9613_vm2, %v9237_v14  ;;  %5979 = vmatprep.mubr.f32.mxu1 %v9543_v7  ;;  %v8186_v18 = vld [vmem:[%s12115_s0 + $0xaf0] sm:$0x1]  ;;  %v8204_v22 = vld [vmem:[%s12115_s0 + $0xb08] sm:$0xff] }
 0x123   :  { %9241 = vmatprep.subr.bf16.mxu1 %v9240_v15  ;;  %8462 = vmatmul.mubr.msk.f32.gmra.mrb[8].mxu0 %vm444_vm7, %v7609_v19  ;;  %v9266_v15 = vpack.c.bf16 %v8178_v6, %v8174_v5  ;;  %v9271_v27 = vpack.c.bf16 %v8186_v18, %v8182_v17  ;;  %v8242_v18 = vld [vmem:[%s12115_s0 + $0xbc0] sm:$0xff] }
 0x124   :  { %v1401_v29 = vmax.f32 %v1397_v62, %v1399_v23  ;;  %v1392_v30 = vpop.f32.mrb[34].mxu1  ;;  %8468 = vmatprep.mubr.msk.f32.mxu0 %vm9547_vm4, %v9543_v7  ;;  %v8175_v62 = vld [vmem:[%s12115_s0 + $0xa98] sm:$0xff]  ;;  %v8208_v23 = vld [vmem:[%s12115_s0 + $0xb28] sm:$0xff] }
 0x125   :  { %v1394_v37 = vpop.f32.mrb[35].mxu1  ;;  %8159 = vmatmul.mubr.msk.f32.vlgmr.msra.gmra.mrb[140].mxu1 %vm50_vm3, %v10528_v32  ;;  %v9264_v4 = vpack.c.bf16 %v8179_v63, %v8175_v62  ;;  %v9278_v28 = vpack.c.bf16 %v8208_v23, %v8204_v22  ;;  %v7718_v63 = vld [vmem:[%s12115_s0 + $0x358] sm:$0xff] }
 0x126   :  { %v1400_v38 = vmax.f32 %v1392_v30, %v1394_v37  ;;  %9243 = vmatpush1.bf16.msra.mxu1 %v9242_v24  ;;  %5985 = vmatprep.mubr.f32.mxu1 %v9543_v7  ;;  %v1403_v44 = vadd.f32 %v1401_v29, %v10656_v25  ;;  %v8203_v29 = vld [vmem:[%s12115_s0 + $0xb00] sm:$0xff]  ;;  %v8237_v23 = vld [vmem:[%s12115_s0 + $0xb98] sm:$0xff] }
 0x127   :  { %9246 = vmatprep.subr.msk.bf16.mxu1 %vm9613_vm2, %v9244_v26  ;;  %8469 = vmatmul.mubr.msk.f32.vlgmr.msra.gmra.mrb[4].mxu0 %vm444_vm7, %v7638_v33  ;;  %v8207_v30 = vld [vmem:[%s12115_s0 + $0xb20] sm:$0xff] }
 0x128   :  { %v1402_v45 = vmax.f32 %v1398_v13, %v1400_v38  ;;  %v1601_v46 = vpop.f32.mrb[36].mxu1  ;;  %8471 = vmatprep.mubr.msk.f32.mxu0 %vm9547_vm4, %v9543_v7  ;;  %v1405_v59 = vmax.f32 %v1403_v44, 0.0  ;;  %v8212_v38 = vld [vmem:[%s12115_s0 + $0xb48] sm:$0xff]  ;;  %v9280_v43 = vpack.c.bf16 %v8207_v30, %v8203_v29  ;;  %v8236_v30 = vld [vmem:[%s12115_s0 + $0xb90] sm:$0xff] }
 0x129   :  { %v1603_v50 = vpop.f32.mrb[37].mxu1  ;;  %8160 = vmatmul.mubr.msk.f32.gmra.mrb[142].mxu1 %vm50_vm3, %v10584_v52 }
 0x12a   :  { %v1404_v51 = vadd.f32 %v1402_v45, %v10676_v41  ;;  %v1689_v53 = vmax.f32 %v1601_v46, %v1603_v50  ;;  %9249 = vmatpush1.bf16.msk.msra.mxu1 %vm9613_vm2, %v9247_v39  ;;  %6056 = vmatprep.mubr.f32.mxu1 %v9543_v7  ;;  %v8216_v39 = vld [vmem:[%s12115_s0 + $0xb68] sm:$0x1]  ;;  %v7710_v45 = vld [vmem:[%s12115_s0 + $0x318] sm:$0xff] }
 0x12b   :  { %9255 = vmatprep.subr.bf16.mxu1 %v9254_v40  ;;  %8472 = vmatmul.mubr.msk.f32.gmra.mrb[6].mxu0 %vm444_vm7, %v7639_v47  ;;  %v7714_v46 = vld [vmem:[%s12115_s0 + $0x338] sm:$0xff]  ;;  %v9282_v47 = vpack.c.bf16 %v8216_v39, %v8212_v38 }
 0x12c   :  { %v1406_v60 = vmax.f32 %v1404_v51, 0.0  ;;  %v1607_v61 = vpop.f32.mrb[38].mxu1  ;;  %8474 = vmatprep.mubr.msk.f32.mxu0 %vm9547_vm4, %v9543_v7  ;;  %v8904_v57 = vpack.c.bf16 %v7714_v46, %v7710_v45  ;;  %v8249_v38 = vld [vmem:[%s12115_s0 + $0xbf8] sm:$0x1]  ;;  %v8244_v46 = vld [vmem:[%s12115_s0 + $0xbd0] sm:$0xff] }
 0x12d   :  { %v1609_v0 = vpop.f32.mrb[39].mxu1  ;;  %8163 = vmatmul.mubr.msk.f32.vlgmr.msra.gmra.mrb[144].mxu1 %vm50_vm3, %v10528_v32 }
 0x12e   :  { %v8867_v1 = vpack.c.bf16 %v1406_v60, %v1405_v59  ;;  %v1690_v2 = vmax.f32 %v1607_v61, %v1609_v0  ;;  %9257 = vmatpush1.bf16.msra.mxu1 %v9256_v54  ;;  %6062 = vmatprep.mubr.f32.mxu1 %v9543_v7  ;;  %v8235_v54 = vld [vmem:[%s12115_s0 + $0xb88] sm:$0xff]  ;;  %v7713_v59 = vld [vmem:[%s12115_s0 + $0x330] sm:$0xff]  ;;  %v9285_v61 = vpack.c.bf16 %v8215_v49, %v8211_v48  ;;  %v7722_v0 = vld [vmem:[%s12115_s0 + $0x378] sm:$0x1] }
 0x12f   :  { %9260 = vmatprep.subr.msk.bf16.mxu1 %vm9613_vm2, %v9258_v55  ;;  %8475 = vmatmul.mubr.msk.f32.gmra.mrb[8].mxu0 %vm444_vm7, %v7640_v58  ;;  %v8239_v55 = vld [vmem:[%s12115_s0 + $0xba8] sm:$0xff]  ;;  %v7709_v58 = vld [vmem:[%s12115_s0 + $0x310] sm:$0xff]  ;;  %v8908_v12 = vpack.c.bf16 %v7722_v0, %v7718_v63 }
 0x130   :  { %8869 = vmatpush3.bf16.msk.msra.mxu0 %vm10750_vm6, %v8867_v1  ;;  %v1678_v8 = vpop.f32.mrb[40].mxu1  ;;  %8481 = vmatprep.mubr.msk.f32.mxu0 %vm9547_vm4, %v9543_v7  ;;  %v9302_v1 = vpack.c.bf16 %v8239_v55, %v8235_v54  ;;  %v8906_v6 = vpack.c.bf16 %v7713_v59, %v7709_v58  ;;  %v8266_v49 = vld [vmem:[%s12115_s0 + $0xc08] sm:$0xff]  ;;  %v11268_v54 = vld [vmem:[%s12116_s1] sm:$0xff] }
 0x131   :  { %v1680_v13 = vpop.f32.mrb[41].mxu1  ;;  %8164 = vmatmul.mubr.msk.f32.gmra.mrb[146].mxu1 %vm50_vm3, %v10584_v52  ;;  %8890 = vmatprep.subr.bf16.mxu0 %v9546_v35  ;;  %v8265_v59 = vld [vmem:[%s12115_s0 + $0xc00] sm:$0xff] }
 0x132   :  { %v1691_v14 = vmax.f32 %v1678_v8, %v1680_v13  ;;  %9263 = vmatpush1.bf16.msk.msra.mxu1 %vm9613_vm2, %v9261_v3  ;;  %6271 = vmatprep.mubr.f32.mxu1 %v9543_v7  ;;  %v8238_v3 = vld [vmem:[%s12115_s0 + $0xba0] sm:$0xff]  ;;  %v8243_v8 = vld [vmem:[%s12115_s0 + $0xbc8] sm:$0xff]  ;;  %v7717_v13 = vld [vmem:[%s12115_s0 + $0x350] sm:$0xff] }
 0x133   :  { %9265 = vmatprep.subr.bf16.mxu1 %v9264_v4  ;;  %8482 = vmatmul.mubr.msk.f32.vlgmr.msra.gmra.mrb[4].mxu0 %vm444_vm7, %v7669_v9  ;;  %v7700_v4 = vld [vmem:[%s12118_s3 + $0x78] sm:$0xff]  ;;  %v8247_v9 = vld [vmem:[%s12115_s0 + $0xbe8] sm:$0x1] }
 0x134   :  { %v1693_v19 = vmax.f32 %v1689_v53, %v1691_v14  ;;  %v1684_v20 = vpop.f32.mrb[42].mxu1  ;;  %8484 = vmatprep.mubr.msk.f32.mxu0 %vm9547_vm4, %v9543_v7  ;;  %v7721_v14 = vld [vmem:[%s12115_s0 + $0x370] sm:$0x1]  ;;  %v9306_v17 = vpack.c.bf16 %v8247_v9, %v8243_v8 }
 0x135   :  { %v1686_v24 = vpop.f32.mrb[43].mxu1  ;;  %8190 = vmatmul.mubr.msk.f32.vlgmr.msra.gmra.mrb[148].mxu1 %vm50_vm3, %v10528_v32  ;;  %v8911_v22 = vpack.c.bf16 %v7721_v14, %v7717_v13 }
 0x136   :  { %v1692_v26 = vmax.f32 %v1684_v20, %v1686_v24  ;;  %9267 = vmatpush1.bf16.msra.mxu1 %v9266_v15  ;;  %6277 = vmatprep.mubr.f32.mxu1 %v9543_v7  ;;  %v1695_v33 = vadd.f32 %v1693_v19, %v10656_v25  ;;  %v8246_v19 = vld [vmem:[%s12115_s0 + $0xbe0] sm:$0x1]  ;;  %v8241_v24 = vld [vmem:[%s12115_s0 + $0xbb8] sm:$0xff] }
 0x137   :  { %9270 = vmatprep.subr.msk.bf16.mxu1 %vm9613_vm2, %v9268_v16  ;;  %8485 = vmatmul.mubr.msk.f32.gmra.mrb[6].mxu0 %vm444_vm7, %v7670_v21  ;;  %v7701_v21 = vld [vmem:[%s12118_s3 + $0x80] sm:$0xff]  ;;  %v9312_v29 = vpack.c.bf16 %v8241_v24, %v8237_v23  ;;  %v8267_v23 = vld [vmem:[%s12115_s0 + $0xc10] sm:$0xff] }
 0x138   :  { %v1694_v34 = vmax.f32 %v1690_v2, %v1692_v26  ;;  %8487 = vmatprep.mubr.msk.f32.mxu0 %vm9547_vm4, %v9543_v7  ;;  %v11110_v37 = vpop.f32.mrb[44].mxu1  ;;  %v1697_v50 = vmax.f32 %v1695_v33, 0.0  ;;  %v8234_v2 = vld [vmem:[%s12115_s0 + $0xb80] sm:$0xff]  ;;  %v8271_v24 = vld [vmem:[%s12115_s0 + $0xc30] sm:$0xff] }
 0x139   :  { %8191 = vmatmul.mubr.msk.f32.gmra.mrb[150].mxu1 %vm50_vm3, %v10584_v52  ;;  %v11120_v40 = vpop.f32.mrb[45].mxu1  ;;  %v9304_v16 = vpack.c.bf16 %v8238_v3, %v8234_v2  ;;  %v8278_v2 = vld [vmem:[%s12115_s0 + $0xc68] sm:$0x1] }
 0x13a   :  { %v1696_v42 = vadd.f32 %v1694_v34, %v10676_v41  ;;  %9273 = vmatpush1.bf16.msk.msra.mxu1 %vm9613_vm2, %v9271_v27  ;;  %6348 = vmatprep.mubr.f32.mxu1 %v9543_v7  ;;  %v1981_v44 = vmax.f32 %v11110_v37, %v11120_v40  ;;  %v7702_v34 = vld [vmem:[%s12118_s3 + $0x88] sm:$0xf] }
 0x13b   :  { %9279 = vmatprep.subr.bf16.mxu1 %v9278_v28  ;;  %8488 = vmatmul.mubr.msk.f32.gmra.mrb[8].mxu0 %vm444_vm7, %v7671_v36  ;;  %v9309_v28 = vpack.c.bf16 %v8246_v19, %v8242_v18  ;;  %v8245_v36 = vld [vmem:[%s12115_s0 + $0xbd8] sm:$0xff]  ;;  %v11294_v3 = vld [vmem:[%s12116_s1 + $0x8] sm:$0x3] }
 0x13c   :  { %v1698_v51 = vmax.f32 %v1696_v42, 0.0  ;;  %8494 = vmatprep.mubr.msk.f32.mxu0 %vm9547_vm4, %v9543_v7  ;;  %v11143_v53 = vpop.f32.mrb[46].mxu1  ;;  %v9316_v45 = vpack.c.bf16 %v8249_v38, %v8245_v36  ;;  %v8279_v36 = vld [vmem:[%s12115_s0 + $0xc70] sm:$0x1] }
 0x13d   :  { %8194 = vmatmul.mubr.msk.f32.vlgmr.msra.gmra.mrb[152].mxu1 %vm50_vm3, %v10528_v32  ;;  %v11153_v56 = vpop.f32.mrb[47].mxu1 }
 0x13e   :  { %v8891_v60 = vpack.c.bf16 %v1698_v51, %v1697_v50  ;;  %9281 = vmatpush1.bf16.msra.mxu1 %v9280_v43  ;;  %6354 = vmatprep.mubr.f32.mxu1 %v9543_v7  ;;  %v1982_v62 = vmax.f32 %v11143_v53, %v11153_v56  ;;  %v8270_v50 = vld [vmem:[%s12115_s0 + $0xc28] sm:$0xff]  ;;  %v7731_v53 = vld [vmem:[%s12118_s3 + $0x90] sm:$0xff] }
 0x13f   :  { %9284 = vmatprep.subr.msk.bf16.mxu1 %vm9613_vm2, %v9282_v47  ;;  %v9326_v58 = vpack.c.bf16 %v8270_v50, %v8266_v49 }
 0x140   :  { %8893 = vmatpush3.bf16.msk.msra.mxu0 %vm10750_vm6, %v8891_v60  ;;  %v2185_v5 = vpop.f32.mrb[48].mxu1  ;;  %v8269_v60 = vld [vmem:[%s12115_s0 + $0xc20] sm:$0xff] }
 0x141   :  { %8195 = vmatmul.mubr.msk.f32.gmra.mrb[154].mxu1 %vm50_vm3, %v10584_v52  ;;  %v2187_v11 = vpop.f32.mrb[49].mxu1  ;;  %8905 = vmatprep.subr.bf16.mxu0 %v8904_v57  ;;  %v9328_v8 = vpack.c.bf16 %v8269_v60, %v8265_v59 }
 0x142   :  { %9287 = vmatpush1.bf16.msk.msra.mxu1 %vm9613_vm2, %v9285_v61  ;;  %6563 = vmatprep.mubr.f32.mxu1 %v9543_v7  ;;  %v2273_v15 = vmax.f32 %v2185_v5, %v2187_v11  ;;  %v8273_v11 = vld [vmem:[%s12115_s0 + $0xc40] sm:$0xff] }
 0x143   :  { %8495 = vmatmul.mubr.msk.f32.vlgmr.msra.gmra.mrb[4].mxu0 %vm444_vm7, %v7700_v4  ;;  %9303 = vmatprep.subr.bf16.mxu1 %v9302_v1  ;;  %v8274_v1 = vld [vmem:[%s12115_s0 + $0xc48] sm:$0xff] }
 0x144   :  { %8497 = vmatprep.mubr.msk.f32.mxu0 %vm9547_vm4, %v9543_v7  ;;  %v2191_v20 = vpop.f32.mrb[50].mxu1  ;;  %8907 = vmatpush1.bf16.msra.mxu0 %v8906_v6  ;;  %v9330_v9 = vpack.c.bf16 %v8278_v2, %v8274_v1 }
 0x145   :  { %8221 = vmatmul.mubr.msk.f32.vlgmr.msra.gmra.mrb[156].mxu1 %vm50_vm3, %v10528_v32  ;;  %v2193_v26 = vpop.f32.mrb[51].mxu1  ;;  %8910 = vmatprep.subr.msk.bf16.mxu0 %vm9613_vm2, %v8908_v12  ;;  %v8240_v32 = vld [vmem:[%s12115_s0 + $0xbb0] sm:$0xff]  ;;  %v8277_v12 = vld [vmem:[%s12115_s0 + $0xc60] sm:$0x1] }
 0x146   :  { %9305 = vmatpush1.bf16.msra.mxu1 %v9304_v16  ;;  %v2274_v27 = vmax.f32 %v2191_v20, %v2193_v26  ;;  %6569 = vmatprep.mubr.f32.mxu1 %v9543_v7  ;;  %v9314_v43 = vpack.c.bf16 %v8240_v32, %v8236_v30  ;;  %v8268_v16 = vld [vmem:[%s12115_s0 + $0xc18] sm:$0xff]  ;;  %v9338_v32 = vpack.c.bf16 %v8271_v24, %v8267_v23 }
 0x147   :  { %8498 = vmatmul.mubr.msk.f32.gmra.mrb[6].mxu0 %vm444_vm7, %v7701_v21  ;;  %9308 = vmatprep.subr.msk.bf16.mxu1 %vm9613_vm2, %v9306_v17  ;;  %v8272_v17 = vld [vmem:[%s12115_s0 + $0xc38] sm:$0xff]  ;;  %v9333_v21 = vpack.c.bf16 %v8277_v12, %v8273_v11 }
 0x148   :  { %v2262_v33 = vpop.f32.mrb[52].mxu1  ;;  %8500 = vmatprep.mubr.msk.f32.mxu0 %vm9547_vm4, %v9543_v7  ;;  %8913 = vmatpush1.bf16.msk.msra.mxu0 %vm9613_vm2, %v8911_v22  ;;  %v9336_v22 = vpack.c.bf16 %v8272_v17, %v8268_v16 }
 0x149   :  { %v2264_v39 = vpop.f32.mrb[53].mxu1  ;;  %8222 = vmatmul.mubr.msk.f32.gmra.mrb[158].mxu1 %vm50_vm3, %v10584_v52  ;;  %8914 = vmatprep.subr.bf16.mxu0 %v9546_v35  ;;  %v8248_v52 = vld [vmem:[%s12115_s0 + $0xbf0] sm:$0x1] }
 0x14a   :  { %v2275_v42 = vmax.f32 %v2262_v33, %v2264_v39  ;;  %9311 = vmatpush1.bf16.msk.msra.mxu1 %vm9613_vm2, %v9309_v28  ;;  %6855 = vmatprep.mubr.f32.mxu1 %v9543_v7  ;;  %v9319_v57 = vpack.c.bf16 %v8248_v52, %v8244_v46  ;;  %v8280_v28 = vld [vmem:[%s12115_s0 + $0xc78] sm:$0x1] }
 0x14b   :  { %8501 = vmatmul.mubr.msk.f32.gmra.mrb[8].mxu0 %vm444_vm7, %v7702_v34  ;;  %9313 = vmatprep.subr.bf16.mxu1 %v9312_v29  ;;  %v8275_v34 = vld [vmem:[%s12115_s0 + $0xc50] sm:$0xff] }
 0x14c   :  { %v2277_v47 = vmax.f32 %v2273_v15, %v2275_v42  ;;  %v2268_v48 = vpop.f32.mrb[54].mxu1  ;;  %1968 = vmatprep.mubr.f32.mxu0 %v9543_v7 }
 0x14d   :  { %v2270_v51 = vpop.f32.mrb[55].mxu1  ;;  %8252 = vmatmul.mubr.msk.f32.vlgmr.msra.gmra.mrb[160].mxu1 %vm50_vm3, %v11268_v54 }
 0x14e   :  { %v2276_v55 = vmax.f32 %v2268_v48, %v2270_v51  ;;  %9315 = vmatpush1.bf16.msra.mxu1 %v9314_v43  ;;  %6861 = vmatprep.mubr.f32.mxu1 %v9543_v7  ;;  %v2279_v61 = vadd.f32 %v2277_v47, %v10656_v25 }
 0x14f   :  { %7729 = vmatmul.mubr.msk.f32.vlgmr.msra.gmra.mrb[10].mxu0 %vm50_vm3, %v11268_v54  ;;  %9318 = vmatprep.subr.msk.bf16.mxu1 %vm9613_vm2, %v9316_v45  ;;  %v9343_v45 = vpack.c.bf16 %v8279_v36, %v8275_v34 }
 0x150   :  { %v2278_v63 = vmax.f32 %v2274_v27, %v2276_v55  ;;  %1974 = vmatprep.mubr.f32.mxu0 %v9543_v7  ;;  %v2477_v0 = vpop.f32.mrb[56].mxu1  ;;  %v2281_v13 = vmax.f32 %v2279_v61, 0.0  ;;  %v8276_v27 = vld [vmem:[%s12115_s0 + $0xc58] sm:$0xff] }
 0x151   :  { %8253 = vmatmul.mubr.msk.f32.gmra.mrb[162].mxu1 %vm50_vm3, %v11294_v3  ;;  %v2479_v4 = vpop.f32.mrb[57].mxu1  ;;  %v9340_v33 = vpack.c.bf16 %v8280_v28, %v8276_v27 }
 0x152   :  { %v2280_v5 = vadd.f32 %v2278_v63, %v10676_v41  ;;  %9321 = vmatpush1.bf16.msk.msra.mxu1 %vm9613_vm2, %v9319_v57  ;;  %6932 = vmatprep.mubr.f32.mxu1 %v9543_v7  ;;  %v2565_v6 = vmax.f32 %v2477_v0, %v2479_v4 }
 0x153   :  { %7730 = vmatmul.mubr.msk.f32.gmra.mrb[12].mxu0 %vm50_vm3, %v11294_v3  ;;  %9327 = vmatprep.subr.bf16.mxu1 %v9326_v58 }
 0x154   :  { %v2282_v14 = vmax.f32 %v2280_v5, 0.0  ;;  %v2483_v15 = vpop.f32.mrb[58].mxu1  ;;  %8507 = vmatprep.mubr.msk.f32.mxu0 %vm9547_vm4, %v9543_v7 }
 0x155   :  { %8256 = vmatmul.mubr.msk.f32.vlgmr.msra.gmra.mrb[164].mxu1 %vm50_vm3, %v11268_v54  ;;  %v2485_v18 = vpop.f32.mrb[59].mxu1 }
 0x156   :  { %v11320_v19 = vpack.c.bf16 %v2282_v14, %v2281_v13  ;;  %9329 = vmatpush1.bf16.msra.mxu1 %v9328_v8  ;;  %v2566_v20 = vmax.f32 %v2483_v15, %v2485_v18  ;;  %6938 = vmatprep.mubr.f32.mxu1 %v9543_v7 }
 0x157   :  { %9332 = vmatprep.subr.msk.bf16.mxu1 %vm9613_vm2, %v9330_v9 }
 0x158   :  { %v2554_v26 = vpop.f32.mrb[60].mxu1 }
 0x159   :  { %v2556_v29 = vpop.f32.mrb[61].mxu1  ;;  %8257 = vmatmul.mubr.msk.f32.gmra.mrb[166].mxu1 %vm50_vm3, %v11294_v3 }
 0x15a   :  { %v2567_v30 = vmax.f32 %v2554_v26, %v2556_v29  ;;  %9335 = vmatpush1.bf16.msk.msra.mxu1 %vm9613_vm2, %v9333_v21  ;;  %7147 = vmatprep.mubr.f32.mxu1 %v9543_v7 }
 0x15b   :  { %9337 = vmatprep.subr.bf16.mxu1 %v9336_v22 }
 0x15c   :  { %v2569_v38 = vmax.f32 %v2565_v6, %v2567_v30  ;;  %v2560_v39 = vpop.f32.mrb[62].mxu1 }
 0x15d   :  { %v2562_v42 = vpop.f32.mrb[63].mxu1  ;;  %8283 = vmatmul.mubr.msk.f32.vlgmr.msra.gmra.mrb[168].mxu1 %vm50_vm3, %v11268_v54 }
 0x15e   :  { %v2568_v43 = vmax.f32 %v2560_v39, %v2562_v42  ;;  %9339 = vmatpush1.bf16.msra.mxu1 %v9338_v32  ;;  %7153 = vmatprep.mubr.f32.mxu1 %v9543_v7  ;;  %v2571_v46 = vadd.f32 %v2569_v38, %v10656_v25 }
 0x15f   :  { %9342 = vmatprep.subr.msk.bf16.mxu1 %vm9613_vm2, %v9340_v33 }
 0x160   :  { %v2570_v52 = vmax.f32 %v2566_v20, %v2568_v43  ;;  %v2769_v47 = vpop.f32.mrb[64].mxu1  ;;  %v2573_v51 = vmax.f32 %v2571_v46, 0.0 }
 0x161   :  { %8284 = vmatmul.mubr.msk.f32.gmra.mrb[170].mxu1 %vm50_vm3, %v11294_v3  ;;  %v2771_v48 = vpop.f32.mrb[65].mxu1 }
 0x162   :  { %v2572_v49 = vadd.f32 %v2570_v52, %v10676_v41  ;;  %9345 = vmatpush1.bf16.msk.msra.mxu1 %vm9613_vm2, %v9343_v45  ;;  %7224 = vmatprep.mubr.f32.mxu1 %v9543_v7  ;;  %v2857_v50 = vmax.f32 %v2769_v47, %v2771_v48 }
 0x164   :  { %v2574_v55 = vmax.f32 %v2572_v49, 0.0  ;;  %v2775_v57 = vpop.f32.mrb[66].mxu1 }
 0x165   :  { %8287 = vmatmul.mubr.msk.f32.vlgmr.msra.gmra.mrb[172].mxu1 %vm50_vm3, %v11268_v54  ;;  %v2777_v58 = vpop.f32.mrb[67].mxu1 }
 0x166   :  { %v11362_v59 = vpack.c.bf16 %v2574_v55, %v2573_v51  ;;  %v2858_v60 = vmax.f32 %v2775_v57, %v2777_v58  ;;  %7230 = vmatprep.mubr.f32.mxu1 %v9543_v7 }
 0x168   :  { %v2846_v61 = vpop.f32.mrb[68].mxu1 }
 0x169   :  { %v2848_v63 = vpop.f32.mrb[69].mxu1  ;;  %8288 = vmatmul.mubr.msk.f32.gmra.mrb[174].mxu1 %vm50_vm3, %v11294_v3 }
 0x16a   :  { %v2859_v0 = vmax.f32 %v2846_v61, %v2848_v63 }
 0x16c   :  { %v2861_v1 = vmax.f32 %v2857_v50, %v2859_v0  ;;  %v2852_v2 = vpop.f32.mrb[70].mxu1 }
 0x16d   :  { %v2854_v4 = vpop.f32.mrb[71].mxu1 }
 0x16e   :  { %v2860_v5 = vmax.f32 %v2852_v2, %v2854_v4  ;;  %v2863_v6 = vadd.f32 %v2861_v1, %v10656_v25 }
 0x170   :  { %v2862_v8 = vmax.f32 %v2858_v60, %v2860_v5  ;;  %v11368_v9 = vpop.f32.mrb[72].mxu1  ;;  %v2865_v14 = vmax.f32 %v2863_v6, 0.0 }
 0x171   :  { %v11370_v11 = vpop.f32.mrb[73].mxu1 }
 0x172   :  { %v2864_v12 = vadd.f32 %v2862_v8, %v10676_v41  ;;  %v3149_v13 = vmax.f32 %v11368_v9, %v11370_v11  ;;  %v7855_v9 = vld [vmem:[%s12118_s3 + $0xf0] sm:$0xff]  ;;  %v7856_v11 = vld [vmem:[%s12118_s3 + $0xf8] sm:$0xff] }
 0x174   :  { %v2866_v15 = vmax.f32 %v2864_v12, 0.0  ;;  %v11375_v16 = vpop.f32.mrb[74].mxu1 }
 0x175   :  { %v11377_v17 = vpop.f32.mrb[75].mxu1 }
 0x176   :  { %v11379_v18 = vpack.c.bf16 %v2866_v15, %v2865_v14  ;;  %v3150_v20 = vmax.f32 %v11375_v16, %v11377_v17  ;;  %v7886_v16 = vld [vmem:[%s12118_s3 + $0x108] sm:$0xff]  ;;  %v7887_v17 = vld [vmem:[%s12118_s3 + $0x110] sm:$0xff] }
 0x178   :  { %v3353_v21 = vpop.f32.mrb[76].mxu1 }
 0x179   :  { %v3355_v22 = vpop.f32.mrb[77].mxu1 }
 0x17a   :  { %v3441_v23 = vmax.f32 %v3353_v21, %v3355_v22 }
 0x17c   :  { %v3359_v24 = vpop.f32.mrb[78].mxu1 }
 0x17d   :  { %v3361_v26 = vpop.f32.mrb[79].mxu1 }
 0x17e   :  { %v3442_v27 = vmax.f32 %v3359_v24, %v3361_v26 }
 0x180   :  { %v3430_v28 = vpop.f32.mrb[80].mxu1 }
 0x181   :  { %v3432_v29 = vpop.f32.mrb[81].mxu1 }
 0x182   :  { %v3443_v30 = vmax.f32 %v3430_v28, %v3432_v29 }
 0x184   :  { %v3445_v32 = vmax.f32 %v3441_v23, %v3443_v30  ;;  %v3436_v33 = vpop.f32.mrb[82].mxu1 }
 0x185   :  { %v3438_v34 = vpop.f32.mrb[83].mxu1 }
 0x186   :  { %v3444_v36 = vmax.f32 %v3436_v33, %v3438_v34  ;;  %v3447_v38 = vadd.f32 %v3445_v32, %v10656_v25 }
 0x188   :  { %v3446_v39 = vmax.f32 %v3442_v27, %v3444_v36  ;;  %v3645_v42 = vpop.f32.mrb[84].mxu1  ;;  %v3449_v52 = vmax.f32 %v3447_v38, 0.0 }
 0x189   :  { %v3647_v43 = vpop.f32.mrb[85].mxu1 }
 0x18a   :  { %v3448_v45 = vadd.f32 %v3446_v39, %v10676_v41  ;;  %v3733_v46 = vmax.f32 %v3645_v42, %v3647_v43 }
 0x18c   :  { %v3450_v47 = vmax.f32 %v3448_v45, 0.0  ;;  %v3651_v48 = vpop.f32.mrb[86].mxu1 }
 0x18d   :  { %v3653_v49 = vpop.f32.mrb[87].mxu1 }
 0x18e   :  { %v11385_v50 = vpack.c.bf16 %v3450_v47, %v3449_v52  ;;  %v3734_v51 = vmax.f32 %v3651_v48, %v3653_v49 }
 0x190   :  { %v3722_v55 = vpop.f32.mrb[88].mxu1 }
 0x191   :  { %v3724_v57 = vpop.f32.mrb[89].mxu1 }
 0x192   :  { %v3735_v58 = vmax.f32 %v3722_v55, %v3724_v57 }
 0x194   :  { %v3737_v60 = vmax.f32 %v3733_v46, %v3735_v58  ;;  %v3728_v61 = vpop.f32.mrb[90].mxu1 }
 0x195   :  { %v3730_v63 = vpop.f32.mrb[91].mxu1 }
 0x196   :  { %v3736_v0 = vmax.f32 %v3728_v61, %v3730_v63  ;;  %v3739_v1 = vadd.f32 %v3737_v60, %v10656_v25 }
 0x198   :  { %v3738_v2 = vmax.f32 %v3734_v51, %v3736_v0  ;;  %v3937_v4 = vpop.f32.mrb[92].mxu1  ;;  %v3741_v12 = vmax.f32 %v3739_v1, 0.0 }
 0x199   :  { %v3939_v5 = vpop.f32.mrb[93].mxu1 }
 0x19a   :  { %v3740_v6 = vadd.f32 %v3738_v2, %v10676_v41  ;;  %v4025_v8 = vmax.f32 %v3937_v4, %v3939_v5 }
 0x19c   :  { %v3742_v14 = vmax.f32 %v3740_v6, 0.0  ;;  %v3943_v15 = vpop.f32.mrb[94].mxu1 }
 0x19d   :  { %v3945_v21 = vpop.f32.mrb[95].mxu1 }
 0x19e   :  { %v11389_v22 = vpack.c.bf16 %v3742_v14, %v3741_v12  ;;  %v4026_v23 = vmax.f32 %v3943_v15, %v3945_v21 }
 0x1a0   :  { %v4014_v24 = vpop.f32.mrb[96].mxu1 }
 0x1a1   :  { %v4016_v26 = vpop.f32.mrb[97].mxu1 }
 0x1a2   :  { %v4027_v27 = vmax.f32 %v4014_v24, %v4016_v26 }
 0x1a4   :  { %v4029_v28 = vmax.f32 %v4025_v8, %v4027_v27  ;;  %v4020_v29 = vpop.f32.mrb[98].mxu1 }
 0x1a5   :  { %v4022_v30 = vpop.f32.mrb[99].mxu1 }
 0x1a6   :  { %v4028_v32 = vmax.f32 %v4020_v29, %v4022_v30  ;;  %v4031_v33 = vadd.f32 %v4029_v28, %v10656_v25 }
 0x1a8   :  { %v4030_v34 = vmax.f32 %v4026_v23, %v4028_v32  ;;  %v11392_v36 = vpop.f32.mrb[100].mxu1  ;;  %v4033_v43 = vmax.f32 %v4031_v33, 0.0 }
 0x1a9   :  { %v11394_v38 = vpop.f32.mrb[101].mxu1 }
 0x1aa   :  { %v4032_v39 = vadd.f32 %v4030_v34, %v10676_v41  ;;  %v4317_v42 = vmax.f32 %v11392_v36, %v11394_v38  ;;  %v7979_v36 = vld [vmem:[%s12118_s3 + $0x150] sm:$0xff]  ;;  %v7980_v38 = vld [vmem:[%s12118_s3 + $0x158] sm:$0xff] }
 0x1ac   :  { %v4034_v45 = vmax.f32 %v4032_v39, 0.0  ;;  %v11399_v46 = vpop.f32.mrb[102].mxu1 }
 0x1ad   :  { %v11401_v52 = vpop.f32.mrb[103].mxu1 }
 0x1ae   :  { %v11403_v47 = vpack.c.bf16 %v4034_v45, %v4033_v43  ;;  %v4318_v48 = vmax.f32 %v11399_v46, %v11401_v52  ;;  %v8010_v46 = vld [vmem:[%s12118_s3 + $0x168] sm:$0xff]  ;;  %v8011_v52 = vld [vmem:[%s12118_s3 + $0x170] sm:$0xff] }
 0x1b0   :  { %v4521_v49 = vpop.f32.mrb[104].mxu1 }
 0x1b1   :  { %v4523_v51 = vpop.f32.mrb[105].mxu1 }
 0x1b2   :  { %v4609_v55 = vmax.f32 %v4521_v49, %v4523_v51 }
 0x1b4   :  { %v4527_v57 = vpop.f32.mrb[106].mxu1 }
 0x1b5   :  { %v4529_v58 = vpop.f32.mrb[107].mxu1 }
 0x1b6   :  { %v4610_v60 = vmax.f32 %v4527_v57, %v4529_v58 }
 0x1b8   :  { %v4598_v61 = vpop.f32.mrb[108].mxu1 }
 0x1b9   :  { %v4600_v63 = vpop.f32.mrb[109].mxu1 }
 0x1ba   :  { %v4611_v0 = vmax.f32 %v4598_v61, %v4600_v63 }
 0x1bc   :  { %v4613_v1 = vmax.f32 %v4609_v55, %v4611_v0  ;;  %v4604_v2 = vpop.f32.mrb[110].mxu1 }
 0x1bd   :  { %v4606_v4 = vpop.f32.mrb[111].mxu1 }
 0x1be   :  { %v4612_v5 = vmax.f32 %v4604_v2, %v4606_v4  ;;  %v4615_v6 = vadd.f32 %v4613_v1, %v10656_v25 }
 0x1c0   :  { %v4614_v8 = vmax.f32 %v4610_v60, %v4612_v5  ;;  %v4813_v12 = vpop.f32.mrb[112].mxu1  ;;  %v4617_v23 = vmax.f32 %v4615_v6, 0.0 }
 0x1c1   :  { %v4815_v14 = vpop.f32.mrb[113].mxu1 }
 0x1c2   :  { %v4616_v15 = vadd.f32 %v4614_v8, %v10676_v41  ;;  %v4901_v21 = vmax.f32 %v4813_v12, %v4815_v14 }
 0x1c4   :  { %v4618_v24 = vmax.f32 %v4616_v15, 0.0  ;;  %v4819_v26 = vpop.f32.mrb[114].mxu1 }
 0x1c5   :  { %v4821_v27 = vpop.f32.mrb[115].mxu1 }
 0x1c6   :  { %v11409_v28 = vpack.c.bf16 %v4618_v24, %v4617_v23  ;;  %v4902_v29 = vmax.f32 %v4819_v26, %v4821_v27 }
 0x1c8   :  { %v4890_v30 = vpop.f32.mrb[116].mxu1 }
 0x1c9   :  { %v4892_v32 = vpop.f32.mrb[117].mxu1 }
 0x1ca   :  { %v4903_v33 = vmax.f32 %v4890_v30, %v4892_v32 }
 0x1cc   :  { %v4905_v34 = vmax.f32 %v4901_v21, %v4903_v33  ;;  %v4896_v39 = vpop.f32.mrb[118].mxu1 }
 0x1cd   :  { %v4898_v43 = vpop.f32.mrb[119].mxu1 }
 0x1ce   :  { %v4904_v45 = vmax.f32 %v4896_v39, %v4898_v43  ;;  %v4907_v49 = vadd.f32 %v4905_v34, %v10656_v25 }
 0x1d0   :  { %v4906_v51 = vmax.f32 %v4902_v29, %v4904_v45  ;;  %v5105_v55 = vpop.f32.mrb[120].mxu1  ;;  %v4909_v61 = vmax.f32 %v4907_v49, 0.0 }
 0x1d1   :  { %v5107_v57 = vpop.f32.mrb[121].mxu1 }
 0x1d2   :  { %v4908_v58 = vadd.f32 %v4906_v51, %v10676_v41  ;;  %v5193_v60 = vmax.f32 %v5105_v55, %v5107_v57 }
 0x1d4   :  { %v4910_v63 = vmax.f32 %v4908_v58, 0.0  ;;  %v5111_v0 = vpop.f32.mrb[122].mxu1 }
 0x1d5   :  { %v5113_v1 = vpop.f32.mrb[123].mxu1 }
 0x1d6   :  { %v11413_v2 = vpack.c.bf16 %v4910_v63, %v4909_v61  ;;  %v5194_v4 = vmax.f32 %v5111_v0, %v5113_v1 }
 0x1d8   :  { %v5182_v5 = vpop.f32.mrb[124].mxu1 }
 0x1d9   :  { %v5184_v6 = vpop.f32.mrb[125].mxu1 }
 0x1da   :  { %v5195_v8 = vmax.f32 %v5182_v5, %v5184_v6 }
 0x1dc   :  { %v5197_v12 = vmax.f32 %v5193_v60, %v5195_v8  ;;  %v5188_v14 = vpop.f32.mrb[126].mxu1 }
 0x1dd   :  { %v5190_v15 = vpop.f32.mrb[127].mxu1 }
 0x1de   :  { %v5196_v21 = vmax.f32 %v5188_v14, %v5190_v15  ;;  %v5199_v23 = vadd.f32 %v5197_v12, %v10656_v25 }
 0x1e0   :  { %v5198_v24 = vmax.f32 %v5194_v4, %v5196_v21  ;;  %v11416_v26 = vpop.f32.mrb[128].mxu1  ;;  %v5201_v32 = vmax.f32 %v5199_v23, 0.0 }
 0x1e1   :  { %v11418_v27 = vpop.f32.mrb[129].mxu1 }
 0x1e2   :  { %v5200_v29 = vadd.f32 %v5198_v24, %v10676_v41 }
 0x1e4   :  { %v5202_v33 = vmax.f32 %v5200_v29, 0.0  ;;  %v11423_v34 = vpop.f32.mrb[130].mxu1 }
 0x1e5   :  { %v11425_v39 = vpop.f32.mrb[131].mxu1 }
 0x1e6   :  { %v11427_v43 = vpack.c.bf16 %v5202_v33, %v5201_v32 }
 0x1e8   :  { %v5689_v49 = vpop.f32.mrb[132].mxu1 }
 0x1e9   :  { %v5691_v51 = vpop.f32.mrb[133].mxu1 }
 0x1ea   :  { %v5777_v55 = vmax.f32 %v5689_v49, %v5691_v51 }
 0x1ec   :  { %v5695_v57 = vpop.f32.mrb[134].mxu1 }
 0x1ed   :  { %v5697_v58 = vpop.f32.mrb[135].mxu1 }
 0x1ee   :  { %v5778_v60 = vmax.f32 %v5695_v57, %v5697_v58 }
 0x1f0   :  { %v5766_v61 = vpop.f32.mrb[136].mxu1 }
 0x1f1   :  { %v5768_v63 = vpop.f32.mrb[137].mxu1 }
 0x1f2   :  { %v5779_v0 = vmax.f32 %v5766_v61, %v5768_v63 }
 0x1f4   :  { %v5781_v1 = vmax.f32 %v5777_v55, %v5779_v0  ;;  %v5772_v4 = vpop.f32.mrb[138].mxu1 }
 0x1f5   :  { %v5774_v5 = vpop.f32.mrb[139].mxu1 }
 0x1f6   :  { %v5780_v6 = vmax.f32 %v5772_v4, %v5774_v5  ;;  %v5783_v8 = vadd.f32 %v5781_v1, %v10656_v25 }
 0x1f8   :  { %v5782_v12 = vmax.f32 %v5778_v60, %v5780_v6  ;;  %v5981_v14 = vpop.f32.mrb[140].mxu1  ;;  %v5785_v24 = vmax.f32 %v5783_v8, 0.0 }
 0x1f9   :  { %v5983_v15 = vpop.f32.mrb[141].mxu1 }
 0x1fa   :  { %v5784_v21 = vadd.f32 %v5782_v12, %v10676_v41  ;;  %v6069_v23 = vmax.f32 %v5981_v14, %v5983_v15 }
 0x1fc   :  { %v5786_v29 = vmax.f32 %v5784_v21, 0.0  ;;  %v5987_v32 = vpop.f32.mrb[142].mxu1 }
 0x1fd   :  { %v5989_v33 = vpop.f32.mrb[143].mxu1 }
 0x1fe   :  { %v11433_v49 = vpack.c.bf16 %v5786_v29, %v5785_v24  ;;  %v6070_v51 = vmax.f32 %v5987_v32, %v5989_v33 }
 0x200   :  { %v6058_v57 = vpop.f32.mrb[144].mxu1 }
 0x201   :  { %v6060_v55 = vpop.f32.mrb[145].mxu1 }
 0x202   :  { %v6071_v58 = vmax.f32 %v6058_v57, %v6060_v55 }
 0x204   :  { %v6073_v61 = vmax.f32 %v6069_v23, %v6071_v58  ;;  %v6064_v63 = vpop.f32.mrb[146].mxu1 }
 0x205   :  { %v6066_v0 = vpop.f32.mrb[147].mxu1 }
 0x206   :  { %v6072_v1 = vmax.f32 %v6064_v63, %v6066_v0  ;;  %v6075_v60 = vadd.f32 %v6073_v61, %v10656_v25 }
 0x208   :  { %v6074_v4 = vmax.f32 %v6070_v51, %v6072_v1  ;;  %v6273_v5 = vpop.f32.mrb[148].mxu1  ;;  %v6077_v14 = vmax.f32 %v6075_v60, 0.0 }
 0x209   :  { %v6275_v6 = vpop.f32.mrb[149].mxu1 }
 0x20a   :  { %v6076_v8 = vadd.f32 %v6074_v4, %v10676_v41  ;;  %v6361_v12 = vmax.f32 %v6273_v5, %v6275_v6 }
 0x20c   :  { %v6078_v15 = vmax.f32 %v6076_v8, 0.0  ;;  %v6279_v21 = vpop.f32.mrb[150].mxu1 }
 0x20d   :  { %v6281_v24 = vpop.f32.mrb[151].mxu1 }
 0x20e   :  { %v11437_v29 = vpack.c.bf16 %v6078_v15, %v6077_v14  ;;  %v6362_v32 = vmax.f32 %v6279_v21, %v6281_v24 }
 0x210   :  { %v6350_v33 = vpop.f32.mrb[152].mxu1 }
 0x211   :  { %v6352_v23 = vpop.f32.mrb[153].mxu1 }
 0x212   :  { %v6363_v57 = vmax.f32 %v6350_v33, %v6352_v23 }
 0x214   :  { %v6365_v55 = vmax.f32 %v6361_v12, %v6363_v57  ;;  %v6356_v58 = vpop.f32.mrb[154].mxu1 }
 0x215   :  { %v6358_v63 = vpop.f32.mrb[155].mxu1 }
 0x216   :  { %v6364_v61 = vmax.f32 %v6356_v58, %v6358_v63  ;;  %v6367_v51 = vadd.f32 %v6365_v55, %v10656_v25 }
 0x218   :  { %v6366_v0 = vmax.f32 %v6362_v32, %v6364_v61  ;;  %v11440_v1 = vpop.f32.mrb[156].mxu1  ;;  %v6369_v6 = vmax.f32 %v6367_v51, 0.0 }
 0x219   :  { %v11442_v4 = vpop.f32.mrb[157].mxu1 }
 0x21a   :  { %v6368_v60 = vadd.f32 %v6366_v0, %v10676_v41 }
 0x21c   :  { %v6370_v8 = vmax.f32 %v6368_v60, 0.0  ;;  %v11447_v14 = vpop.f32.mrb[158].mxu1 }
 0x21d   :  { %v11449_v12 = vpop.f32.mrb[159].mxu1 }
 0x21e   :  { %v11451_v15 = vpack.c.bf16 %v6370_v8, %v6369_v6 }
 0x220   :  { %v6857_v24 = vpop.f32.mrb[160].mxu1 }
 0x221   :  { %v6859_v32 = vpop.f32.mrb[161].mxu1 }
 0x222   :  { %v1970_v33 = vpop.f32.mrb[10].mxu0  ;;  %v6945_v23 = vmax.f32 %v6857_v24, %v6859_v32 }
 0x223   :  { %v1972_v57 = vpop.f32.mrb[11].mxu0 }
 0x224   :  { %v1983_v55 = vmax.f32 %v1970_v33, %v1972_v57  ;;  %v6863_v58 = vpop.f32.mrb[162].mxu1 }
 0x225   :  { %v6865_v63 = vpop.f32.mrb[163].mxu1 }
 0x226   :  { %v1985_v61 = vmax.f32 %v1981_v44, %v1983_v55  ;;  %v1976_v51 = vpop.f32.mrb[12].mxu0  ;;  %v6946_v0 = vmax.f32 %v6863_v58, %v6865_v63 }
 0x227   :  { %v1978_v60 = vpop.f32.mrb[13].mxu0 }
 0x228   :  { %v1984_v6 = vmax.f32 %v1976_v51, %v1978_v60  ;;  %v6934_v8 = vpop.f32.mrb[164].mxu1  ;;  %v1987_v21 = vadd.f32 %v1985_v61, %v10656_v25 }
 0x229   :  { %v6936_v5 = vpop.f32.mrb[165].mxu1 }
 0x22a   :  { %v1986_v24 = vmax.f32 %v1982_v62, %v1984_v6  ;;  %v6947_v32 = vmax.f32 %v6934_v8, %v6936_v5  ;;  %v1989_v37 = vmax.f32 %v1987_v21, 0.0 }
 0x22c   :  { %v1988_v33 = vadd.f32 %v1986_v24, %v10676_v41  ;;  %v6949_v57 = vmax.f32 %v6945_v23, %v6947_v32  ;;  %v6940_v45 = vpop.f32.mrb[166].mxu1 }
 0x22d   :  { %v6942_v30 = vpop.f32.mrb[167].mxu1 }
 0x22e   :  { %v1990_v40 = vmax.f32 %v1988_v33, 0.0  ;;  %v6948_v44 = vmax.f32 %v6940_v45, %v6942_v30  ;;  %v6951_v58 = vadd.f32 %v6949_v57, %v10656_v25 }
 0x230   :  { %v8915_v55 = vpack.c.bf16 %v1990_v40, %v1989_v37  ;;  %v6950_v63 = vmax.f32 %v6946_v0, %v6948_v44  ;;  %v7149_v51 = vpop.f32.mrb[168].mxu1  ;;  %v6953_v62 = vmax.f32 %v6951_v58, 0.0  ;;  %v7732_v0 = vld [vmem:[%s12118_s3 + $0x98] sm:$0xff]  ;;  %v7762_v40 = vld [vmem:[%s12118_s3 + $0xa8] sm:$0xff] }
 0x231   :  { %v7151_v60 = vpop.f32.mrb[169].mxu1 }
 0x232   :  { %v6952_v61 = vadd.f32 %v6950_v63, %v10676_v41  ;;  %8917 = vmatpush3.bf16.msk.msra.mxu0 %vm10750_vm6, %v8915_v55  ;;  %v7237_v56 = vmax.f32 %v7149_v51, %v7151_v60  ;;  %v7763_v63 = vld [vmem:[%s12118_s3 + $0xb0] sm:$0xff] }
 0x233   :  { %8938 = vmatprep.subr.bf16.mxu0 %v9546_v35 }
 0x234   :  { %v6954_v30 = vmax.f32 %v6952_v61, 0.0  ;;  %v7155_v45 = vpop.f32.mrb[170].mxu1 }
 0x235   :  { %8508 = vmatmul.mubr.msk.f32.vlgmr.msra.gmra.mrb[4].mxu0 %vm444_vm7, %v7731_v53  ;;  %v7157_v5 = vpop.f32.mrb[171].mxu1  ;;  %v7834_v53 = vld [vmem:[%s12115_s0 + $0x518] sm:$0xff] }
 0x236   :  { %v11472_v21 = vpack.c.bf16 %v6954_v30, %v6953_v62  ;;  %8941 = vmatpush3.bf16.msk.msra.mxu0 %vm10750_vm6, %v11320_v19  ;;  %v7238_v23 = vmax.f32 %v7155_v45, %v7157_v5  ;;  %8510 = vmatprep.mubr.msk.f32.mxu0 %vm9547_vm4, %v9543_v7  ;;  %v7733_v19 = vld [vmem:[%s12118_s3 + $0xa0] sm:$0xf]  ;;  %v7794_v45 = vld [vmem:[%s12118_s3 + $0xc8] sm:$0xff]  ;;  %v7795_v5 = vld [vmem:[%s12118_s3 + $0xd0] sm:$0xf] }
 0x237   :  { %8962 = vmatprep.subr.bf16.mxu0 %v9546_v35  ;;  %v7793_v62 = vld [vmem:[%s12118_s3 + $0xc0] sm:$0xff] }
 0x238   :  { %v7226_v6 = vpop.f32.mrb[172].mxu1 }
 0x239   :  { %8511 = vmatmul.mubr.msk.f32.gmra.mrb[6].mxu0 %vm444_vm7, %v7732_v0  ;;  %v7228_v8 = vpop.f32.mrb[173].mxu1  ;;  %v7842_v0 = vld [vmem:[%s12115_s0 + $0x558] sm:$0xff] }
 0x23a   :  { %v7239_v24 = vmax.f32 %v7226_v6, %v7228_v8  ;;  %8513 = vmatprep.mubr.msk.f32.mxu0 %vm9547_vm4, %v9543_v7  ;;  %v7846_v6 = vld [vmem:[%s12115_s0 + $0x578] sm:$0x1] }
 0x23b   :  { %v7824_v8 = vld [vmem:[%s12118_s3 + $0xd8] sm:$0xff] }
 0x23c   :  { %v7241_v32 = vmax.f32 %v7237_v56, %v7239_v24  ;;  %v7232_v33 = vpop.f32.mrb[174].mxu1  ;;  %v7838_v56 = vld [vmem:[%s12115_s0 + $0x538] sm:$0xff] }
 0x23d   :  { %8514 = vmatmul.mubr.msk.f32.gmra.mrb[8].mxu0 %vm444_vm7, %v7733_v19  ;;  %v7234_v57 = vpop.f32.mrb[175].mxu1  ;;  %v9000_v30 = vpack.c.bf16 %v7838_v56, %v7834_v53  ;;  %v9004_v19 = vpack.c.bf16 %v7846_v6, %v7842_v0  ;;  %v7918_v0 = vld [vmem:[%s12118_s3 + $0x128] sm:$0xff]  ;;  %v7919_v6 = vld [vmem:[%s12118_s3 + $0x130] sm:$0xf] }
 0x23e   :  { %v7240_v37 = vmax.f32 %v7232_v33, %v7234_v57  ;;  %8520 = vmatprep.mubr.msk.f32.mxu0 %vm9547_vm4, %v9543_v7  ;;  %v7243_v44 = vadd.f32 %v7241_v32, %v10656_v25  ;;  %v7841_v32 = vld [vmem:[%s12115_s0 + $0x550] sm:$0xff]  ;;  %v7825_v57 = vld [vmem:[%s12118_s3 + $0xe0] sm:$0xff] }
 0x23f   :  { %v7845_v33 = vld [vmem:[%s12115_s0 + $0x570] sm:$0x1] }
 0x240   :  { %v7242_v55 = vmax.f32 %v7238_v23, %v7240_v37  ;;  %v7245_v51 = vmax.f32 %v7243_v44, 0.0  ;;  %v7837_v23 = vld [vmem:[%s12115_s0 + $0x530] sm:$0xff]  ;;  %v9007_v37 = vpack.c.bf16 %v7845_v33, %v7841_v32  ;;  %v7948_v32 = vld [vmem:[%s12118_s3 + $0x138] sm:$0xff] }
 0x241   :  { %8521 = vmatmul.mubr.msk.f32.vlgmr.msra.gmra.mrb[4].mxu0 %vm444_vm7, %v7762_v40  ;;  %v7826_v40 = vld [vmem:[%s12118_s3 + $0xe8] sm:$0xf] }
 0x242   :  { %v7244_v58 = vadd.f32 %v7242_v55, %v10676_v41  ;;  %8965 = vmatpush3.bf16.msk.msra.mxu0 %vm10750_vm6, %v11362_v59  ;;  %8523 = vmatprep.mubr.msk.f32.mxu0 %vm9547_vm4, %v9543_v7  ;;  %v7764_v59 = vld [vmem:[%s12118_s3 + $0xb8] sm:$0xf] }
 0x243   :  { %8986 = vmatprep.subr.bf16.mxu0 %v9546_v35 }
 0x244   :  { %v7246_v60 = vmax.f32 %v7244_v58, 0.0 }
 0x245   :  { %8524 = vmatmul.mubr.msk.f32.gmra.mrb[6].mxu0 %vm444_vm7, %v7763_v63 }
 0x246   :  { %v11508_v61 = vpack.c.bf16 %v7246_v60, %v7245_v51  ;;  %8526 = vmatprep.mubr.msk.f32.mxu0 %vm9547_vm4, %v9543_v7 }
 0x249   :  { %8527 = vmatmul.mubr.msk.f32.gmra.mrb[8].mxu0 %vm444_vm7, %v7764_v59 }
 0x24a   :  { %8533 = vmatprep.mubr.msk.f32.mxu0 %vm9547_vm4, %v9543_v7 }
 0x24d   :  { %8534 = vmatmul.mubr.msk.f32.vlgmr.msra.gmra.mrb[4].mxu0 %vm444_vm7, %v7793_v62 }
 0x24e   :  { %8989 = vmatpush3.bf16.msk.msra.mxu0 %vm10750_vm6, %v11379_v18  ;;  %8536 = vmatprep.mubr.msk.f32.mxu0 %vm9547_vm4, %v9543_v7  ;;  %v7833_v18 = vld [vmem:[%s12115_s0 + $0x510] sm:$0xff] }
 0x24f   :  { %9001 = vmatprep.subr.bf16.mxu0 %v9000_v30  ;;  %v9002_v24 = vpack.c.bf16 %v7837_v23, %v7833_v18  ;;  %v7917_v18 = vld [vmem:[%s12118_s3 + $0x120] sm:$0xff] }
 0x251   :  { %8537 = vmatmul.mubr.msk.f32.gmra.mrb[6].mxu0 %vm444_vm7, %v7794_v45 }
 0x252   :  { %8539 = vmatprep.mubr.msk.f32.mxu0 %vm9547_vm4, %v9543_v7 }
 0x255   :  { %8540 = vmatmul.mubr.msk.f32.gmra.mrb[8].mxu0 %vm444_vm7, %v7795_v5 }
 0x256   :  { %8546 = vmatprep.mubr.msk.f32.mxu0 %vm9547_vm4, %v9543_v7 }
 0x259   :  { %8547 = vmatmul.mubr.msk.f32.vlgmr.msra.gmra.mrb[4].mxu0 %vm444_vm7, %v7824_v8  ;;  %v7961_v8 = vld [vmem:[%s12115_s0 + $0x730] sm:$0xff] }
 0x25a   :  { %8549 = vmatprep.mubr.msk.f32.mxu0 %vm9547_vm4, %v9543_v7  ;;  %9003 = vmatpush1.bf16.msra.mxu0 %v9002_v24  ;;  %v7966_v24 = vld [vmem:[%s12115_s0 + $0x758] sm:$0xff] }
 0x25b   :  { %9006 = vmatprep.subr.msk.bf16.mxu0 %vm9613_vm2, %v9004_v19  ;;  %v7970_v19 = vld [vmem:[%s12115_s0 + $0x778] sm:$0x1] }
 0x25d   :  { %8550 = vmatmul.mubr.msk.f32.gmra.mrb[6].mxu0 %vm444_vm7, %v7825_v57  ;;  %v9100_v57 = vpack.c.bf16 %v7970_v19, %v7966_v24  ;;  %v8074_v19 = vld [vmem:[%s12118_s3 + $0x1a8] sm:$0xf] }
 0x25e   :  { %8552 = vmatprep.mubr.msk.f32.mxu0 %vm9547_vm4, %v9543_v7  ;;  %9009 = vmatpush1.bf16.msk.msra.mxu0 %vm9613_vm2, %v9007_v37  ;;  %v7965_v37 = vld [vmem:[%s12115_s0 + $0x750] sm:$0xff] }
 0x25f   :  { %9010 = vmatprep.subr.bf16.mxu0 %v9546_v35 }
 0x261   :  { %8553 = vmatmul.mubr.msk.f32.gmra.mrb[8].mxu0 %vm444_vm7, %v7826_v40  ;;  %v7969_v40 = vld [vmem:[%s12115_s0 + $0x770] sm:$0x1] }
 0x262   :  { %3136 = vmatprep.mubr.f32.mxu0 %v9543_v7 }
 0x265   :  { %7853 = vmatmul.mubr.msk.f32.vlgmr.msra.gmra.mrb[14].mxu0 %vm50_vm3, %v11268_v54 }
 0x266   :  { %3142 = vmatprep.mubr.f32.mxu0 %v9543_v7 }
 0x269   :  { %7854 = vmatmul.mubr.msk.f32.gmra.mrb[16].mxu0 %vm50_vm3, %v11294_v3 }
 0x26a   :  { %8559 = vmatprep.mubr.msk.f32.mxu0 %vm9547_vm4, %v9543_v7 }
 0x338   :  { %v3138_v44 = vpop.f32.mrb[14].mxu0 }
 0x339   :  { %v3140_v55 = vpop.f32.mrb[15].mxu0 }
 0x33a   :  { %v3151_v58 = vmax.f32 %v3138_v44, %v3140_v55  ;;  %v7949_v44 = vld [vmem:[%s12118_s3 + $0x140] sm:$0xff]  ;;  %v9103_v55 = vpack.c.bf16 %v7969_v40, %v7965_v37 }
 0x33c   :  { %v3153_v63 = vmax.f32 %v3149_v13, %v3151_v58  ;;  %v3144_v51 = vpop.f32.mrb[16].mxu0  ;;  %v7857_v13 = vld [vmem:[%s12118_s3 + $0x100] sm:$0xf]  ;;  %v7950_v58 = vld [vmem:[%s12118_s3 + $0x148] sm:$0xf] }
 0x33d   :  { %v3146_v60 = vpop.f32.mrb[17].mxu0 }
 0x33e   :  { %v3152_v59 = vmax.f32 %v3144_v51, %v3146_v60  ;;  %v3155_v53 = vadd.f32 %v3153_v63, %v10656_v25 }
 0x340   :  { %v3154_v56 = vmax.f32 %v3150_v20, %v3152_v59  ;;  %v3157_v30 = vmax.f32 %v3155_v53, 0.0  ;;  %v7888_v20 = vld [vmem:[%s12118_s3 + $0x118] sm:$0xf] }
 0x342   :  { %v3156_v62 = vadd.f32 %v3154_v56, %v10676_v41 }
 0x344   :  { %v3158_v45 = vmax.f32 %v3156_v62, 0.0 }
 0x346   :  { %v9011_v5 = vpack.c.bf16 %v3158_v45, %v3157_v30 }
 0x348   :  { %9013 = vmatpush3.bf16.msk.msra.mxu0 %vm10750_vm6, %v9011_v5 }
 0x349   :  { %9034 = vmatprep.subr.bf16.mxu0 %v9546_v35 }
 0x34b   :  { %8560 = vmatmul.mubr.msk.f32.vlgmr.msra.gmra.mrb[4].mxu0 %vm444_vm7, %v7855_v9 }
 0x34c   :  { %9037 = vmatpush3.bf16.msk.msra.mxu0 %vm10750_vm6, %v11385_v50  ;;  %8562 = vmatprep.mubr.msk.f32.mxu0 %vm9547_vm4, %v9543_v7  ;;  %v7958_v50 = vld [vmem:[%s12115_s0 + $0x718] sm:$0xff] }
 0x34d   :  { %9058 = vmatprep.subr.bf16.mxu0 %v9546_v35 }
 0x34f   :  { %8563 = vmatmul.mubr.msk.f32.gmra.mrb[6].mxu0 %vm444_vm7, %v7856_v11  ;;  %v8041_v11 = vld [vmem:[%s12118_s3 + $0x180] sm:$0xff] }
 0x350   :  { %8565 = vmatprep.mubr.msk.f32.mxu0 %vm9547_vm4, %v9543_v7 }
 0x353   :  { %8566 = vmatmul.mubr.msk.f32.gmra.mrb[8].mxu0 %vm444_vm7, %v7857_v13 }
 0x354   :  { %8572 = vmatprep.mubr.msk.f32.mxu0 %vm9547_vm4, %v9543_v7 }
 0x357   :  { %8573 = vmatmul.mubr.msk.f32.vlgmr.msra.gmra.mrb[4].mxu0 %vm444_vm7, %v7886_v16  ;;  %v8042_v16 = vld [vmem:[%s12118_s3 + $0x188] sm:$0xff] }
 0x358   :  { %9061 = vmatpush3.bf16.msk.msra.mxu0 %vm10750_vm6, %v11389_v22  ;;  %8575 = vmatprep.mubr.msk.f32.mxu0 %vm9547_vm4, %v9543_v7  ;;  %v7962_v22 = vld [vmem:[%s12115_s0 + $0x738] sm:$0xff] }
 0x359   :  { %9082 = vmatprep.subr.bf16.mxu0 %v9546_v35  ;;  %v9096_v23 = vpack.c.bf16 %v7962_v22, %v7958_v50  ;;  %v8090_v50 = vld [vmem:[%s12115_s0 + $0x958] sm:$0xff] }
 0x35a   :  { %v8094_v22 = vld [vmem:[%s12115_s0 + $0x978] sm:$0x1] }
 0x35b   :  { %8576 = vmatmul.mubr.msk.f32.gmra.mrb[6].mxu0 %vm444_vm7, %v7887_v17  ;;  %v8043_v17 = vld [vmem:[%s12118_s3 + $0x190] sm:$0xf] }
 0x35c   :  { %8578 = vmatprep.mubr.msk.f32.mxu0 %vm9547_vm4, %v9543_v7 }
 0x35f   :  { %8579 = vmatmul.mubr.msk.f32.gmra.mrb[8].mxu0 %vm444_vm7, %v7888_v20  ;;  %v8085_v20 = vld [vmem:[%s12115_s0 + $0x930] sm:$0xff] }
 0x360   :  { %8585 = vmatprep.mubr.msk.f32.mxu0 %vm9547_vm4, %v9543_v7 }
 0x363   :  { %8586 = vmatmul.mubr.msk.f32.vlgmr.msra.gmra.mrb[4].mxu0 %vm444_vm7, %v7917_v18  ;;  %v8072_v18 = vld [vmem:[%s12118_s3 + $0x198] sm:$0xff] }
 0x364   :  { %9085 = vmatpush3.bf16.msk.msra.mxu0 %vm10750_vm6, %v11403_v47  ;;  %8588 = vmatprep.mubr.msk.f32.mxu0 %vm9547_vm4, %v9543_v7  ;;  %v7957_v47 = vld [vmem:[%s12115_s0 + $0x710] sm:$0xff] }
 0x365   :  { %9097 = vmatprep.subr.bf16.mxu0 %v9096_v23  ;;  %v9098_v33 = vpack.c.bf16 %v7961_v8, %v7957_v47  ;;  %v8093_v47 = vld [vmem:[%s12115_s0 + $0x970] sm:$0x1]  ;;  %v8073_v8 = vld [vmem:[%s12118_s3 + $0x1a0] sm:$0xff] }
 0x367   :  { %8589 = vmatmul.mubr.msk.f32.gmra.mrb[6].mxu0 %vm444_vm7, %v7918_v0  ;;  %v9196_v0 = vpack.c.bf16 %v8094_v22, %v8090_v50  ;;  %v12129_v22 = vmax.f32 %v11440_v1, %v11442_v4  ;;  %v8227_v1 = vld [vmem:[%s12118_s3 + $0x210] sm:$0xff]  ;;  %v8258_v4 = vld [vmem:[%s12118_s3 + $0x228] sm:$0xff] }
 0x368   :  { %8591 = vmatprep.mubr.msk.f32.mxu0 %vm9547_vm4, %v9543_v7 }
 0x36b   :  { %8592 = vmatmul.mubr.msk.f32.gmra.mrb[8].mxu0 %vm444_vm7, %v7919_v6  ;;  %v8089_v6 = vld [vmem:[%s12115_s0 + $0x950] sm:$0xff] }
 0x36c   :  { %8598 = vmatprep.mubr.msk.f32.mxu0 %vm9547_vm4, %v9543_v7  ;;  %v9199_v24 = vpack.c.bf16 %v8093_v47, %v8089_v6 }
 0x36f   :  { %8599 = vmatmul.mubr.msk.f32.vlgmr.msra.gmra.mrb[4].mxu0 %vm444_vm7, %v7948_v32  ;;  %v11846_v32 = vld [vmem:[%s12116_s1] sm:$0xff] }
 0x370   :  { %8601 = vmatprep.mubr.msk.f32.mxu0 %vm9547_vm4, %v9543_v7  ;;  %9099 = vmatpush1.bf16.msra.mxu0 %v9098_v33  ;;  %v11854_v33 = vld [vmem:[%s12116_s1 + $0x8] sm:$0x3] }
 0x371   :  { %9102 = vmatprep.subr.msk.bf16.mxu0 %vm9613_vm2, %v9100_v57 }
 0x373   :  { %8602 = vmatmul.mubr.msk.f32.gmra.mrb[6].mxu0 %vm444_vm7, %v7949_v44  ;;  %v12127_v44 = vmax.f32 %v11416_v26, %v11418_v27  ;;  %v8103_v26 = vld [vmem:[%s12118_s3 + $0x1b0] sm:$0xff]  ;;  %v8104_v27 = vld [vmem:[%s12118_s3 + $0x1b8] sm:$0xff] }
 0x374   :  { %8604 = vmatprep.mubr.msk.f32.mxu0 %vm9547_vm4, %v9543_v7  ;;  %9105 = vmatpush1.bf16.msk.msra.mxu0 %vm9613_vm2, %v9103_v55 }
 0x375   :  { %9106 = vmatprep.subr.bf16.mxu0 %v9546_v35 }
 0x377   :  { %8605 = vmatmul.mubr.msk.f32.gmra.mrb[8].mxu0 %vm444_vm7, %v7950_v58 }
 0x378   :  { %4304 = vmatprep.mubr.f32.mxu0 %v9543_v7 }
 0x37b   :  { %7977 = vmatmul.mubr.msk.f32.vlgmr.msra.gmra.mrb[18].mxu0 %vm50_vm3, %v11268_v54 }
 0x37c   :  { %4310 = vmatprep.mubr.f32.mxu0 %v9543_v7 }
 0x37f   :  { %7978 = vmatmul.mubr.msk.f32.gmra.mrb[20].mxu0 %vm50_vm3, %v11294_v3 }
 0x380   :  { %8611 = vmatprep.mubr.msk.f32.mxu0 %vm9547_vm4, %v9543_v7 }
 0x44e   :  { %v4306_v63 = vpop.f32.mrb[18].mxu0 }
 0x44f   :  { %v4308_v51 = vpop.f32.mrb[19].mxu0 }
 0x450   :  { %v4319_v60 = vmax.f32 %v4306_v63, %v4308_v51 }
 0x452   :  { %v4321_v59 = vmax.f32 %v4317_v42, %v4319_v60  ;;  %v4312_v53 = vpop.f32.mrb[20].mxu0  ;;  %v7981_v42 = vld [vmem:[%s12118_s3 + $0x160] sm:$0xf] }
 0x453   :  { %v4314_v56 = vpop.f32.mrb[21].mxu0 }
 0x454   :  { %v4320_v62 = vmax.f32 %v4312_v53, %v4314_v56  ;;  %v4323_v54 = vadd.f32 %v4321_v59, %v10656_v25  ;;  %v12128_v59 = vmax.f32 %v11423_v34, %v11425_v39  ;;  %v8105_v34 = vld [vmem:[%s12118_s3 + $0x1c0] sm:$0xf]  ;;  %v8134_v39 = vld [vmem:[%s12118_s3 + $0x1c8] sm:$0xff] }
 0x456   :  { %v4322_v30 = vmax.f32 %v4318_v48, %v4320_v62  ;;  %v4325_v45 = vmax.f32 %v4323_v54, 0.0  ;;  %v8012_v48 = vld [vmem:[%s12118_s3 + $0x178] sm:$0xf] }
 0x458   :  { %v4324_v3 = vadd.f32 %v4322_v30, %v10676_v41 }
 0x45a   :  { %v4326_v5 = vmax.f32 %v4324_v3, 0.0  ;;  %v8136_v3 = vld [vmem:[%s12118_s3 + $0x1d8] sm:$0xf] }
 0x45c   :  { %v9107_v9 = vpack.c.bf16 %v4326_v5, %v4325_v45  ;;  %v8210_v45 = vld [vmem:[%s12115_s0 + $0xb38] sm:$0xff]  ;;  %v8165_v5 = vld [vmem:[%s12118_s3 + $0x1e0] sm:$0xff] }
 0x45e   :  { %9109 = vmatpush3.bf16.msk.msra.mxu0 %vm10750_vm6, %v9107_v9 }
 0x45f   :  { %9130 = vmatprep.subr.bf16.mxu0 %v9546_v35 }
 0x461   :  { %8612 = vmatmul.mubr.msk.f32.vlgmr.msra.gmra.mrb[4].mxu0 %vm444_vm7, %v7979_v36  ;;  %v8166_v36 = vld [vmem:[%s12118_s3 + $0x1e8] sm:$0xff] }
 0x462   :  { %9133 = vmatpush3.bf16.msk.msra.mxu0 %vm10750_vm6, %v11409_v28  ;;  %8614 = vmatprep.mubr.msk.f32.mxu0 %vm9547_vm4, %v9543_v7  ;;  %v8082_v28 = vld [vmem:[%s12115_s0 + $0x918] sm:$0xff] }
 0x463   :  { %9154 = vmatprep.subr.bf16.mxu0 %v9546_v35 }
 0x465   :  { %8615 = vmatmul.mubr.msk.f32.gmra.mrb[6].mxu0 %vm444_vm7, %v7980_v38  ;;  %v8167_v38 = vld [vmem:[%s12118_s3 + $0x1f0] sm:$0xf] }
 0x466   :  { %8617 = vmatprep.mubr.msk.f32.mxu0 %vm9547_vm4, %v9543_v7 }
 0x469   :  { %8618 = vmatmul.mubr.msk.f32.gmra.mrb[8].mxu0 %vm444_vm7, %v7981_v42  ;;  %v8209_v42 = vld [vmem:[%s12115_s0 + $0xb30] sm:$0xff] }
 0x46a   :  { %8624 = vmatprep.mubr.msk.f32.mxu0 %vm9547_vm4, %v9543_v7 }
 0x46d   :  { %8625 = vmatmul.mubr.msk.f32.vlgmr.msra.gmra.mrb[4].mxu0 %vm444_vm7, %v8010_v46  ;;  %v8214_v46 = vld [vmem:[%s12115_s0 + $0xb58] sm:$0xff] }
 0x46e   :  { %9157 = vmatpush3.bf16.msk.msra.mxu0 %vm10750_vm6, %v11413_v2  ;;  %8627 = vmatprep.mubr.msk.f32.mxu0 %vm9547_vm4, %v9543_v7  ;;  %v8086_v2 = vld [vmem:[%s12115_s0 + $0x938] sm:$0xff] }
 0x46f   :  { %9178 = vmatprep.subr.bf16.mxu0 %v9546_v35  ;;  %v9192_v13 = vpack.c.bf16 %v8086_v2, %v8082_v28 }
 0x471   :  { %8628 = vmatmul.mubr.msk.f32.gmra.mrb[6].mxu0 %vm444_vm7, %v8011_v52  ;;  %v8218_v52 = vld [vmem:[%s12115_s0 + $0xb78] sm:$0x1] }
 0x472   :  { %8630 = vmatprep.mubr.msk.f32.mxu0 %vm9547_vm4, %v9543_v7  ;;  %v9292_v2 = vpack.c.bf16 %v8218_v52, %v8214_v46  ;;  %v8297_v46 = vld [vmem:[%s12120_s5 + $0x20] sm:$0xff] }
 0x475   :  { %8631 = vmatmul.mubr.msk.f32.gmra.mrb[8].mxu0 %vm444_vm7, %v8012_v48  ;;  %v8196_v48 = vld [vmem:[%s12118_s3 + $0x1f8] sm:$0xff] }
 0x476   :  { %8637 = vmatprep.mubr.msk.f32.mxu0 %vm9547_vm4, %v9543_v7 }
 0x479   :  { %8638 = vmatmul.mubr.msk.f32.vlgmr.msra.gmra.mrb[4].mxu0 %vm444_vm7, %v8041_v11  ;;  %v8213_v11 = vld [vmem:[%s12115_s0 + $0xb50] sm:$0xff] }
 0x47a   :  { %9181 = vmatpush3.bf16.msk.msra.mxu0 %vm10750_vm6, %v11427_v43  ;;  %8640 = vmatprep.mubr.msk.f32.mxu0 %vm9547_vm4, %v9543_v7  ;;  %v8081_v43 = vld [vmem:[%s12115_s0 + $0x910] sm:$0xff] }
 0x47b   :  { %9193 = vmatprep.subr.bf16.mxu0 %v9192_v13  ;;  %v9194_v23 = vpack.c.bf16 %v8085_v20, %v8081_v43  ;;  %v8217_v13 = vld [vmem:[%s12115_s0 + $0xb70] sm:$0x1]  ;;  %v8198_v43 = vld [vmem:[%s12118_s3 + $0x208] sm:$0xf] }
 0x47d   :  { %8641 = vmatmul.mubr.msk.f32.gmra.mrb[6].mxu0 %vm444_vm7, %v8042_v16  ;;  %v8197_v16 = vld [vmem:[%s12118_s3 + $0x200] sm:$0xff] }
 0x47e   :  { %8643 = vmatprep.mubr.msk.f32.mxu0 %vm9547_vm4, %v9543_v7 }
 0x481   :  { %8644 = vmatmul.mubr.msk.f32.gmra.mrb[8].mxu0 %vm444_vm7, %v8043_v17  ;;  %v9295_v17 = vpack.c.bf16 %v8217_v13, %v8213_v11 }
 0x482   :  { %8650 = vmatprep.mubr.msk.f32.mxu0 %vm9547_vm4, %v9543_v7 }
 0x485   :  { %8651 = vmatmul.mubr.msk.f32.vlgmr.msra.gmra.mrb[4].mxu0 %vm444_vm7, %v8072_v18 }
 0x486   :  { %8653 = vmatprep.mubr.msk.f32.mxu0 %vm9547_vm4, %v9543_v7  ;;  %9195 = vmatpush1.bf16.msra.mxu0 %v9194_v23 }
 0x487   :  { %9198 = vmatprep.subr.msk.bf16.mxu0 %vm9613_vm2, %v9196_v0 }
 0x489   :  { %8654 = vmatmul.mubr.msk.f32.gmra.mrb[6].mxu0 %vm444_vm7, %v8073_v8  ;;  %v12130_v8 = vmax.f32 %v11447_v14, %v11449_v12  ;;  %v8260_v14 = vld [vmem:[%s12118_s3 + $0x238] sm:$0xf]  ;;  %v8290_v12 = vld [vmem:[%s12118_s3 + $0x248] sm:$0xff] }
 0x48a   :  { %8656 = vmatprep.mubr.msk.f32.mxu0 %vm9547_vm4, %v9543_v7  ;;  %9201 = vmatpush1.bf16.msk.msra.mxu0 %vm9613_vm2, %v9199_v24 }
 0x48b   :  { %9202 = vmatprep.subr.bf16.mxu0 %v9546_v35 }
 0x48d   :  { %8657 = vmatmul.mubr.msk.f32.gmra.mrb[8].mxu0 %vm444_vm7, %v8074_v19 }
 0x48e   :  { %5472 = vmatprep.mubr.f32.mxu0 %v9543_v7 }
 0x491   :  { %8101 = vmatmul.mubr.msk.f32.vlgmr.msra.gmra.mrb[22].mxu0 %vm50_vm3, %v11846_v32 }
 0x492   :  { %5478 = vmatprep.mubr.f32.mxu0 %v9543_v7 }
 0x495   :  { %8102 = vmatmul.mubr.msk.f32.gmra.mrb[24].mxu0 %vm50_vm3, %v11854_v33 }
 0x496   :  { %8663 = vmatprep.mubr.msk.f32.mxu0 %vm9547_vm4, %v9543_v7 }
 0x564   :  { %v5474_v57 = vpop.f32.mrb[22].mxu0 }
 0x565   :  { %v5476_v37 = vpop.f32.mrb[23].mxu0 }
 0x566   :  { %v5487_v40 = vmax.f32 %v5474_v57, %v5476_v37 }
 0x568   :  { %v5489_v55 = vmax.f32 %v12127_v44, %v5487_v40  ;;  %v5480_v58 = vpop.f32.mrb[24].mxu0 }
 0x569   :  { %v5482_v63 = vpop.f32.mrb[25].mxu0 }
 0x56a   :  { %v5488_v51 = vmax.f32 %v5480_v58, %v5482_v63  ;;  %v5491_v60 = vadd.f32 %v5489_v55, %v10656_v25  ;;  %v31_v55 = vld [vmem:[%s12119_s4] sm:$0xff]  ;;  %v32_v63 = vld [vmem:[%s12119_s4 + $0x8] sm:$0xff] }
 0x56c   :  { %v5490_v53 = vmax.f32 %v12128_v59, %v5488_v51  ;;  %v5493_v62 = vmax.f32 %v5491_v60, 0.0  ;;  %v33_v51 = vld [vmem:[%s12119_s4 + $0x10] sm:$0xf] }
 0x56e   :  { %v5492_v56 = vadd.f32 %v5490_v53, %v10676_v41 }
 0x570   :  { %v5494_v54 = vmax.f32 %v5492_v56, 0.0 }
 0x572   :  { %v9203_v30 = vpack.c.bf16 %v5494_v54, %v5493_v62 }
 0x574   :  { %9205 = vmatpush3.bf16.msk.msra.mxu0 %vm10750_vm6, %v9203_v30 }
 0x575   :  { %9226 = vmatprep.subr.bf16.mxu0 %v9546_v35 }
 0x577   :  { %8664 = vmatmul.mubr.msk.f32.vlgmr.msra.gmra.mrb[4].mxu0 %vm444_vm7, %v8103_v26 }
 0x578   :  { %9229 = vmatpush3.bf16.msk.msra.mxu0 %vm10750_vm6, %v11433_v49  ;;  %8666 = vmatprep.mubr.msk.f32.mxu0 %vm9547_vm4, %v9543_v7  ;;  %v8135_v49 = vld [vmem:[%s12118_s3 + $0x1d0] sm:$0xff] }
 0x579   :  { %9250 = vmatprep.subr.bf16.mxu0 %v9546_v35 }
 0x57b   :  { %8667 = vmatmul.mubr.msk.f32.gmra.mrb[6].mxu0 %vm444_vm7, %v8104_v27 }
 0x57c   :  { %8669 = vmatprep.mubr.msk.f32.mxu0 %vm9547_vm4, %v9543_v7 }
 0x57f   :  { %8670 = vmatmul.mubr.msk.f32.gmra.mrb[8].mxu0 %vm444_vm7, %v8105_v34 }
 0x580   :  { %8676 = vmatprep.mubr.msk.f32.mxu0 %vm9547_vm4, %v9543_v7 }
 0x583   :  { %8677 = vmatmul.mubr.msk.f32.vlgmr.msra.gmra.mrb[4].mxu0 %vm444_vm7, %v8134_v39 }
 0x584   :  { %9253 = vmatpush3.bf16.msk.msra.mxu0 %vm10750_vm6, %v11437_v29  ;;  %8679 = vmatprep.mubr.msk.f32.mxu0 %vm9547_vm4, %v9543_v7  ;;  %v8206_v29 = vld [vmem:[%s12115_s0 + $0xb18] sm:$0xff] }
 0x585   :  { %9274 = vmatprep.subr.bf16.mxu0 %v9546_v35  ;;  %v9288_v9 = vpack.c.bf16 %v8210_v45, %v8206_v29  ;;  %v7401_v29 = vld [vmem:[%s12120_s5] sm:$0xff] }
 0x587   :  { %8680 = vmatmul.mubr.msk.f32.gmra.mrb[6].mxu0 %vm444_vm7, %v8135_v49 }
 0x588   :  { %8682 = vmatprep.mubr.msk.f32.mxu0 %vm9547_vm4, %v9543_v7 }
 0x58b   :  { %8683 = vmatmul.mubr.msk.f32.gmra.mrb[8].mxu0 %vm444_vm7, %v8136_v3 }
 0x58c   :  { %8689 = vmatprep.mubr.msk.f32.mxu0 %vm9547_vm4, %v9543_v7 }
 0x58f   :  { %8690 = vmatmul.mubr.msk.f32.vlgmr.msra.gmra.mrb[4].mxu0 %vm444_vm7, %v8165_v5 }
 0x590   :  { %9277 = vmatpush3.bf16.msk.msra.mxu0 %vm10750_vm6, %v11451_v15  ;;  %8692 = vmatprep.mubr.msk.f32.mxu0 %vm9547_vm4, %v9543_v7  ;;  %v8205_v15 = vld [vmem:[%s12115_s0 + $0xb10] sm:$0xff]  ;;  %s9549_s0 = smov 64  }
 0x591   :  { %9289 = vmatprep.subr.bf16.mxu0 %v9288_v9  ;;  %v9290_v28 = vpack.c.bf16 %v8209_v42, %v8205_v15  ;;  %v8296_v9 = vld [vmem:[%s12120_s5 + $0x18] sm:$0xff]  ;;  %v7402_v42 = vld [vmem:[%s12120_s5 + $0x8] sm:$0xff] }
 0x593   :  { %8693 = vmatmul.mubr.msk.f32.gmra.mrb[6].mxu0 %vm444_vm7, %v8166_v36 }
 0x594   :  { %8695 = vmatprep.mubr.msk.f32.mxu0 %vm9547_vm4, %v9543_v7 }
 0x597   :  { %8696 = vmatmul.mubr.msk.f32.gmra.mrb[8].mxu0 %vm444_vm7, %v8167_v38 }
 0x598   :  { %8702 = vmatprep.mubr.msk.f32.mxu0 %vm9547_vm4, %v9543_v7 }
 0x59b   :  { %8703 = vmatmul.mubr.msk.f32.vlgmr.msra.gmra.mrb[4].mxu0 %vm444_vm7, %v8196_v48 }
 0x59c   :  { %8705 = vmatprep.mubr.msk.f32.mxu0 %vm9547_vm4, %v9543_v7  ;;  %9291 = vmatpush1.bf16.msra.mxu0 %v9290_v28 }
 0x59d   :  { %9294 = vmatprep.subr.msk.bf16.mxu0 %vm9613_vm2, %v9292_v2 }
 0x59f   :  { %8706 = vmatmul.mubr.msk.f32.gmra.mrb[6].mxu0 %vm444_vm7, %v8197_v16  ;;  %v7403_v16 = vld [vmem:[%s12120_s5 + $0x10] sm:$0xf] }
 0x5a0   :  { %8708 = vmatprep.mubr.msk.f32.mxu0 %vm9547_vm4, %v9543_v7  ;;  %9297 = vmatpush1.bf16.msk.msra.mxu0 %vm9613_vm2, %v9295_v17  ;;  %v8298_v17 = vld [vmem:[%s12120_s5 + $0x28] sm:$0xf]  ;;  %vm7524_vm2 = vcmask 9216  }
 0x5a1   :  { %9298 = vmatprep.subr.bf16.mxu0 %v9546_v35 }
 0x5a3   :  { %8709 = vmatmul.mubr.msk.f32.gmra.mrb[8].mxu0 %vm444_vm7, %v8198_v43 }
 0x5a4   :  { %6640 = vmatprep.mubr.f32.mxu0 %v9543_v7 }
 0x5a7   :  { %8225 = vmatmul.mubr.msk.f32.vlgmr.msra.gmra.mrb[26].mxu0 %vm50_vm3, %v11846_v32 }
 0x5a8   :  { %6646 = vmatprep.mubr.f32.mxu0 %v9543_v7 }
 0x5ab   :  { %8226 = vmatmul.mubr.msk.f32.gmra.mrb[28].mxu0 %vm50_vm3, %v11854_v33 }
 0x5ac   :  { %8715 = vmatprep.mubr.msk.f32.mxu0 %vm9547_vm4, %v9543_v7 }
 0x67a   :  { %v6642_v20 = vpop.f32.mrb[26].mxu0 }
 0x67b   :  { %v6644_v10 = vpop.f32.mrb[27].mxu0 }
 0x67c   :  { %v6655_v50 = vmax.f32 %v6642_v20, %v6644_v10 }
 0x67e   :  { %v6657_v18 = vmax.f32 %v12129_v22, %v6655_v50  ;;  %v6648_v23 = vpop.f32.mrb[28].mxu0 }
 0x67f   :  { %v6650_v0 = vpop.f32.mrb[29].mxu0 }
 0x680   :  { %v6656_v6 = vmax.f32 %v6648_v23, %v6650_v0  ;;  %v6659_v47 = vadd.f32 %v6657_v18, %v10656_v25  ;;  %v8228_v25 = vld [vmem:[%s12118_s3 + $0x218] sm:$0xff] }
 0x682   :  { %v6658_v24 = vmax.f32 %v12130_v8, %v6656_v6  ;;  %v6661_v32 = vmax.f32 %v6659_v47, 0.0 }
 0x684   :  { %v6660_v19 = vadd.f32 %v6658_v24, %v10676_v41  ;;  %v8229_v41 = vld [vmem:[%s12118_s3 + $0x220] sm:$0xf] }
 0x686   :  { %v6662_v33 = vmax.f32 %v6660_v19, 0.0 }
 0x688   :  { %v9299_v57 = vpack.c.bf16 %v6662_v33, %v6661_v32 }
 0x68a   :  { %9301 = vmatpush3.bf16.msk.msra.mxu0 %vm10750_vm6, %v9299_v57 }
 0x68b   :  { %9322 = vmatprep.subr.bf16.mxu0 %v9546_v35 }
 0x68d   :  { %8716 = vmatmul.mubr.msk.f32.vlgmr.msra.gmra.mrb[4].mxu0 %vm444_vm7, %v8227_v1 }
 0x68e   :  { %9325 = vmatpush3.bf16.msk.msra.mxu0 %vm10750_vm6, %v11472_v21  ;;  %8718 = vmatprep.mubr.msk.f32.mxu0 %vm9547_vm4, %v9543_v7  ;;  %v8291_v21 = vld [vmem:[%s12118_s3 + $0x250] sm:$0xf] }
 0x68f   :  { %9346 = vmatprep.subr.bf16.mxu0 %v9546_v35  ;;  %v8259_v35 = vld [vmem:[%s12118_s3 + $0x230] sm:$0xff] }
 0x691   :  { %8719 = vmatmul.mubr.msk.f32.gmra.mrb[6].mxu0 %vm444_vm7, %v8228_v25 }
 0x692   :  { %8721 = vmatprep.mubr.msk.f32.mxu0 %vm9547_vm4, %v9543_v7 }
 0x695   :  { %8722 = vmatmul.mubr.msk.f32.gmra.mrb[8].mxu0 %vm444_vm7, %v8229_v41 }
 0x696   :  { %8728 = vmatprep.mubr.msk.f32.mxu0 %vm9547_vm4, %v9543_v7 }
 0x699   :  { %8729 = vmatmul.mubr.msk.f32.vlgmr.msra.gmra.mrb[4].mxu0 %vm444_vm7, %v8258_v4 }
 0x69a   :  { %9349 = vmatpush3.bf16.msk.msra.mxu0 %vm10750_vm6, %v11508_v61  ;;  %8731 = vmatprep.mubr.msk.f32.mxu0 %vm9547_vm4, %v9543_v7 }
 0x69d   :  { %8732 = vmatmul.mubr.msk.f32.gmra.mrb[6].mxu0 %vm444_vm7, %v8259_v35 }
 0x69e   :  { %8734 = vmatprep.mubr.msk.f32.mxu0 %vm9547_vm4, %v9543_v7 }
 0x6a1   :  { %8735 = vmatmul.mubr.msk.f32.gmra.mrb[8].mxu0 %vm444_vm7, %v8260_v14 }
 0x6a2   :  { %8741 = vmatprep.mubr.msk.f32.mxu0 %vm9547_vm4, %v9543_v7 }
 0x6a5   :  { %8742 = vmatmul.mubr.msk.f32.vlgmr.msra.gmra.mrb[4].mxu0 %vm444_vm7, %v8289_v31 }
 0x6a6   :  { %8744 = vmatprep.mubr.msk.f32.mxu0 %vm9547_vm4, %v9543_v7 }
 0x6a9   :  { %8745 = vmatmul.mubr.msk.f32.gmra.mrb[6].mxu0 %vm444_vm7, %v8290_v12 }
 0x6aa   :  { %8747 = vmatprep.mubr.msk.f32.mxu0 %vm9547_vm4, %v9543_v7 }
 0x6ad   :  { %8748 = vmatmul.mubr.msk.f32.gmra.mrb[8].mxu0 %vm444_vm7, %v8291_v21 }
 0x778   :  { %v7329_v61 = vpop.f32.mrb[4].mxu0 }
 0x779   :  { %7349 = vrot.lane.b32.xlu1 %v7329_v61, %s9548_s12  ;;  %v8743_v37 = vpop.f32.mrb[5].mxu0 }
 0x77c   :  { %v7334_v40 = vpop.f32.mrb[6].mxu0 }
 0x77d   :  { %7351 = vrot.lane.b32.xlu1 %v7334_v40, %s9548_s12  ;;  %v8746_v44 = vpop.f32.mrb[7].mxu0 }
 0x780   :  { %v7339_v58 = vpop.f32.mrb[8].mxu0 }
 0x781   :  { %7353 = vrot.lane.b32.xlu0 %v7339_v58, %s9548_s12  ;;  %v8749_v7 = vpop.f32.mrb[9].mxu0  ;;  %7378 = vperm.xlu1 %9512, %v31_v55   ;;  %s9519_s12 = scalar_lea.vmem %s7533_s11, 32 }
 0x782   :  { %p9520_p0 = scmp.ne.s32.totalorder %s7533_s11, %s9519_s12  ;;  %p9525_p2 = scmp.lt.s32.totalorder %s9519_s12, %s9519_s12 }
 0x784   :  { %p9526_p3 = por %p9525_p2, %p9524_p1 }
 0x785   :  { %7383 = vperm.xlu0 %9511, %v32_v63   ;;  %7388 = vperm.xlu1 %9512, %v33_v51  }
 0x786   :  { %p9527_p4 = pnand %p9526_p3, %p9520_p0 }
 0x7eb   :  { %v7350_v60 = vpop.permute.xlu1 %7349 }
 0x7ec   :  { %v7358_v59 = vmax.f32 %v7329_v61, %v7350_v60 }
 0x7ee   :  { %7364 = vrot.lane.b32.xlu0 %v7358_v59, %s9549_s0 }
 0x7ef   :  { %v7352_v53 = vpop.permute.xlu1 %7351 }
 0x7f0   :  { %v7359_v56 = vmax.f32 %v7334_v40, %v7352_v53 }
 0x7f2   :  { %7366 = vrot.lane.b32.xlu1 %v7359_v56, %s9549_s0 }
 0x7f3   :  { %v7354_v62 = vpop.permute.xlu0 %7353 }
 0x7f4   :  { %v7360_v54 = vmax.f32 %v7339_v58, %v7354_v62 }
 0x7f6   :  { %7368 = vrot.lane.b32.xlu0 %v7360_v54, %s9549_s0 }
 0x800   :  { %v7379_v30 = vpop.permute.xlu1 %7378 }
 0x804   :  { %v7384_v26 = vpop.permute.xlu0 %7383  ;;  %v7389_v27 = vpop.permute.xlu1 %7388 }
 0x860   :  { %v7365_v34 = vpop.permute.xlu0 %7364 }
 0x861   :  { %v7373_v39 = vmax.f32 %v7358_v59, %v7365_v34 }
 0x863   :  { %v7391_v49 = vadd.f32 %v7379_v30, %v7373_v39 }
 0x864   :  { %v7367_v3 = vpop.permute.xlu1 %7366 }
 0x865   :  { %v7394_v45 = vmax.f32 %v7391_v49, 0.0  ;;  %v7374_v5 = vmax.f32 %v7359_v56, %v7367_v3 }
 0x867   :  { %v7392_v36 = vadd.f32 %v7384_v26, %v7374_v5  ;;  %v7404_v38 = vmul.f32 %v7401_v29, %v7394_v45  ;;  %v7464_v28 = vmul.f32 %v8296_v9, %v7394_v45 }
 0x868   :  { %v7369_v15 = vpop.permute.xlu0 %7368 }
 0x869   :  { %v7395_v52 = vmax.f32 %v7392_v36, 0.0  ;;  %v7375_v48 = vmax.f32 %v7360_v54, %v7369_v15  ;;  %7432 = vrot.lane.b32.xlu1 %v7404_v38, %s9550_s24  ;;  %v7467_v20 = vsel %vm7407_vm8, %v7464_v28, 0.0  ;;  %v7408_v47 = vsel %vm7407_vm8, %v7404_v38, 0.0 }
 0x86b   :  { %v7393_v2 = vadd.f32 %v7389_v27, %v7375_v48  ;;  %v7405_v11 = vmul.f32 %v7402_v42, %v7395_v52  ;;  %v7465_v13 = vmul.f32 %v8297_v46, %v7395_v52  ;;  %v7397_v48 = vlaneseq }
 0x86d   :  { %v7396_v43 = vmax.f32 %v7393_v2, 0.0  ;;  %7434 = vrot.lane.b32.xlu0 %v7405_v11, %s9550_s24  ;;  %v7468_v10 = vsel %vm7407_vm8, %v7465_v13, 0.0  ;;  %v7409_v6 = vsel %vm7407_vm8, %v7405_v11, 0.0  ;;  %v7400_v2 = vand.u32 127, %v7397_v48 }
 0x86e   :  { %v7469_v50 = vadd.f32 %v7468_v10, %v7467_v20  ;;  %v7410_v24 = vadd.f32 %v7409_v6, %v7408_v47 }
 0x86f   :  { %v7406_v22 = vmul.f32 %v7403_v16, %v7396_v43  ;;  %v7466_v18 = vmul.f32 %v8298_v17, %v7396_v43  ;;  %vm7424_vm12 = vcmp.eq.s32.totalorder %v7400_v2, 0  ;;  %vm7481_vm14 = vcmp.eq.s32.totalorder %v7400_v2, 1 }
 0x871   :  { %7489 = vrot.lane.b32.xlu0 %v7464_v28, %s9550_s24  ;;  %7436 = vrot.lane.b32.xlu1 %v7406_v22, %s9550_s24  ;;  %v7470_v23 = vsel %vm7411_vm9, %v7466_v18, 0.0  ;;  %v7412_v8 = vsel %vm7411_vm9, %v7406_v22, 0.0  ;;  %v7398_v28 = vshrl.u32 %v7397_v48, 7 }
 0x872   :  { %v7471_v0 = vadd.f32 %v7470_v23, %v7469_v50  ;;  %v7413_v19 = vadd.f32 %v7412_v8, %v7410_v24  ;;  %v8299_v23 = vld [vmem:[%s12121_s6] ss:$0 sm:$0xff] }
 0x873   :  { %vm7455_vm10 = vcmp.eq.s32.totalorder %v7398_v28, 1  ;;  %vm7423_vm11 = vcmp.eq.s32.totalorder %v7398_v28, 0 }
 0x874   :  { %vm7456_vm13 = vmand %vm7455_vm10, %vm7424_vm12 }
 0x875   :  { %7493 = vrot.lane.b32.xlu0 %v7466_v18, %s9550_s24  ;;  %7491 = vrot.lane.b32.xlu1 %v7465_v13, %s9550_s24  ;;  %vm7425_vm15 = vmand %vm7423_vm11, %vm7424_vm12 }
 0x876   :  { %vm7482_vm0 = vmand %vm7423_vm11, %vm7481_vm14 }
 0x877   :  { %vm7512_vm1 = vmand %vm7455_vm10, %vm7481_vm14 }
 0x899   :  { %7414 = vadd.xlane.f32.xlu1 %v7413_v19 }
 0x8db   :  { %v7433_v32 = vpop.permute.xlu1 %7432 }
 0x8dc   :  { %v7441_v1 = vsel %vm7407_vm8, %v7433_v32, 0.0 }
 0x8df   :  { %v7435_v33 = vpop.permute.xlu0 %7434 }
 0x8e0   :  { %v7442_v57 = vsel %vm7407_vm8, %v7435_v33, 0.0 }
 0x8e1   :  { %v7443_v25 = vadd.f32 %v7442_v57, %v7441_v1 }
 0x8e3   :  { %v7437_v41 = vpop.permute.xlu1 %7436  ;;  %v7490_v4 = vpop.permute.xlu0 %7489 }
 0x8e4   :  { %v7444_v35 = vsel %vm7411_vm9, %v7437_v41, 0.0  ;;  %v7498_v21 = vsel %vm7407_vm8, %v7490_v4, 0.0 }
 0x8e5   :  { %v7445_v14 = vadd.f32 %v7444_v35, %v7443_v25 }
 0x8e7   :  { %v7492_v31 = vpop.permute.xlu1 %7491  ;;  %7446 = vadd.xlane.f32.xlu0 %v7445_v14  ;;  %v7494_v12 = vpop.permute.xlu0 %7493 }
 0x8e8   :  { %v7499_v61 = vsel %vm7407_vm8, %v7492_v31, 0.0  ;;  %v7501_v40 = vsel %vm7411_vm9, %v7494_v12, 0.0 }
 0x8e9   :  { %v7500_v37 = vadd.f32 %v7499_v61, %v7498_v21 }
 0x8eb   :  { %7472 = vadd.xlane.f32.xlu0 %v7471_v0  ;;  %v7502_v44 = vadd.f32 %v7501_v40, %v7500_v37 }
 0x8ed   :  { %7503 = vadd.xlane.f32.xlu1 %v7502_v44 }
 0x926   :  { %v7415_v55 = vpop.xlane.xlu1 %7414 }
 0x927   :  { %v7416_v58 = vrot.slane %v7415_v55, 4 }
 0x929   :  { %v7417_v7 = vadd.f32 %v7416_v58, %v7415_v55 }
 0x92b   :  { %v7418_v63 = vrot.slane %v7417_v7, 2 }
 0x92d   :  { %v7419_v51 = vadd.f32 %v7418_v63, %v7417_v7 }
 0x92f   :  { %v7420_v60 = vrot.slane %v7419_v51, 1 }
 0x931   :  { %v7421_v59 = vadd.f32 %v7420_v60, %v7419_v51 }
 0x933   :  { %9494 = vpush %v7421_v59 }
 0x964   :  { %s9495_s5 = spop %9494 }
 0x965   :  { %v7426_v11 = vstv %s9495_s5 }
 0x966   :  { %v7427_v17 = vsel %vm7425_vm15, %v7426_v11, 0.0 }
 0x974   :  { %v7447_v53 = vpop.xlane.xlu0 %7446 }
 0x975   :  { %v7448_v56 = vrot.slane %v7447_v53, 4 }
 0x977   :  { %v7449_v62 = vadd.f32 %v7448_v56, %v7447_v53 }
 0x978   :  { %v7473_v54 = vpop.xlane.xlu0 %7472 }
 0x979   :  { %v7450_v30 = vrot.slane %v7449_v62, 2  ;;  %v7474_v26 = vrot.slane %v7473_v54, 4 }
 0x97a   :  { %v7504_v27 = vpop.xlane.xlu1 %7503 }
 0x97b   :  { %v7475_v34 = vadd.f32 %v7474_v26, %v7473_v54  ;;  %v7505_v39 = vrot.slane %v7504_v27, 4  ;;  %v7451_v49 = vadd.f32 %v7450_v30, %v7449_v62 }
 0x97d   :  { %v7476_v3 = vrot.slane %v7475_v34, 2  ;;  %v7506_v29 = vadd.f32 %v7505_v39, %v7504_v27  ;;  %v7452_v45 = vrot.slane %v7451_v49, 1 }
 0x97f   :  { %v7477_v5 = vadd.f32 %v7476_v3, %v7475_v34  ;;  %v7507_v9 = vrot.slane %v7506_v29, 2  ;;  %v7453_v36 = vadd.f32 %v7452_v45, %v7451_v49 }
 0x981   :  { %v7508_v38 = vadd.f32 %v7507_v9, %v7506_v29  ;;  %9496 = vpush %v7453_v36  ;;  %v7478_v15 = vrot.slane %v7477_v5, 1 }
 0x983   :  { %v7479_v42 = vadd.f32 %v7478_v15, %v7477_v5  ;;  %v7509_v46 = vrot.slane %v7508_v38, 1 }
 0x985   :  { %9498 = vpush %v7479_v42  ;;  %v7510_v52 = vadd.f32 %v7509_v46, %v7508_v38 }
 0x987   :  { %9500 = vpush %v7510_v52 }
 0x9b2   :  { %s9497_s1 = spop %9496 }
 0x9b3   :  { %v7457_v13 = vstv %s9497_s1 }
 0x9b4   :  { %v7458_v16 = vsel %vm7456_vm13, %v7457_v13, 0.0 }
 0x9b5   :  { %v7459_v43 = vadd.f32 %v7458_v16, %v7427_v17 }
 0x9b6   :  { %s9499_s29 = spop %9498 }
 0x9b7   :  { %v7483_v20 = vstv %s9499_s29 }
 0x9b8   :  { %v7484_v10 = vsel %vm7482_vm0, %v7483_v20, 0.0  ;;  %s9501_s30 = spop %9500 }
 0x9b9   :  { %v7485_v50 = vadd.f32 %v7484_v10, %v7459_v43  ;;  %v7513_v22 = vstv %s9501_s30 }
 0x9ba   :  { %v7514_v18 = vsel %vm7512_vm1, %v7513_v22, 0.0 }
 0x9bb   :  { %v7515_v0 = vadd.f32 %v7514_v18, %v7485_v50 }
 0x9bd   :  { %v7523_v6 = vadd.f32 %v8299_v23, %v7515_v0 }
 0x9bf   :  { %7525 = vst.msk [vmem:[#allocation2] sm:$0x3] %vm7524_vm2, %v7523_v6 }
 0x9c0   :  { %9530 = shalt.err (!%p9527_p4)
}
 0x9c1   :  { %s9531_s14 = scalar_lea.hbm %s12122_s7, 32 }
 0x9c2   :  { %p9532_p5 = scmp.ne.s32.totalorder %s12122_s7, %s9531_s14  ;;  %p9535_p6 = scmp.lt.u32.totalorder %s9531_s14, %s12122_s7 }
 0x9c4   :  { %p9537_p7 = pnand %p9535_p6, %p9532_p5 }
 0x9c6   :  { %9540 = shalt.err (!%p9537_p7)
}
 0x9c7   :  { %7535 = dma.vmem_to_hbm [thread:$0]  %s7533_s11, 32, %s12122_s7, [#allocation3]  }
 0x9c8   :  { %9541 = dma.done.wait [#allocation3], 32  }
 0x9c9   :  { %9542 = vsyncadd [#allocation3], 4294967264 }
 0x9ca   :  { %7539 = vsyncpa [#allocation3], 1 }

</bundles_post_ra>
